<compile_context>
chip_gen: v7x
topology: tpu7x:2x2x1
jax: 0.10.0
libtpu: 0.0.40
codegen_flags: <defaults>
</compile_context>

<pallas_src>
import math

import jax
import jax.numpy as jnp
from jax import lax
from jax.experimental import pallas as pl
from jax.experimental.pallas import tpu as pltpu

C_IN = 24        # conv in/out channels
KSZ = 3          # conv kernel size
H = 64           # LSTM hidden size
N_LAYERS = 5     # LSTM layers
L = 9            # sequence length (576 = L * H in linear1)
NEG_SLOPE = 0.01 # F.leaky_relu default


# ------------------------------- Pallas kernel -------------------------------
def cnnlstm_kernel(patches_ref,                      # (L*bt, 3*C_IN) f32, row = t*bt + b
                   conv_w_ref, conv_b_ref,           # (3*C_IN, H), (1, H)   [zero-padded past C_IN]
                   w_ih_ref, w_hh_ref, b_ref,        # (5, H, 4H), (5, H, 4H), (5, 1, 4H)  gate order (i,f,o,g)
                   fc1_w_ref, fc1_b_ref,             # (L*H, 256), (1, 256)
                   fc2_w_ref, fc2_b_ref,             # (256, 128), (1, 128)
                   fc3_w_ref, fc3_b_ref,             # (128, 1), (1, 1)
                   out_ref,                          # (bt, 1)
                   seq_scr,                          # VMEM (L*bt, H)
                   xw_scr,                           # VMEM (L*bt, 4H)
                   flat_scr):                        # VMEM (bt, L*H)
    rows = patches_ref.shape[0]
    bt = rows // L                                   # batch rows in this grid block (multiple of 8)

    def leaky(v):
        return jnp.where(v > 0, v, NEG_SLOPE * v)

    # ---- Conv1d(24, 24, k=3, pad=1): single im2col matmul over all (t, b) rows.
    # Output features >= 24 are exactly zero (zero-padded weights/bias), matching
    # the zero-padded layer-0 LSTM input weights.
    y = jnp.dot(patches_ref[...], conv_w_ref[...],
                preferred_element_type=jnp.float32) + conv_b_ref[...]
    seq_scr[...] = leaky(y)                          # (L*bt, H)

    zeros = jnp.zeros((bt, H), jnp.float32)

    # ---- 5-layer LSTM, batch_first.  Gates packed as (i, f, o, g). ----
    for layer in range(N_LAYERS):
        # Hoisted input projection: whole-sequence x @ W_ih + bias, one matmul.
        xw_scr[...] = (jnp.dot(seq_scr[...], w_ih_ref[layer],
                               preferred_element_type=jnp.float32)
                       + b_ref[layer])
        w_hh = w_hh_ref[layer]                       # (H, 4H)

        def step(t, carry, w_hh=w_hh):
            h, c = carry
            row0 = pl.multiple_of(t * bt, bt)        # bt is a multiple of 8 -> aligned slices
            gates = (xw_scr[pl.ds(row0, bt), :]
                     + jnp.dot(h, w_hh, preferred_element_type=jnp.float32))
            sig = jax.nn.sigmoid(gates[:, :3 * H])   # i, f, o — one EUP pass
            g_g = jnp.tanh(gates[:, 3 * H:])         # g       — one EUP pass
            c = sig[:, H:2 * H] * c + sig[:, :H] * g_g
            h = sig[:, 2 * H:3 * H] * jnp.tanh(c)
            seq_scr[pl.ds(row0, bt), :] = h          # layer output for next layer
            return h, c

        lax.fori_loop(0, L, step, (zeros, zeros))

    # ---- flatten layer-5 outputs -> (bt, L*H), matching torch.reshape(x, (B, -1))
    for t in range(L):
        flat_scr[:, t * H:(t + 1) * H] = seq_scr[t * bt:(t + 1) * bt, :]

    # ---- linear1(576 -> 256) as a single K=576 matmul, then linear2, linear3 ----
    x1 = leaky(jnp.dot(flat_scr[...], fc1_w_ref[...],
                       preferred_element_type=jnp.float32) + fc1_b_ref[...])
    x2 = leaky(jnp.dot(x1, fc2_w_ref[...],
                       preferred_element_type=jnp.float32) + fc2_b_ref[...])
    out_ref[...] = (jnp.dot(x2, fc3_w_ref[...],
                            preferred_element_type=jnp.float32) + fc3_b_ref[...])


# --------------------------- parameters (PyTorch layout) ---------------------
def init_params(key):
    keys = iter(jax.random.split(key, 32))

    def u(shape, bound):
        return jax.random.uniform(next(keys), shape, jnp.float32, -bound, bound)

    p = {}
    cb = 1.0 / math.sqrt(C_IN * KSZ)
    p["conv_w"] = u((C_IN, C_IN, KSZ), cb)       # (out, in, k)
    p["conv_b"] = u((C_IN,), cb)

    hb = 1.0 / math.sqrt(H)
    p["lstm"] = []
    for layer in range(N_LAYERS):
        in_dim = C_IN if layer == 0 else H
        p["lstm"].append(dict(
            w_ih=u((4 * H, in_dim), hb),
            w_hh=u((4 * H, H), hb),
            b_ih=u((4 * H,), hb),
            b_hh=u((4 * H,), hb)))

    p["w1"] = u((256, L * H), 1.0 / math.sqrt(L * H)); p["b1"] = u((256,), 1.0 / math.sqrt(L * H))
    p["w2"] = u((128, 256), 1.0 / math.sqrt(256));     p["b2"] = u((128,), 1.0 / math.sqrt(256))
    p["w3"] = u((1, 128), 1.0 / math.sqrt(128));       p["b3"] = u((1,), 1.0 / math.sqrt(128))
    return p


def _reorder_gates(a):
    """PyTorch LSTM packs gates (i, f, g, o) along dim 0; repack as (i, f, o, g)."""
    return jnp.concatenate([a[0:H], a[H:2 * H], a[3 * H:4 * H], a[2 * H:3 * H]], axis=0)


def pack_params(p):
    """Re-layout PyTorch-shaped params into the kernel's matmul-friendly layout."""
    # conv weight (out, in, k) -> (k*in, out), zero-padded to H output feats.
    conv_w = jnp.transpose(p["conv_w"], (2, 1, 0)).reshape(KSZ * C_IN, C_IN)
    conv_w = jnp.pad(conv_w, ((0, 0), (0, H - C_IN)))                      # (72, 64)
    conv_b = jnp.pad(p["conv_b"], (0, H - C_IN)).reshape(1, H)             # (1, 64)  (pad MUST stay zero)

    w_ih, w_hh, bias = [], [], []
    for lp in p["lstm"]:
        wi = _reorder_gates(lp["w_ih"]).T                                  # (in, 4H), gate order (i,f,o,g)
        if wi.shape[0] < H:                                                # layer 0: pad 24 -> 64 with zeros
            wi = jnp.pad(wi, ((0, H - wi.shape[0]), (0, 0)))
        w_ih.append(wi)
        w_hh.append(_reorder_gates(lp["w_hh"]).T)                          # (H, 4H)
        bias.append(_reorder_gates(lp["b_ih"] + lp["b_hh"]).reshape(1, 4 * H))
    w_ih = jnp.stack(w_ih)                                                 # (5, 64, 256)
    w_hh = jnp.stack(w_hh)                                                 # (5, 64, 256)
    bias = jnp.stack(bias)                                                 # (5, 1, 256)

    fc1_w = p["w1"].T                                                      # (576, 256), row = t*H + h
    fc1_b = p["b1"].reshape(1, 256)
    fc2_w = p["w2"].T                                                      # (256, 128)
    fc2_b = p["b2"].reshape(1, 128)
    fc3_w = p["w3"].T                                                      # (128, 1)
    fc3_b = p["b3"].reshape(1, 1)
    return (conv_w, conv_b, w_ih, w_hh, bias,
            fc1_w, fc1_b, fc2_w, fc2_b, fc3_w, fc3_b)


# --------------------------------- wrapper ------------------------------------
def cnnlstm_forward(x, params, *, batch_block=256):
    """x: (B, 24, 9) NCL float32 (PyTorch Conv1d layout). Returns (B,)."""
    B, C, n_steps = x.shape
    assert C == C_IN and n_steps == L
    packed = pack_params(params)

    # Batch tile: whole batch if small, otherwise `batch_block`-sized tiles.
    # Always round the tile up to a multiple of 8 (>= 8) so in-kernel dynamic
    # sublane slices of size bt are aligned (unmasked vld/vst in the recurrence).
    bt = B if B <= batch_block else batch_block
    bt = max(8, ((bt + 7) // 8) * 8)
    G = pl.cdiv(B, bt)
    Bp = G * bt

    # im2col glue (pad/concat/transpose only): (B, C, L) -> block-major (G*L*bt, 3C)
    xp = jnp.transpose(x, (0, 2, 1))                     # (B, L, C)
    xp = jnp.pad(xp, ((0, 0), (1, 1), (0, 0)))           # (B, L+2, C)
    patches = jnp.concatenate([xp[:, k:k + L, :] for k in range(KSZ)],
                              axis=-1)                   # (B, L, 3C)
    if Bp > B:
        patches = jnp.pad(patches, ((0, Bp - B), (0, 0), (0, 0)))
    patches = (patches.reshape(G, bt, L, KSZ * C_IN)
                      .transpose(0, 2, 1, 3)             # (G, L, bt, 3C)
                      .reshape(G * L * bt, KSZ * C_IN))  # row = t*bt + b inside a block

    def full_spec(a):
        nd = a.ndim
        return pl.BlockSpec(a.shape, lambda g, _nd=nd: (0,) * _nd)

    out = pl.pallas_call(
        cnnlstm_kernel,
        out_shape=jax.ShapeDtypeStruct((Bp, 1), jnp.float32),
        grid=(G,),
        in_specs=[pl.BlockSpec((L * bt, KSZ * C_IN), lambda g: (g, 0))]
                 + [full_spec(a) for a in packed],
        out_specs=pl.BlockSpec((bt, 1), lambda g: (g, 0)),
        scratch_shapes=[pltpu.VMEM((L * bt, H), jnp.float32),       # sequence (layer in/out)
                        pltpu.VMEM((L * bt, 4 * H), jnp.float32),   # hoisted input projection
                        pltpu.VMEM((bt, L * H), jnp.float32)],      # flattened LSTM output
        compiler_params=pltpu.CompilerParams(
            dimension_semantics=("parallel",)),
    )(patches, *packed)
    return out[:B, 0]                                    # torch.flatten


# ------------------------------ pure-JAX reference ----------------------------
def reference_forward(x, p):
    HI = lax.Precision.HIGHEST
    B = x.shape[0]

    def leaky(v):
        return jnp.where(v > 0, v, NEG_SLOPE * v)

    xp = jnp.pad(x, ((0, 0), (0, 0), (1, 1)))
    y = p["conv_b"][None, :, None]
    for k in range(KSZ):
        y = y + jnp.einsum("oi,bil->bol", p["conv_w"][:, :, k], xp[:, :, k:k + L],
                           precision=HI)
    seq = jnp.transpose(leaky(y), (0, 2, 1))             # (B, L, 24)

    for lp in p["lstm"]:
        h = jnp.zeros((B, H), jnp.float32)
        c = jnp.zeros((B, H), jnp.float32)
        outs = []
        for t in range(L):
            g = (jnp.dot(seq[:, t, :], lp["w_ih"].T, precision=HI)
                 + jnp.dot(h, lp["w_hh"].T, precision=HI)
                 + lp["b_ih"] + lp["b_hh"])
            i_g, f_g, g_g, o_g = jnp.split(g, 4, axis=-1)
            i_g = jax.nn.sigmoid(i_g); f_g = jax.nn.sigmoid(f_g)
            g_g = jnp.tanh(g_g);       o_g = jax.nn.sigmoid(o_g)
            c = f_g * c + i_g * g_g
            h = o_g * jnp.tanh(c)
            outs.append(h)
        seq = jnp.stack(outs, axis=1)                    # (B, L, 64)

    z = seq.reshape(B, -1)                               # (B, 576)
    z = leaky(jnp.dot(z, p["w1"].T, precision=HI) + p["b1"])
    z = leaky(jnp.dot(z, p["w2"].T, precision=HI) + p["b2"])
    z = jnp.dot(z, p["w3"].T, precision=HI) + p["b3"]
    return z.reshape(-1)


# ---------------------------------- main ---------------------------------------
if __name__ == "__main__":
    key = jax.random.PRNGKey(0)
    kx, kp = jax.random.split(key)
    params = init_params(kp)

    B = 2
    x = jax.random.normal(kx, (B, C_IN, L), jnp.float32)   # (2, 24, 9) NCL

    out = jax.block_until_ready(cnnlstm_forward(x, params))
    assert out.shape == (B,)

    ref = reference_forward(x, params)
    if not jnp.allclose(out, ref, rtol=2e-2, atol=2e-2):
        raise AssertionError(f"mismatch: kernel={out} ref={ref}")

    print("KERNEL_OK")
</pallas_src>

<mosaic_0001>
module attributes {stable_mosaic.version = 11 : i64} {
  func.func @cnnlstm_kernel(%arg0: i32, %arg1: memref<72x72xf32, #tpu.memory_space<vmem>>, %arg2: memref<72x64xf32, #tpu.memory_space<vmem>>, %arg3: memref<1x64xf32, #tpu.memory_space<vmem>>, %arg4: memref<5x64x256xf32, #tpu.memory_space<vmem>>, %arg5: memref<5x64x256xf32, #tpu.memory_space<vmem>>, %arg6: memref<5x1x256xf32, #tpu.memory_space<vmem>>, %arg7: memref<576x256xf32, #tpu.memory_space<vmem>>, %arg8: memref<1x256xf32, #tpu.memory_space<vmem>>, %arg9: memref<256x128xf32, #tpu.memory_space<vmem>>, %arg10: memref<1x128xf32, #tpu.memory_space<vmem>>, %arg11: memref<128x1xf32, #tpu.memory_space<vmem>>, %arg12: memref<1x1xf32, #tpu.memory_space<vmem>>, %arg13: memref<8x1xf32, #tpu.memory_space<vmem>>, %arg14: memref<72x64xf32, #tpu.memory_space<vmem>>, %arg15: memref<72x256xf32, #tpu.memory_space<vmem>>, %arg16: memref<8x576xf32, #tpu.memory_space<vmem>>) attributes {dimension_semantics = [#tpu.dimension_semantics<parallel>], iteration_bounds = array<i64: 1>, scalar_prefetch = 0 : i64, scratch_operands = 3 : i64, tpu.core_type = #tpu.core_type<tc>, window_params = [{transform_indices = @transform_0, window_bounds = array<i64: 72, 72>}, {pipeline_mode = #tpu.pipeline_mode<synchronous>, transform_indices = @transform_1, window_bounds = array<i64: 72, 64>}, {pipeline_mode = #tpu.pipeline_mode<synchronous>, transform_indices = @transform_2, window_bounds = array<i64: 1, 64>}, {pipeline_mode = #tpu.pipeline_mode<synchronous>, transform_indices = @transform_3, window_bounds = array<i64: 5, 64, 256>}, {pipeline_mode = #tpu.pipeline_mode<synchronous>, transform_indices = @transform_4, window_bounds = array<i64: 5, 64, 256>}, {pipeline_mode = #tpu.pipeline_mode<synchronous>, transform_indices = @transform_5, window_bounds = array<i64: 5, 1, 256>}, {pipeline_mode = #tpu.pipeline_mode<synchronous>, transform_indices = @transform_6, window_bounds = array<i64: 576, 256>}, {pipeline_mode = #tpu.pipeline_mode<synchronous>, transform_indices = @transform_7, window_bounds = array<i64: 1, 256>}, {pipeline_mode = #tpu.pipeline_mode<synchronous>, transform_indices = @transform_8, window_bounds = array<i64: 256, 128>}, {pipeline_mode = #tpu.pipeline_mode<synchronous>, transform_indices = @transform_9, window_bounds = array<i64: 1, 128>}, {pipeline_mode = #tpu.pipeline_mode<synchronous>, transform_indices = @transform_10, window_bounds = array<i64: 128, 1>}, {pipeline_mode = #tpu.pipeline_mode<synchronous>, transform_indices = @transform_11, window_bounds = array<i64: 1, 1>}, {transform_indices = @transform_12, window_bounds = array<i64: 8, 1>}]} {
    %c0 = arith.constant 0 : index
    %c0_0 = arith.constant 0 : index
    %0 = vector.load %arg1[%c0, %c0_0] : memref<72x72xf32, #tpu.memory_space<vmem>>, vector<72x72xf32>
    %c0_1 = arith.constant 0 : index
    %c0_2 = arith.constant 0 : index
    %1 = vector.load %arg2[%c0_1, %c0_2] : memref<72x64xf32, #tpu.memory_space<vmem>>, vector<72x64xf32>
    %cst = arith.constant dense<0.000000e+00> : vector<72x64xf32>
    %2 = tpu.matmul %0, %1, %cst {dimension_numbers = #tpu.dot_dimension_numbers<[1], [0], [0], [1], [0, 0, 1, 1], [], []>} : vector<72x72xf32>, vector<72x64xf32>, vector<72x64xf32> -> vector<72x64xf32>
    %c0_3 = arith.constant 0 : index
    %c0_4 = arith.constant 0 : index
    %3 = vector.load %arg3[%c0_3, %c0_4] : memref<1x64xf32, #tpu.memory_space<vmem>>, vector<1x64xf32>
    %4 = vector.broadcast %3 : vector<1x64xf32> to vector<72x64xf32>
    %5 = arith.addf %2, %4 : vector<72x64xf32>
    %cst_5 = arith.constant 0.000000e+00 : f32
    %6 = vector.broadcast %cst_5 : f32 to vector<72x64xf32>
    %7 = arith.cmpf ogt, %5, %6 : vector<72x64xf32>
    %cst_6 = arith.constant 0.00999999977 : f32
    %8 = vector.broadcast %cst_6 : f32 to vector<72x64xf32>
    %9 = arith.mulf %8, %5 : vector<72x64xf32>
    %10 = arith.select %7, %5, %9 : vector<72x64xi1>, vector<72x64xf32>
    %c0_7 = arith.constant 0 : index
    %c0_8 = arith.constant 0 : index
    %11 = vector.load %arg14[%c0_7, %c0_8] : memref<72x64xf32, #tpu.memory_space<vmem>>, vector<72x64xf32>
    tpu.vector_store %arg14[%c0_7, %c0_8], %10 {strides = array<i32>} : memref<72x64xf32, #tpu.memory_space<vmem>>, vector<72x64xf32>,
    %cst_9 = arith.constant 0.000000e+00 : f32
    %12 = vector.broadcast %cst_9 : f32 to vector<8x64xf32>
    %c0_10 = arith.constant 0 : index
    %c0_11 = arith.constant 0 : index
    %13 = vector.load %arg14[%c0_10, %c0_11] : memref<72x64xf32, #tpu.memory_space<vmem>>, vector<72x64xf32>
    %c0_12 = arith.constant 0 : index
    %c0_13 = arith.constant 0 : index
    %c0_14 = arith.constant 0 : index
    %14 = vector.load %arg4[%c0_12, %c0_13, %c0_14] : memref<5x64x256xf32, #tpu.memory_space<vmem>>, vector<1x64x256xf32>
    %15 = vector.shape_cast %14 : vector<1x64x256xf32> to vector<64x256xf32>
    %cst_15 = arith.constant dense<0.000000e+00> : vector<72x256xf32>
    %16 = tpu.matmul %13, %15, %cst_15 {dimension_numbers = #tpu.dot_dimension_numbers<[1], [0], [0], [1], [0, 0, 1, 1], [], []>} : vector<72x64xf32>, vector<64x256xf32>, vector<72x256xf32> -> vector<72x256xf32>
    %c0_16 = arith.constant 0 : index
    %c0_17 = arith.constant 0 : index
    %c0_18 = arith.constant 0 : index
    %17 = vector.load %arg6[%c0_16, %c0_17, %c0_18] : memref<5x1x256xf32, #tpu.memory_space<vmem>>, vector<1x1x256xf32>
    %18 = vector.shape_cast %17 : vector<1x1x256xf32> to vector<1x256xf32>
    %19 = vector.broadcast %18 : vector<1x256xf32> to vector<72x256xf32>
    %20 = arith.addf %16, %19 : vector<72x256xf32>
    %c0_19 = arith.constant 0 : index
    %c0_20 = arith.constant 0 : index
    %21 = vector.load %arg15[%c0_19, %c0_20] : memref<72x256xf32, #tpu.memory_space<vmem>>, vector<72x256xf32>
    tpu.vector_store %arg15[%c0_19, %c0_20], %20 {strides = array<i32>} : memref<72x256xf32, #tpu.memory_space<vmem>>, vector<72x256xf32>,
    %c0_21 = arith.constant 0 : index
    %c0_22 = arith.constant 0 : index
    %c0_23 = arith.constant 0 : index
    %22 = vector.load %arg5[%c0_21, %c0_22, %c0_23] : memref<5x64x256xf32, #tpu.memory_space<vmem>>, vector<1x64x256xf32>
    %23 = vector.shape_cast %22 : vector<1x64x256xf32> to vector<64x256xf32>
    %c0_i32 = arith.constant 0 : i32
    %c9_i32 = arith.constant 9 : i32
    %24 = arith.addi %c0_i32, %c9_i32 : i32
    %c1_i32 = arith.constant 1 : i32
    %25:2 = scf.for %arg17 = %c0_i32 to %24 step %c1_i32 iter_args(%arg18 = %12, %arg19 = %12) -> (vector<8x64xf32>, vector<8x64xf32>)  : i32 {
      %c8_i32 = arith.constant 8 : i32
      %123 = arith.muli %arg17, %c8_i32 : i32
      %124 = tpu.assume_multiple %123, 8 : i32
      %125 = arith.index_cast %124 : i32 to index
      %c0_137 = arith.constant 0 : index
      %126 = vector.load %arg15[%125, %c0_137] : memref<72x256xf32, #tpu.memory_space<vmem>>, vector<8x256xf32>
      %cst_138 = arith.constant dense<0.000000e+00> : vector<8x256xf32>
      %127 = tpu.matmul %arg18, %23, %cst_138 {dimension_numbers = #tpu.dot_dimension_numbers<[1], [0], [0], [1], [0, 0, 1, 1], [], []>} : vector<8x64xf32>, vector<64x256xf32>, vector<8x256xf32> -> vector<8x256xf32>
      %128 = arith.addf %126, %127 : vector<8x256xf32>
      %129 = vector.extract_strided_slice %128 {offsets = [0, 0], sizes = [8, 192], strides = [1, 1]} : vector<8x256xf32> to vector<8x192xf32>
      %130 = arith.negf %129 : vector<8x192xf32>
      %131 = math.exp %130 : vector<8x192xf32>
      %cst_139 = arith.constant 1.000000e+00 : f32
      %132 = vector.broadcast %cst_139 : f32 to vector<8x192xf32>
      %133 = arith.addf %132, %131 : vector<8x192xf32>
      %134 = arith.divf %132, %133 : vector<8x192xf32>
      %135 = vector.extract_strided_slice %128 {offsets = [0, 192], sizes = [8, 64], strides = [1, 1]} : vector<8x256xf32> to vector<8x64xf32>
      %136 = math.tanh %135 : vector<8x64xf32>
      %137 = vector.extract_strided_slice %134 {offsets = [0, 64], sizes = [8, 64], strides = [1, 1]} : vector<8x192xf32> to vector<8x64xf32>
      %138 = arith.mulf %137, %arg19 : vector<8x64xf32>
      %139 = vector.extract_strided_slice %134 {offsets = [0, 0], sizes = [8, 64], strides = [1, 1]} : vector<8x192xf32> to vector<8x64xf32>
      %140 = arith.mulf %139, %136 : vector<8x64xf32>
      %141 = arith.addf %138, %140 : vector<8x64xf32>
      %142 = vector.extract_strided_slice %134 {offsets = [0, 128], sizes = [8, 64], strides = [1, 1]} : vector<8x192xf32> to vector<8x64xf32>
      %143 = math.tanh %141 : vector<8x64xf32>
      %144 = arith.mulf %142, %143 : vector<8x64xf32>
      %145 = arith.index_cast %124 : i32 to index
      %c0_140 = arith.constant 0 : index
      %146 = vector.load %arg14[%145, %c0_140] : memref<72x64xf32, #tpu.memory_space<vmem>>, vector<8x64xf32>
      tpu.vector_store %arg14[%145, %c0_140], %144 {strides = array<i32>} : memref<72x64xf32, #tpu.memory_space<vmem>>, vector<8x64xf32>,
      scf.yield %144, %141 : vector<8x64xf32>, vector<8x64xf32>
    }
    %c9_i32_24 = arith.constant 9 : i32
    %c0_25 = arith.constant 0 : index
    %c0_26 = arith.constant 0 : index
    %26 = vector.load %arg14[%c0_25, %c0_26] : memref<72x64xf32, #tpu.memory_space<vmem>>, vector<72x64xf32>
    %c1 = arith.constant 1 : index
    %c0_27 = arith.constant 0 : index
    %c0_28 = arith.constant 0 : index
    %27 = vector.load %arg4[%c1, %c0_27, %c0_28] : memref<5x64x256xf32, #tpu.memory_space<vmem>>, vector<1x64x256xf32>
    %28 = vector.shape_cast %27 : vector<1x64x256xf32> to vector<64x256xf32>
    %cst_29 = arith.constant dense<0.000000e+00> : vector<72x256xf32>
    %29 = tpu.matmul %26, %28, %cst_29 {dimension_numbers = #tpu.dot_dimension_numbers<[1], [0], [0], [1], [0, 0, 1, 1], [], []>} : vector<72x64xf32>, vector<64x256xf32>, vector<72x256xf32> -> vector<72x256xf32>
    %c1_30 = arith.constant 1 : index
    %c0_31 = arith.constant 0 : index
    %c0_32 = arith.constant 0 : index
    %30 = vector.load %arg6[%c1_30, %c0_31, %c0_32] : memref<5x1x256xf32, #tpu.memory_space<vmem>>, vector<1x1x256xf32>
    %31 = vector.shape_cast %30 : vector<1x1x256xf32> to vector<1x256xf32>
    %32 = vector.broadcast %31 : vector<1x256xf32> to vector<72x256xf32>
    %33 = arith.addf %29, %32 : vector<72x256xf32>
    %c0_33 = arith.constant 0 : index
    %c0_34 = arith.constant 0 : index
    %34 = vector.load %arg15[%c0_33, %c0_34] : memref<72x256xf32, #tpu.memory_space<vmem>>, vector<72x256xf32>
    tpu.vector_store %arg15[%c0_33, %c0_34], %33 {strides = array<i32>} : memref<72x256xf32, #tpu.memory_space<vmem>>, vector<72x256xf32>,
    %c1_35 = arith.constant 1 : index
    %c0_36 = arith.constant 0 : index
    %c0_37 = arith.constant 0 : index
    %35 = vector.load %arg5[%c1_35, %c0_36, %c0_37] : memref<5x64x256xf32, #tpu.memory_space<vmem>>, vector<1x64x256xf32>
    %36 = vector.shape_cast %35 : vector<1x64x256xf32> to vector<64x256xf32>
    %c0_i32_38 = arith.constant 0 : i32
    %c9_i32_39 = arith.constant 9 : i32
    %37 = arith.addi %c0_i32_38, %c9_i32_39 : i32
    %c1_i32_40 = arith.constant 1 : i32
    %38:2 = scf.for %arg17 = %c0_i32_38 to %37 step %c1_i32_40 iter_args(%arg18 = %12, %arg19 = %12) -> (vector<8x64xf32>, vector<8x64xf32>)  : i32 {
      %c8_i32 = arith.constant 8 : i32
      %123 = arith.muli %arg17, %c8_i32 : i32
      %124 = tpu.assume_multiple %123, 8 : i32
      %125 = arith.index_cast %124 : i32 to index
      %c0_137 = arith.constant 0 : index
      %126 = vector.load %arg15[%125, %c0_137] : memref<72x256xf32, #tpu.memory_space<vmem>>, vector<8x256xf32>
      %cst_138 = arith.constant dense<0.000000e+00> : vector<8x256xf32>
      %127 = tpu.matmul %arg18, %36, %cst_138 {dimension_numbers = #tpu.dot_dimension_numbers<[1], [0], [0], [1], [0, 0, 1, 1], [], []>} : vector<8x64xf32>, vector<64x256xf32>, vector<8x256xf32> -> vector<8x256xf32>
      %128 = arith.addf %126, %127 : vector<8x256xf32>
      %129 = vector.extract_strided_slice %128 {offsets = [0, 0], sizes = [8, 192], strides = [1, 1]} : vector<8x256xf32> to vector<8x192xf32>
      %130 = arith.negf %129 : vector<8x192xf32>
      %131 = math.exp %130 : vector<8x192xf32>
      %cst_139 = arith.constant 1.000000e+00 : f32
      %132 = vector.broadcast %cst_139 : f32 to vector<8x192xf32>
      %133 = arith.addf %132, %131 : vector<8x192xf32>
      %134 = arith.divf %132, %133 : vector<8x192xf32>
      %135 = vector.extract_strided_slice %128 {offsets = [0, 192], sizes = [8, 64], strides = [1, 1]} : vector<8x256xf32> to vector<8x64xf32>
      %136 = math.tanh %135 : vector<8x64xf32>
      %137 = vector.extract_strided_slice %134 {offsets = [0, 64], sizes = [8, 64], strides = [1, 1]} : vector<8x192xf32> to vector<8x64xf32>
      %138 = arith.mulf %137, %arg19 : vector<8x64xf32>
      %139 = vector.extract_strided_slice %134 {offsets = [0, 0], sizes = [8, 64], strides = [1, 1]} : vector<8x192xf32> to vector<8x64xf32>
      %140 = arith.mulf %139, %136 : vector<8x64xf32>
      %141 = arith.addf %138, %140 : vector<8x64xf32>
      %142 = vector.extract_strided_slice %134 {offsets = [0, 128], sizes = [8, 64], strides = [1, 1]} : vector<8x192xf32> to vector<8x64xf32>
      %143 = math.tanh %141 : vector<8x64xf32>
      %144 = arith.mulf %142, %143 : vector<8x64xf32>
      %145 = arith.index_cast %124 : i32 to index
      %c0_140 = arith.constant 0 : index
      %146 = vector.load %arg14[%145, %c0_140] : memref<72x64xf32, #tpu.memory_space<vmem>>, vector<8x64xf32>
      tpu.vector_store %arg14[%145, %c0_140], %144 {strides = array<i32>} : memref<72x64xf32, #tpu.memory_space<vmem>>, vector<8x64xf32>,
      scf.yield %144, %141 : vector<8x64xf32>, vector<8x64xf32>
    }
    %c9_i32_41 = arith.constant 9 : i32
    %c0_42 = arith.constant 0 : index
    %c0_43 = arith.constant 0 : index
    %39 = vector.load %arg14[%c0_42, %c0_43] : memref<72x64xf32, #tpu.memory_space<vmem>>, vector<72x64xf32>
    %c2 = arith.constant 2 : index
    %c0_44 = arith.constant 0 : index
    %c0_45 = arith.constant 0 : index
    %40 = vector.load %arg4[%c2, %c0_44, %c0_45] : memref<5x64x256xf32, #tpu.memory_space<vmem>>, vector<1x64x256xf32>
    %41 = vector.shape_cast %40 : vector<1x64x256xf32> to vector<64x256xf32>
    %cst_46 = arith.constant dense<0.000000e+00> : vector<72x256xf32>
    %42 = tpu.matmul %39, %41, %cst_46 {dimension_numbers = #tpu.dot_dimension_numbers<[1], [0], [0], [1], [0, 0, 1, 1], [], []>} : vector<72x64xf32>, vector<64x256xf32>, vector<72x256xf32> -> vector<72x256xf32>
    %c2_47 = arith.constant 2 : index
    %c0_48 = arith.constant 0 : index
    %c0_49 = arith.constant 0 : index
    %43 = vector.load %arg6[%c2_47, %c0_48, %c0_49] : memref<5x1x256xf32, #tpu.memory_space<vmem>>, vector<1x1x256xf32>
    %44 = vector.shape_cast %43 : vector<1x1x256xf32> to vector<1x256xf32>
    %45 = vector.broadcast %44 : vector<1x256xf32> to vector<72x256xf32>
    %46 = arith.addf %42, %45 : vector<72x256xf32>
    %c0_50 = arith.constant 0 : index
    %c0_51 = arith.constant 0 : index
    %47 = vector.load %arg15[%c0_50, %c0_51] : memref<72x256xf32, #tpu.memory_space<vmem>>, vector<72x256xf32>
    tpu.vector_store %arg15[%c0_50, %c0_51], %46 {strides = array<i32>} : memref<72x256xf32, #tpu.memory_space<vmem>>, vector<72x256xf32>,
    %c2_52 = arith.constant 2 : index
    %c0_53 = arith.constant 0 : index
    %c0_54 = arith.constant 0 : index
    %48 = vector.load %arg5[%c2_52, %c0_53, %c0_54] : memref<5x64x256xf32, #tpu.memory_space<vmem>>, vector<1x64x256xf32>
    %49 = vector.shape_cast %48 : vector<1x64x256xf32> to vector<64x256xf32>
    %c0_i32_55 = arith.constant 0 : i32
    %c9_i32_56 = arith.constant 9 : i32
    %50 = arith.addi %c0_i32_55, %c9_i32_56 : i32
    %c1_i32_57 = arith.constant 1 : i32
    %51:2 = scf.for %arg17 = %c0_i32_55 to %50 step %c1_i32_57 iter_args(%arg18 = %12, %arg19 = %12) -> (vector<8x64xf32>, vector<8x64xf32>)  : i32 {
      %c8_i32 = arith.constant 8 : i32
      %123 = arith.muli %arg17, %c8_i32 : i32
      %124 = tpu.assume_multiple %123, 8 : i32
      %125 = arith.index_cast %124 : i32 to index
      %c0_137 = arith.constant 0 : index
      %126 = vector.load %arg15[%125, %c0_137] : memref<72x256xf32, #tpu.memory_space<vmem>>, vector<8x256xf32>
      %cst_138 = arith.constant dense<0.000000e+00> : vector<8x256xf32>
      %127 = tpu.matmul %arg18, %49, %cst_138 {dimension_numbers = #tpu.dot_dimension_numbers<[1], [0], [0], [1], [0, 0, 1, 1], [], []>} : vector<8x64xf32>, vector<64x256xf32>, vector<8x256xf32> -> vector<8x256xf32>
      %128 = arith.addf %126, %127 : vector<8x256xf32>
      %129 = vector.extract_strided_slice %128 {offsets = [0, 0], sizes = [8, 192], strides = [1, 1]} : vector<8x256xf32> to vector<8x192xf32>
      %130 = arith.negf %129 : vector<8x192xf32>
      %131 = math.exp %130 : vector<8x192xf32>
      %cst_139 = arith.constant 1.000000e+00 : f32
      %132 = vector.broadcast %cst_139 : f32 to vector<8x192xf32>
      %133 = arith.addf %132, %131 : vector<8x192xf32>
      %134 = arith.divf %132, %133 : vector<8x192xf32>
      %135 = vector.extract_strided_slice %128 {offsets = [0, 192], sizes = [8, 64], strides = [1, 1]} : vector<8x256xf32> to vector<8x64xf32>
      %136 = math.tanh %135 : vector<8x64xf32>
      %137 = vector.extract_strided_slice %134 {offsets = [0, 64], sizes = [8, 64], strides = [1, 1]} : vector<8x192xf32> to vector<8x64xf32>
      %138 = arith.mulf %137, %arg19 : vector<8x64xf32>
      %139 = vector.extract_strided_slice %134 {offsets = [0, 0], sizes = [8, 64], strides = [1, 1]} : vector<8x192xf32> to vector<8x64xf32>
      %140 = arith.mulf %139, %136 : vector<8x64xf32>
      %141 = arith.addf %138, %140 : vector<8x64xf32>
      %142 = vector.extract_strided_slice %134 {offsets = [0, 128], sizes = [8, 64], strides = [1, 1]} : vector<8x192xf32> to vector<8x64xf32>
      %143 = math.tanh %141 : vector<8x64xf32>
      %144 = arith.mulf %142, %143 : vector<8x64xf32>
      %145 = arith.index_cast %124 : i32 to index
      %c0_140 = arith.constant 0 : index
      %146 = vector.load %arg14[%145, %c0_140] : memref<72x64xf32, #tpu.memory_space<vmem>>, vector<8x64xf32>
      tpu.vector_store %arg14[%145, %c0_140], %144 {strides = array<i32>} : memref<72x64xf32, #tpu.memory_space<vmem>>, vector<8x64xf32>,
      scf.yield %144, %141 : vector<8x64xf32>, vector<8x64xf32>
    }
    %c9_i32_58 = arith.constant 9 : i32
    %c0_59 = arith.constant 0 : index
    %c0_60 = arith.constant 0 : index
    %52 = vector.load %arg14[%c0_59, %c0_60] : memref<72x64xf32, #tpu.memory_space<vmem>>, vector<72x64xf32>
    %c3 = arith.constant 3 : index
    %c0_61 = arith.constant 0 : index
    %c0_62 = arith.constant 0 : index
    %53 = vector.load %arg4[%c3, %c0_61, %c0_62] : memref<5x64x256xf32, #tpu.memory_space<vmem>>, vector<1x64x256xf32>
    %54 = vector.shape_cast %53 : vector<1x64x256xf32> to vector<64x256xf32>
    %cst_63 = arith.constant dense<0.000000e+00> : vector<72x256xf32>
    %55 = tpu.matmul %52, %54, %cst_63 {dimension_numbers = #tpu.dot_dimension_numbers<[1], [0], [0], [1], [0, 0, 1, 1], [], []>} : vector<72x64xf32>, vector<64x256xf32>, vector<72x256xf32> -> vector<72x256xf32>
    %c3_64 = arith.constant 3 : index
    %c0_65 = arith.constant 0 : index
    %c0_66 = arith.constant 0 : index
    %56 = vector.load %arg6[%c3_64, %c0_65, %c0_66] : memref<5x1x256xf32, #tpu.memory_space<vmem>>, vector<1x1x256xf32>
    %57 = vector.shape_cast %56 : vector<1x1x256xf32> to vector<1x256xf32>
    %58 = vector.broadcast %57 : vector<1x256xf32> to vector<72x256xf32>
    %59 = arith.addf %55, %58 : vector<72x256xf32>
    %c0_67 = arith.constant 0 : index
    %c0_68 = arith.constant 0 : index
    %60 = vector.load %arg15[%c0_67, %c0_68] : memref<72x256xf32, #tpu.memory_space<vmem>>, vector<72x256xf32>
    tpu.vector_store %arg15[%c0_67, %c0_68], %59 {strides = array<i32>} : memref<72x256xf32, #tpu.memory_space<vmem>>, vector<72x256xf32>,
    %c3_69 = arith.constant 3 : index
    %c0_70 = arith.constant 0 : index
    %c0_71 = arith.constant 0 : index
    %61 = vector.load %arg5[%c3_69, %c0_70, %c0_71] : memref<5x64x256xf32, #tpu.memory_space<vmem>>, vector<1x64x256xf32>
    %62 = vector.shape_cast %61 : vector<1x64x256xf32> to vector<64x256xf32>
    %c0_i32_72 = arith.constant 0 : i32
    %c9_i32_73 = arith.constant 9 : i32
    %63 = arith.addi %c0_i32_72, %c9_i32_73 : i32
    %c1_i32_74 = arith.constant 1 : i32
    %64:2 = scf.for %arg17 = %c0_i32_72 to %63 step %c1_i32_74 iter_args(%arg18 = %12, %arg19 = %12) -> (vector<8x64xf32>, vector<8x64xf32>)  : i32 {
      %c8_i32 = arith.constant 8 : i32
      %123 = arith.muli %arg17, %c8_i32 : i32
      %124 = tpu.assume_multiple %123, 8 : i32
      %125 = arith.index_cast %124 : i32 to index
      %c0_137 = arith.constant 0 : index
      %126 = vector.load %arg15[%125, %c0_137] : memref<72x256xf32, #tpu.memory_space<vmem>>, vector<8x256xf32>
      %cst_138 = arith.constant dense<0.000000e+00> : vector<8x256xf32>
      %127 = tpu.matmul %arg18, %62, %cst_138 {dimension_numbers = #tpu.dot_dimension_numbers<[1], [0], [0], [1], [0, 0, 1, 1], [], []>} : vector<8x64xf32>, vector<64x256xf32>, vector<8x256xf32> -> vector<8x256xf32>
      %128 = arith.addf %126, %127 : vector<8x256xf32>
      %129 = vector.extract_strided_slice %128 {offsets = [0, 0], sizes = [8, 192], strides = [1, 1]} : vector<8x256xf32> to vector<8x192xf32>
      %130 = arith.negf %129 : vector<8x192xf32>
      %131 = math.exp %130 : vector<8x192xf32>
      %cst_139 = arith.constant 1.000000e+00 : f32
      %132 = vector.broadcast %cst_139 : f32 to vector<8x192xf32>
      %133 = arith.addf %132, %131 : vector<8x192xf32>
      %134 = arith.divf %132, %133 : vector<8x192xf32>
      %135 = vector.extract_strided_slice %128 {offsets = [0, 192], sizes = [8, 64], strides = [1, 1]} : vector<8x256xf32> to vector<8x64xf32>
      %136 = math.tanh %135 : vector<8x64xf32>
      %137 = vector.extract_strided_slice %134 {offsets = [0, 64], sizes = [8, 64], strides = [1, 1]} : vector<8x192xf32> to vector<8x64xf32>
      %138 = arith.mulf %137, %arg19 : vector<8x64xf32>
      %139 = vector.extract_strided_slice %134 {offsets = [0, 0], sizes = [8, 64], strides = [1, 1]} : vector<8x192xf32> to vector<8x64xf32>
      %140 = arith.mulf %139, %136 : vector<8x64xf32>
      %141 = arith.addf %138, %140 : vector<8x64xf32>
      %142 = vector.extract_strided_slice %134 {offsets = [0, 128], sizes = [8, 64], strides = [1, 1]} : vector<8x192xf32> to vector<8x64xf32>
      %143 = math.tanh %141 : vector<8x64xf32>
      %144 = arith.mulf %142, %143 : vector<8x64xf32>
      %145 = arith.index_cast %124 : i32 to index
      %c0_140 = arith.constant 0 : index
      %146 = vector.load %arg14[%145, %c0_140] : memref<72x64xf32, #tpu.memory_space<vmem>>, vector<8x64xf32>
      tpu.vector_store %arg14[%145, %c0_140], %144 {strides = array<i32>} : memref<72x64xf32, #tpu.memory_space<vmem>>, vector<8x64xf32>,
      scf.yield %144, %141 : vector<8x64xf32>, vector<8x64xf32>
    }
    %c9_i32_75 = arith.constant 9 : i32
    %c0_76 = arith.constant 0 : index
    %c0_77 = arith.constant 0 : index
    %65 = vector.load %arg14[%c0_76, %c0_77] : memref<72x64xf32, #tpu.memory_space<vmem>>, vector<72x64xf32>
    %c4 = arith.constant 4 : index
    %c0_78 = arith.constant 0 : index
    %c0_79 = arith.constant 0 : index
    %66 = vector.load %arg4[%c4, %c0_78, %c0_79] : memref<5x64x256xf32, #tpu.memory_space<vmem>>, vector<1x64x256xf32>
    %67 = vector.shape_cast %66 : vector<1x64x256xf32> to vector<64x256xf32>
    %cst_80 = arith.constant dense<0.000000e+00> : vector<72x256xf32>
    %68 = tpu.matmul %65, %67, %cst_80 {dimension_numbers = #tpu.dot_dimension_numbers<[1], [0], [0], [1], [0, 0, 1, 1], [], []>} : vector<72x64xf32>, vector<64x256xf32>, vector<72x256xf32> -> vector<72x256xf32>
    %c4_81 = arith.constant 4 : index
    %c0_82 = arith.constant 0 : index
    %c0_83 = arith.constant 0 : index
    %69 = vector.load %arg6[%c4_81, %c0_82, %c0_83] : memref<5x1x256xf32, #tpu.memory_space<vmem>>, vector<1x1x256xf32>
    %70 = vector.shape_cast %69 : vector<1x1x256xf32> to vector<1x256xf32>
    %71 = vector.broadcast %70 : vector<1x256xf32> to vector<72x256xf32>
    %72 = arith.addf %68, %71 : vector<72x256xf32>
    %c0_84 = arith.constant 0 : index
    %c0_85 = arith.constant 0 : index
    %73 = vector.load %arg15[%c0_84, %c0_85] : memref<72x256xf32, #tpu.memory_space<vmem>>, vector<72x256xf32>
    tpu.vector_store %arg15[%c0_84, %c0_85], %72 {strides = array<i32>} : memref<72x256xf32, #tpu.memory_space<vmem>>, vector<72x256xf32>,
    %c4_86 = arith.constant 4 : index
    %c0_87 = arith.constant 0 : index
    %c0_88 = arith.constant 0 : index
    %74 = vector.load %arg5[%c4_86, %c0_87, %c0_88] : memref<5x64x256xf32, #tpu.memory_space<vmem>>, vector<1x64x256xf32>
    %75 = vector.shape_cast %74 : vector<1x64x256xf32> to vector<64x256xf32>
    %c0_i32_89 = arith.constant 0 : i32
    %c9_i32_90 = arith.constant 9 : i32
    %76 = arith.addi %c0_i32_89, %c9_i32_90 : i32
    %c1_i32_91 = arith.constant 1 : i32
    %77:2 = scf.for %arg17 = %c0_i32_89 to %76 step %c1_i32_91 iter_args(%arg18 = %12, %arg19 = %12) -> (vector<8x64xf32>, vector<8x64xf32>)  : i32 {
      %c8_i32 = arith.constant 8 : i32
      %123 = arith.muli %arg17, %c8_i32 : i32
      %124 = tpu.assume_multiple %123, 8 : i32
      %125 = arith.index_cast %124 : i32 to index
      %c0_137 = arith.constant 0 : index
      %126 = vector.load %arg15[%125, %c0_137] : memref<72x256xf32, #tpu.memory_space<vmem>>, vector<8x256xf32>
      %cst_138 = arith.constant dense<0.000000e+00> : vector<8x256xf32>
      %127 = tpu.matmul %arg18, %75, %cst_138 {dimension_numbers = #tpu.dot_dimension_numbers<[1], [0], [0], [1], [0, 0, 1, 1], [], []>} : vector<8x64xf32>, vector<64x256xf32>, vector<8x256xf32> -> vector<8x256xf32>
      %128 = arith.addf %126, %127 : vector<8x256xf32>
      %129 = vector.extract_strided_slice %128 {offsets = [0, 0], sizes = [8, 192], strides = [1, 1]} : vector<8x256xf32> to vector<8x192xf32>
      %130 = arith.negf %129 : vector<8x192xf32>
      %131 = math.exp %130 : vector<8x192xf32>
      %cst_139 = arith.constant 1.000000e+00 : f32
      %132 = vector.broadcast %cst_139 : f32 to vector<8x192xf32>
      %133 = arith.addf %132, %131 : vector<8x192xf32>
      %134 = arith.divf %132, %133 : vector<8x192xf32>
      %135 = vector.extract_strided_slice %128 {offsets = [0, 192], sizes = [8, 64], strides = [1, 1]} : vector<8x256xf32> to vector<8x64xf32>
      %136 = math.tanh %135 : vector<8x64xf32>
      %137 = vector.extract_strided_slice %134 {offsets = [0, 64], sizes = [8, 64], strides = [1, 1]} : vector<8x192xf32> to vector<8x64xf32>
      %138 = arith.mulf %137, %arg19 : vector<8x64xf32>
      %139 = vector.extract_strided_slice %134 {offsets = [0, 0], sizes = [8, 64], strides = [1, 1]} : vector<8x192xf32> to vector<8x64xf32>
      %140 = arith.mulf %139, %136 : vector<8x64xf32>
      %141 = arith.addf %138, %140 : vector<8x64xf32>
      %142 = vector.extract_strided_slice %134 {offsets = [0, 128], sizes = [8, 64], strides = [1, 1]} : vector<8x192xf32> to vector<8x64xf32>
      %143 = math.tanh %141 : vector<8x64xf32>
      %144 = arith.mulf %142, %143 : vector<8x64xf32>
      %145 = arith.index_cast %124 : i32 to index
      %c0_140 = arith.constant 0 : index
      %146 = vector.load %arg14[%145, %c0_140] : memref<72x64xf32, #tpu.memory_space<vmem>>, vector<8x64xf32>
      tpu.vector_store %arg14[%145, %c0_140], %144 {strides = array<i32>} : memref<72x64xf32, #tpu.memory_space<vmem>>, vector<8x64xf32>,
      scf.yield %144, %141 : vector<8x64xf32>, vector<8x64xf32>
    }
    %c9_i32_92 = arith.constant 9 : i32
    %c0_93 = arith.constant 0 : index
    %c0_94 = arith.constant 0 : index
    %78 = vector.load %arg14[%c0_93, %c0_94] : memref<72x64xf32, #tpu.memory_space<vmem>>, vector<8x64xf32>
    %c0_95 = arith.constant 0 : index
    %c0_96 = arith.constant 0 : index
    %79 = vector.load %arg16[%c0_95, %c0_96] : memref<8x576xf32, #tpu.memory_space<vmem>>, vector<8x64xf32>
    tpu.vector_store %arg16[%c0_95, %c0_96], %78 {strides = array<i32>} : memref<8x576xf32, #tpu.memory_space<vmem>>, vector<8x64xf32>,
    %c8 = arith.constant 8 : index
    %c0_97 = arith.constant 0 : index
    %80 = vector.load %arg14[%c8, %c0_97] : memref<72x64xf32, #tpu.memory_space<vmem>>, vector<8x64xf32>
    %c0_98 = arith.constant 0 : index
    %c64 = arith.constant 64 : index
    %81 = vector.load %arg16[%c0_98, %c64] : memref<8x576xf32, #tpu.memory_space<vmem>>, vector<8x64xf32>
    tpu.vector_store %arg16[%c0_98, %c64], %80 {strides = array<i32>} : memref<8x576xf32, #tpu.memory_space<vmem>>, vector<8x64xf32>,
    %c16 = arith.constant 16 : index
    %c0_99 = arith.constant 0 : index
    %82 = vector.load %arg14[%c16, %c0_99] : memref<72x64xf32, #tpu.memory_space<vmem>>, vector<8x64xf32>
    %c0_100 = arith.constant 0 : index
    %c128 = arith.constant 128 : index
    %83 = vector.load %arg16[%c0_100, %c128] : memref<8x576xf32, #tpu.memory_space<vmem>>, vector<8x64xf32>
    tpu.vector_store %arg16[%c0_100, %c128], %82 {strides = array<i32>} : memref<8x576xf32, #tpu.memory_space<vmem>>, vector<8x64xf32>,
    %c24 = arith.constant 24 : index
    %c0_101 = arith.constant 0 : index
    %84 = vector.load %arg14[%c24, %c0_101] : memref<72x64xf32, #tpu.memory_space<vmem>>, vector<8x64xf32>
    %c0_102 = arith.constant 0 : index
    %c192 = arith.constant 192 : index
    %85 = vector.load %arg16[%c0_102, %c192] : memref<8x576xf32, #tpu.memory_space<vmem>>, vector<8x64xf32>
    tpu.vector_store %arg16[%c0_102, %c192], %84 {strides = array<i32>} : memref<8x576xf32, #tpu.memory_space<vmem>>, vector<8x64xf32>,
    %c32 = arith.constant 32 : index
    %c0_103 = arith.constant 0 : index
    %86 = vector.load %arg14[%c32, %c0_103] : memref<72x64xf32, #tpu.memory_space<vmem>>, vector<8x64xf32>
    %c0_104 = arith.constant 0 : index
    %c256 = arith.constant 256 : index
    %87 = vector.load %arg16[%c0_104, %c256] : memref<8x576xf32, #tpu.memory_space<vmem>>, vector<8x64xf32>
    tpu.vector_store %arg16[%c0_104, %c256], %86 {strides = array<i32>} : memref<8x576xf32, #tpu.memory_space<vmem>>, vector<8x64xf32>,
    %c40 = arith.constant 40 : index
    %c0_105 = arith.constant 0 : index
    %88 = vector.load %arg14[%c40, %c0_105] : memref<72x64xf32, #tpu.memory_space<vmem>>, vector<8x64xf32>
    %c0_106 = arith.constant 0 : index
    %c320 = arith.constant 320 : index
    %89 = vector.load %arg16[%c0_106, %c320] : memref<8x576xf32, #tpu.memory_space<vmem>>, vector<8x64xf32>
    tpu.vector_store %arg16[%c0_106, %c320], %88 {strides = array<i32>} : memref<8x576xf32, #tpu.memory_space<vmem>>, vector<8x64xf32>,
    %c48 = arith.constant 48 : index
    %c0_107 = arith.constant 0 : index
    %90 = vector.load %arg14[%c48, %c0_107] : memref<72x64xf32, #tpu.memory_space<vmem>>, vector<8x64xf32>
    %c0_108 = arith.constant 0 : index
    %c384 = arith.constant 384 : index
    %91 = vector.load %arg16[%c0_108, %c384] : memref<8x576xf32, #tpu.memory_space<vmem>>, vector<8x64xf32>
    tpu.vector_store %arg16[%c0_108, %c384], %90 {strides = array<i32>} : memref<8x576xf32, #tpu.memory_space<vmem>>, vector<8x64xf32>,
    %c56 = arith.constant 56 : index
    %c0_109 = arith.constant 0 : index
    %92 = vector.load %arg14[%c56, %c0_109] : memref<72x64xf32, #tpu.memory_space<vmem>>, vector<8x64xf32>
    %c0_110 = arith.constant 0 : index
    %c448 = arith.constant 448 : index
    %93 = vector.load %arg16[%c0_110, %c448] : memref<8x576xf32, #tpu.memory_space<vmem>>, vector<8x64xf32>
    tpu.vector_store %arg16[%c0_110, %c448], %92 {strides = array<i32>} : memref<8x576xf32, #tpu.memory_space<vmem>>, vector<8x64xf32>,
    %c64_111 = arith.constant 64 : index
    %c0_112 = arith.constant 0 : index
    %94 = vector.load %arg14[%c64_111, %c0_112] : memref<72x64xf32, #tpu.memory_space<vmem>>, vector<8x64xf32>
    %c0_113 = arith.constant 0 : index
    %c512 = arith.constant 512 : index
    %95 = vector.load %arg16[%c0_113, %c512] : memref<8x576xf32, #tpu.memory_space<vmem>>, vector<8x64xf32>
    tpu.vector_store %arg16[%c0_113, %c512], %94 {strides = array<i32>} : memref<8x576xf32, #tpu.memory_space<vmem>>, vector<8x64xf32>,
    %c0_114 = arith.constant 0 : index
    %c0_115 = arith.constant 0 : index
    %96 = vector.load %arg16[%c0_114, %c0_115] : memref<8x576xf32, #tpu.memory_space<vmem>>, vector<8x576xf32>
    %c0_116 = arith.constant 0 : index
    %c0_117 = arith.constant 0 : index
    %97 = vector.load %arg7[%c0_116, %c0_117] : memref<576x256xf32, #tpu.memory_space<vmem>>, vector<576x256xf32>
    %cst_118 = arith.constant dense<0.000000e+00> : vector<8x256xf32>
    %98 = tpu.matmul %96, %97, %cst_118 {dimension_numbers = #tpu.dot_dimension_numbers<[1], [0], [0], [1], [0, 0, 1, 1], [], []>} : vector<8x576xf32>, vector<576x256xf32>, vector<8x256xf32> -> vector<8x256xf32>
    %c0_119 = arith.constant 0 : index
    %c0_120 = arith.constant 0 : index
    %99 = vector.load %arg8[%c0_119, %c0_120] : memref<1x256xf32, #tpu.memory_space<vmem>>, vector<1x256xf32>
    %100 = vector.broadcast %99 : vector<1x256xf32> to vector<8x256xf32>
    %101 = arith.addf %98, %100 : vector<8x256xf32>
    %cst_121 = arith.constant 0.000000e+00 : f32
    %102 = vector.broadcast %cst_121 : f32 to vector<8x256xf32>
    %103 = arith.cmpf ogt, %101, %102 : vector<8x256xf32>
    %cst_122 = arith.constant 0.00999999977 : f32
    %104 = vector.broadcast %cst_122 : f32 to vector<8x256xf32>
    %105 = arith.mulf %104, %101 : vector<8x256xf32>
    %106 = arith.select %103, %101, %105 : vector<8x256xi1>, vector<8x256xf32>
    %c0_123 = arith.constant 0 : index
    %c0_124 = arith.constant 0 : index
    %107 = vector.load %arg9[%c0_123, %c0_124] : memref<256x128xf32, #tpu.memory_space<vmem>>, vector<256x128xf32>
    %cst_125 = arith.constant dense<0.000000e+00> : vector<8x128xf32>
    %108 = tpu.matmul %106, %107, %cst_125 {dimension_numbers = #tpu.dot_dimension_numbers<[1], [0], [0], [1], [0, 0, 1, 1], [], []>} : vector<8x256xf32>, vector<256x128xf32>, vector<8x128xf32> -> vector<8x128xf32>
    %c0_126 = arith.constant 0 : index
    %c0_127 = arith.constant 0 : index
    %109 = vector.load %arg10[%c0_126, %c0_127] : memref<1x128xf32, #tpu.memory_space<vmem>>, vector<1x128xf32>
    %110 = vector.broadcast %109 : vector<1x128xf32> to vector<8x128xf32>
    %111 = arith.addf %108, %110 : vector<8x128xf32>
    %cst_128 = arith.constant 0.000000e+00 : f32
    %112 = vector.broadcast %cst_128 : f32 to vector<8x128xf32>
    %113 = arith.cmpf ogt, %111, %112 : vector<8x128xf32>
    %cst_129 = arith.constant 0.00999999977 : f32
    %114 = vector.broadcast %cst_129 : f32 to vector<8x128xf32>
    %115 = arith.mulf %114, %111 : vector<8x128xf32>
    %116 = arith.select %113, %111, %115 : vector<8x128xi1>, vector<8x128xf32>
    %c0_130 = arith.constant 0 : index
    %c0_131 = arith.constant 0 : index
    %117 = vector.load %arg11[%c0_130, %c0_131] : memref<128x1xf32, #tpu.memory_space<vmem>>, vector<128x1xf32>
    %cst_132 = arith.constant dense<0.000000e+00> : vector<8x1xf32>
    %118 = tpu.matmul %116, %117, %cst_132 {dimension_numbers = #tpu.dot_dimension_numbers<[1], [0], [0], [1], [0, 0, 1, 1], [], []>} : vector<8x128xf32>, vector<128x1xf32>, vector<8x1xf32> -> vector<8x1xf32>
    %c0_133 = arith.constant 0 : index
    %c0_134 = arith.constant 0 : index
    %119 = vector.load %arg12[%c0_133, %c0_134] : memref<1x1xf32, #tpu.memory_space<vmem>>, vector<1x1xf32>
    %120 = vector.broadcast %119 : vector<1x1xf32> to vector<8x1xf32>
    %121 = arith.addf %118, %120 : vector<8x1xf32>
    %c0_135 = arith.constant 0 : index
    %c0_136 = arith.constant 0 : index
    %122 = vector.load %arg13[%c0_135, %c0_136] : memref<8x1xf32, #tpu.memory_space<vmem>>, vector<8x1xf32>
    tpu.vector_store %arg13[%c0_135, %c0_136], %121 {strides = array<i32>} : memref<8x1xf32, #tpu.memory_space<vmem>>, vector<8x1xf32>,
    return
  }
  func.func @transform_0(%arg0: i32) -> (i32, i32) {
    %c0_i32 = arith.constant 0 : i32
    %c0_i32_0 = arith.constant 0 : i32
    return %arg0, %c0_i32 : i32, i32
  }
  func.func @transform_1(%arg0: i32) -> (i32, i32) {
    %c0_i32 = arith.constant 0 : i32
    %c0_i32_0 = arith.constant 0 : i32
    %c0_i32_1 = arith.constant 0 : i32
    return %c0_i32, %c0_i32_0 : i32, i32
  }
  func.func @transform_2(%arg0: i32) -> (i32, i32) {
    %c0_i32 = arith.constant 0 : i32
    %c0_i32_0 = arith.constant 0 : i32
    %c0_i32_1 = arith.constant 0 : i32
    return %c0_i32, %c0_i32_0 : i32, i32
  }
  func.func @transform_3(%arg0: i32) -> (i32, i32, i32) {
    %c0_i32 = arith.constant 0 : i32
    %c0_i32_0 = arith.constant 0 : i32
    %c0_i32_1 = arith.constant 0 : i32
    %c0_i32_2 = arith.constant 0 : i32
    return %c0_i32, %c0_i32_0, %c0_i32_1 : i32, i32, i32
  }
  func.func @transform_4(%arg0: i32) -> (i32, i32, i32) {
    %c0_i32 = arith.constant 0 : i32
    %c0_i32_0 = arith.constant 0 : i32
    %c0_i32_1 = arith.constant 0 : i32
    %c0_i32_2 = arith.constant 0 : i32
    return %c0_i32, %c0_i32_0, %c0_i32_1 : i32, i32, i32
  }
  func.func @transform_5(%arg0: i32) -> (i32, i32, i32) {
    %c0_i32 = arith.constant 0 : i32
    %c0_i32_0 = arith.constant 0 : i32
    %c0_i32_1 = arith.constant 0 : i32
    %c0_i32_2 = arith.constant 0 : i32
    return %c0_i32, %c0_i32_0, %c0_i32_1 : i32, i32, i32
  }
  func.func @transform_6(%arg0: i32) -> (i32, i32) {
    %c0_i32 = arith.constant 0 : i32
    %c0_i32_0 = arith.constant 0 : i32
    %c0_i32_1 = arith.constant 0 : i32
    return %c0_i32, %c0_i32_0 : i32, i32
  }
  func.func @transform_7(%arg0: i32) -> (i32, i32) {
    %c0_i32 = arith.constant 0 : i32
    %c0_i32_0 = arith.constant 0 : i32
    %c0_i32_1 = arith.constant 0 : i32
    return %c0_i32, %c0_i32_0 : i32, i32
  }
  func.func @transform_8(%arg0: i32) -> (i32, i32) {
    %c0_i32 = arith.constant 0 : i32
    %c0_i32_0 = arith.constant 0 : i32
    %c0_i32_1 = arith.constant 0 : i32
    return %c0_i32, %c0_i32_0 : i32, i32
  }
  func.func @transform_9(%arg0: i32) -> (i32, i32) {
    %c0_i32 = arith.constant 0 : i32
    %c0_i32_0 = arith.constant 0 : i32
    %c0_i32_1 = arith.constant 0 : i32
    return %c0_i32, %c0_i32_0 : i32, i32
  }
  func.func @transform_10(%arg0: i32) -> (i32, i32) {
    %c0_i32 = arith.constant 0 : i32
    %c0_i32_0 = arith.constant 0 : i32
    %c0_i32_1 = arith.constant 0 : i32
    return %c0_i32, %c0_i32_0 : i32, i32
  }
  func.func @transform_11(%arg0: i32) -> (i32, i32) {
    %c0_i32 = arith.constant 0 : i32
    %c0_i32_0 = arith.constant 0 : i32
    %c0_i32_1 = arith.constant 0 : i32
    return %c0_i32, %c0_i32_0 : i32, i32
  }
  func.func @transform_12(%arg0: i32) -> (i32, i32) {
    %c0_i32 = arith.constant 0 : i32
    %c0_i32_0 = arith.constant 0 : i32
    return %arg0, %c0_i32 : i32, i32
  }
}

</mosaic_0001>

<bundles_post_ra>
// kernel: tpu_custom_call.1
= control target key start
LH: loop header
LB: loop body
LE: loop exit
PB: predicated region body
PF: predicated region fallthrough
CT: control target
= control target key end

     0   :  { %s4687_s0 = inlined_call_operand.hbm [shape: f32[72,72], index: 0, kind: input, shape index: {}]   ;;  %s4688_s1 = inlined_call_operand.vmem [shape: f32[72,64], index: 1, kind: input, shape index: {}]   ;;  %s4689_s2 = inlined_call_operand.vmem [shape: f32[1,64], index: 2, kind: input, shape index: {}]   ;;  %s4690_s3 = inlined_call_operand.hbm [shape: f32[5,64,256], index: 3, kind: input, shape index: {}]   ;;  %s4691_s4 = inlined_call_operand.hbm [shape: f32[5,64,256], index: 4, kind: input, shape index: {}]   ;;  %s4692_s5 = inlined_call_operand.vmem [shape: f32[5,1,256], index: 5, kind: input, shape index: {}]   ;;  %s4693_s6 = inlined_call_operand.hbm [shape: f32[576,256], index: 6, kind: input, shape index: {}]   ;;  %s4694_s7 = inlined_call_operand.vmem [shape: f32[1,256], index: 7, kind: input, shape index: {}]   ;;  %s4695_s8 = inlined_call_operand.vmem [shape: f32[256,128], index: 8, kind: input, shape index: {}]   ;;  %s4696_s9 = inlined_call_operand.vmem [shape: f32[1,128], index: 9, kind: input, shape index: {}]   ;;  %s4697_s10 = inlined_call_operand.vmem [shape: f32[128,1], index: 10, kind: input, shape index: {}]   ;;  %s4698_s11 = inlined_call_operand.<no memory space> [shape: f32[1,1], index: 11, kind: input, shape index: {}]   ;;  %s4699_s12 = inlined_call_operand.vmem [shape: f32[8,1], index: 12, kind: output, shape index: {}]  }
   0x1   :  { %v17_v0 = vstv %s4698_s11 }
   0x2   :  { %18 = vst [vmem:[#allocation5] sm:$0x1] %v17_v0 }
   0x3   :  { %19 = vsyncpa [#allocation7], 0 }
   0x4   :  { %20 = vsyncpa [#allocation9], 0 }
   0x5   :  { %21 = vsyncpa [#allocation12], 0  ;;  %s3795_s23 = smov [#allocation8]   ;;  %s3581_s27 = scalar_lea.hbm %s4690_s3, 10240 }
   0x6   :  { %s43_s24 = sshll.u32 %s3795_s23, 4  ;;  %p3582_p0 = scmp.ne.s32.totalorder %s4690_s3, %s3581_s27  ;;  %s44_s24 = int_to_ptr.vmem [resolvable:$true] %s43_s24 }
   0x7   :  { %p3585_p1 = scmp.lt.u32.totalorder %s3581_s27, %s4690_s3 }
   0x9   :  { %p3587_p2 = pnand %p3585_p1, %p3582_p0 }
   0xb   :  { %3590 = shalt.err (!%p3587_p2)
}
   0xc   :  { %s3591_s11 = scalar_lea.vmem %s44_s24, 10240  ;;  %p3596_p4 = scmp.lt.s32.totalorder %s44_s24, %s44_s24 }
   0xd   :  { %p3592_p3 = scmp.ne.s32.totalorder %s44_s24, %s3591_s11  ;;  %p3597_p5 = scmp.lt.s32.totalorder %s3591_s11, %s3591_s11 }
   0xf   :  { %p3598_p6 = por %p3597_p5, %p3596_p4 }
  0x11   :  { %p3599_p7 = pnand %p3598_p6, %p3592_p3 }
  0x13   :  { %3602 = shalt.err (!%p3599_p7)
}
  0x14   :  { %s3796_s14 = smov 256   ;;  %s3797_s15 = smov 16  }
  0x15   :  { %49 = dma.hbm_to_vmem [thread:$0]  %s4690_s3, 10240, %s44_s24, [#allocation9], %s3796_s14, %s3796_s14, %s3797_s15  }
  0x16   :  { %s3798_s18 = smov [#allocation6]   ;;  %s3603_s22 = scalar_lea.hbm %s4687_s0, 1152 }
  0x17   :  { %s27_s19 = sshll.u32 %s3798_s18, 4  ;;  %p3604_p8 = scmp.ne.s32.totalorder %s4687_s0, %s3603_s22  ;;  %s28_s19 = int_to_ptr.vmem [resolvable:$true] %s27_s19 }
  0x18   :  { %p3607_p9 = scmp.lt.u32.totalorder %s3603_s22, %s4687_s0 }
  0x1a   :  { %p3609_p10 = pnand %p3607_p9, %p3604_p8 }
  0x1c   :  { %3612 = shalt.err (!%p3609_p10)
}
  0x1d   :  { %s3613_s28 = scalar_lea.vmem %s28_s19, 1152  ;;  %p3618_p12 = scmp.lt.s32.totalorder %s28_s19, %s28_s19 }
  0x1e   :  { %p3614_p11 = scmp.ne.s32.totalorder %s28_s19, %s3613_s28  ;;  %p3619_p13 = scmp.lt.s32.totalorder %s3613_s28, %s3613_s28 }
  0x20   :  { %p3620_p0 = por %p3619_p13, %p3618_p12 }
  0x22   :  { %p3621_p1 = pnand %p3620_p0, %p3614_p11 }
  0x24   :  { %3624 = shalt.err (!%p3621_p1)
}
  0x25   :  { %s3799_s3 = smov 128   ;;  %s3800_s24 = smov 8  }
  0x26   :  { %33 = dma.hbm_to_vmem [thread:$0]  %s4687_s0, 1152, %s28_s19, [#allocation7], %s3799_s3, %s3799_s3, %s3800_s24  }
  0x27   :  { %s3801_s13 = smov [#allocation10]   ;;  %s3802_s16 = smov [#allocation11]  }
  0x28   :  { %s55_s11 = sshll.u32 %s3801_s13, 4  ;;  %s69_s17 = sshll.u32 %s3802_s16, 4  ;;  %s56_s11 = int_to_ptr.vmem [resolvable:$true] %s55_s11  ;;  %s3912_s17 = int_to_ptr.vmem [resolvable:$true] %s69_s17 }
  0x29   :  { %s3625_s21 = scalar_lea.hbm %s4691_s4, 10240 }
  0x2a   :  { %p3626_p2 = scmp.ne.s32.totalorder %s4691_s4, %s3625_s21  ;;  %p3629_p3 = scmp.lt.u32.totalorder %s3625_s21, %s4691_s4 }
  0x2c   :  { %p3631_p4 = pnand %p3629_p3, %p3626_p2 }
  0x2e   :  { %3634 = shalt.err (!%p3631_p4)
}
  0x2f   :  { %s3635_s0 = scalar_lea.vmem %s56_s11, 10240  ;;  %p3640_p6 = scmp.lt.s32.totalorder %s56_s11, %s56_s11 }
  0x30   :  { %p3636_p5 = scmp.ne.s32.totalorder %s56_s11, %s3635_s0  ;;  %p3641_p7 = scmp.lt.s32.totalorder %s3635_s0, %s3635_s0 }
  0x32   :  { %p3642_p8 = por %p3641_p7, %p3640_p6 }
  0x34   :  { %p3643_p9 = pnand %p3642_p8, %p3636_p5 }
  0x36   :  { %3646 = shalt.err (!%p3643_p9)
}
  0x37   :  { %61 = dma.hbm_to_vmem [thread:$0]  %s4691_s4, 10240, %s56_s11, [#allocation9], %s3796_s14, %s3796_s14, %s3797_s15  }
  0x38   :  { %s3647_s24 = scalar_lea.hbm %s4693_s6, 18432 }
  0x39   :  { %p3648_p10 = scmp.ne.s32.totalorder %s4693_s6, %s3647_s24  ;;  %p3651_p11 = scmp.lt.u32.totalorder %s3647_s24, %s4693_s6 }
  0x3b   :  { %p3653_p12 = pnand %p3651_p11, %p3648_p10 }
  0x3d   :  { %3656 = shalt.err (!%p3653_p12)
}
  0x3e   :  { %s3657_s18 = scalar_lea.vmem %s3912_s17, 18432  ;;  %p3662_p0 = scmp.lt.s32.totalorder %s3912_s17, %s3912_s17 }
  0x3f   :  { %p3658_p13 = scmp.ne.s32.totalorder %s3912_s17, %s3657_s18  ;;  %p3663_p1 = scmp.lt.s32.totalorder %s3657_s18, %s3657_s18 }
  0x41   :  { %p3664_p2 = por %p3663_p1, %p3662_p0 }
  0x43   :  { %p3665_p3 = pnand %p3664_p2, %p3658_p13 }
  0x45   :  { %3668 = shalt.err (!%p3665_p3)
}
  0x46   :  { %75 = dma.hbm_to_vmem [thread:$0]  %s4693_s6, 18432, %s3912_s17, [#allocation12], %s3796_s14, %s3796_s14, %s3797_s15  }
  0x47   :  { %3729 = dma.done.wait [#allocation7], 1152  }
  0x48   :  { %3730 = vsyncadd [#allocation7], 4294966144 }
  0x49   :  { %3731 = dma.done.wait [#allocation9], 20480  }
  0x4a   :  { %3732 = vsyncadd [#allocation9], 4294946816 }
  0x4b   :  { %3733 = dma.done.wait [#allocation12], 18432  }
  0x4c   :  { %3734 = vsyncadd [#allocation12], 4294948864  ;;  %v3803_v1 = vmov 0.0|0.0   ;;  %vm3804_vm0 = vmmov 0   ;;  %v3805_v2 = vmov 0.0   ;;  %v3953_v3 = vld [vmem:[#allocation10] sm:$0xff] }
  0x4d   :  { %2969 = vmatprep.subr.bf16.mxu0 %v3803_v1  ;;  %2907 = vmatprep.mubr.msk.f32.mxu0 %vm3804_vm0, %v3805_v2  ;;  %v3955_v4 = vld [vmem:[#allocation10 + $0x8] sm:$0xff]  ;;  %v3957_v5 = vld [vmem:[#allocation10 + $0x10] sm:$0xff]  ;;  %v3959_v6 = vld [vmem:[#allocation10 + $0x18] sm:$0xff]  ;;  %vm123_vm1 = vcmask 588800   ;;  %vm288_vm3 = vcmask 523264   ;;  %s4094_s18 = smov 0  }
  0x4e   :  { %426 = vmatprep.mubr.f32.mxu1 %v3805_v2  ;;  %v3961_v7 = vld [vmem:[#allocation10 + $0x20] sm:$0xff]  ;;  %v3963_v8 = vld [vmem:[#allocation10 + $0x28] sm:$0xff]  ;;  %v3965_v9 = vld [vmem:[#allocation10 + $0x30] sm:$0xff] }
  0x4f   :  { %v3967_v10 = vld [vmem:[#allocation10 + $0x38] sm:$0xff]  ;;  %v3969_v11 = vld [vmem:[#allocation10 + $0x40] sm:$0xff]  ;;  %v3971_v12 = vld [vmem:[#allocation10 + $0x48] sm:$0xff] }
  0x50   :  { %v3973_v13 = vld [vmem:[#allocation10 + $0x50] sm:$0xff]  ;;  %v3975_v14 = vld [vmem:[#allocation10 + $0x58] sm:$0xff]  ;;  %v3977_v15 = vld [vmem:[#allocation10 + $0x60] sm:$0xff] }
  0x51   :  { %v3979_v16 = vld [vmem:[#allocation10 + $0x68] sm:$0xff]  ;;  %v3981_v17 = vld [vmem:[#allocation10 + $0x70] sm:$0xff]  ;;  %v3983_v18 = vld [vmem:[#allocation10 + $0x78] sm:$0xff] }
  0x52   :  { %v107_v19 = vld [vmem:[%s4688_s1] sm:$0xff]  ;;  %v108_v20 = vld [vmem:[%s4688_s1 + $0x8] sm:$0xff]  ;;  %v109_v22 = vld [vmem:[%s4688_s1 + $0x10] sm:$0xff] }
  0x53   :  { %v2970_v21 = vpack.c.bf16 %v108_v20, %v107_v19  ;;  %v110_v23 = vld [vmem:[%s4688_s1 + $0x18] sm:$0xff]  ;;  %v111_v25 = vld [vmem:[%s4688_s1 + $0x20] sm:$0xff]  ;;  %v112_v26 = vld [vmem:[%s4688_s1 + $0x28] sm:$0xff] }
  0x54   :  { %v2973_v24 = vpack.c.bf16 %v110_v23, %v109_v22  ;;  %v308_v27 = vld [vmem:[#allocation8 + $0x8] sm:$0xff]  ;;  %v310_v28 = vld [vmem:[#allocation8 + $0x18] sm:$0xff]  ;;  %v2976_v29 = vpack.c.bf16 %v112_v26, %v111_v25  ;;  %v307_v31 = vld [vmem:[#allocation8] sm:$0xff] }
  0x55   :  { %2971 = vmatpush3.bf16.msra.mxu0 %v2970_v21  ;;  %v2981_v30 = vpack.c.bf16 %v310_v28, %v308_v27  ;;  %v309_v32 = vld [vmem:[#allocation8 + $0x10] sm:$0xff]  ;;  %v113_v33 = vld [vmem:[%s4688_s1 + $0x30] sm:$0xff]  ;;  %v98_v38 = vld [vmem:[#allocation6] sm:$0xff] }
  0x56   :  { %2972 = vmatprep.subr.bf16.mxu0 %v3803_v1  ;;  %v114_v34 = vld [vmem:[%s4688_s1 + $0x38] sm:$0xff]  ;;  %v2983_v35 = vpack.c.bf16 %v309_v32, %v307_v31  ;;  %v115_v37 = vld [vmem:[%s4688_s1 + $0x40] sm:$0xff]  ;;  %v99_v39 = vld [vmem:[#allocation6 + $0x8] sm:$0xff] }
  0x57   :  { %2982 = vmatprep.subr.bf16.mxu1 %v2981_v30  ;;  %v2979_v36 = vpack.c.bf16 %v114_v34, %v113_v33  ;;  %v100_v40 = vld [vmem:[#allocation6 + $0x10] sm:$0xff]  ;;  %v101_v41 = vld [vmem:[#allocation6 + $0x18] sm:$0xff]  ;;  %v102_v42 = vld [vmem:[#allocation6 + $0x20] sm:$0xff] }
  0x58   :  { %2984 = vmatpush1.bf16.msra.mxu1 %v2983_v35  ;;  %v103_v43 = vld [vmem:[#allocation6 + $0x28] sm:$0xff]  ;;  %v104_v44 = vld [vmem:[#allocation6 + $0x30] sm:$0xff]  ;;  %v105_v45 = vld [vmem:[#allocation6 + $0x38] sm:$0xff] }
  0x59   :  { %2974 = vmatpush3.bf16.msra.mxu0 %v2973_v24  ;;  %v106_v46 = vld [vmem:[#allocation6 + $0x40] sm:$0xff]  ;;  %v312_v47 = vld [vmem:[#allocation8 + $0x28] sm:$0xff]  ;;  %v311_v50 = vld [vmem:[#allocation8 + $0x20] sm:$0xff] }
  0x5a   :  { %2975 = vmatprep.subr.bf16.mxu0 %v3803_v1  ;;  %v314_v48 = vld [vmem:[#allocation8 + $0x38] sm:$0xff]  ;;  %v313_v51 = vld [vmem:[#allocation8 + $0x30] sm:$0xff]  ;;  %v316_v53 = vld [vmem:[#allocation8 + $0x48] sm:$0xff] }
  0x5b   :  { %v2985_v49 = vpack.c.bf16 %v314_v48, %v312_v47  ;;  %v2987_v52 = vpack.c.bf16 %v313_v51, %v311_v50  ;;  %v318_v54 = vld [vmem:[#allocation8 + $0x58] sm:$0xff]  ;;  %v315_v56 = vld [vmem:[#allocation8 + $0x40] sm:$0xff]  ;;  %v317_v57 = vld [vmem:[#allocation8 + $0x50] sm:$0xff] }
  0x5c   :  { %v2989_v55 = vpack.c.bf16 %v318_v54, %v316_v53  ;;  %v2991_v58 = vpack.c.bf16 %v317_v57, %v315_v56  ;;  %v320_v59 = vld [vmem:[#allocation8 + $0x68] sm:$0xff]  ;;  %v322_v60 = vld [vmem:[#allocation8 + $0x78] sm:$0xff]  ;;  %v319_v62 = vld [vmem:[#allocation8 + $0x60] sm:$0xff] }
  0x5d   :  { %2977 = vmatpush3.bf16.msra.mxu0 %v2976_v29  ;;  %2986 = vmatprep.subr.bf16.mxu1 %v2985_v49  ;;  %v2993_v61 = vpack.c.bf16 %v322_v60, %v320_v59  ;;  %v321_v63 = vld [vmem:[#allocation8 + $0x70] sm:$0xff] }
  0x5e   :  { %2978 = vmatprep.subr.bf16.mxu0 %v3803_v1  ;;  %2988 = vmatpush1.bf16.msra.mxu1 %v2987_v52  ;;  %v2995_v0 = vpack.c.bf16 %v321_v63, %v319_v62  ;;  %v4044_v19 = vld [vmem:[%s4689_s2] ss:$0 sm:$0xff] }
  0x5f   :  { %2990 = vmatprep.subr.bf16.mxu1 %v2989_v55 }
  0x61   :  { %2980 = vmatpush3.bf16.msra.mxu0 %v2979_v36 }
  0x62   :  { %2905 = vmatprep.subr.mxu0 %v3805_v2  ;;  %2992 = vmatpush1.bf16.msra.mxu1 %v2991_v58 }
  0x63   :  { %2994 = vmatprep.subr.bf16.mxu1 %v2993_v61 }
  0x65   :  { %2906 = vmatpush3.msra.mxu0 %v115_v37 }
  0x66   :  { %2908 = vmatmul.mubr.msk.f32.vlgmr.msra.gmra.mrb[0].mxu0 %vm123_vm1, %v98_v38  ;;  %2996 = vmatpush1.bf16.msra.mxu1 %v2995_v0 }
  0x67   :  { %2910 = vmatprep.mubr.msk.f32.mxu0 %vm3804_vm0, %v3805_v2 }
  0x6a   :  { %2911 = vmatmul.mubr.msk.f32.gmra.mrb[2].mxu0 %vm123_vm1, %v99_v39 }
  0x6b   :  { %2913 = vmatprep.mubr.msk.f32.mxu0 %vm3804_vm0, %v3805_v2 }
  0x6e   :  { %2914 = vmatmul.mubr.msk.f32.gmra.mrb[4].mxu0 %vm123_vm1, %v100_v40 }
  0x6f   :  { %2916 = vmatprep.mubr.msk.f32.mxu0 %vm3804_vm0, %v3805_v2 }
  0x72   :  { %2917 = vmatmul.mubr.msk.f32.gmra.mrb[6].mxu0 %vm123_vm1, %v101_v41 }
  0x73   :  { %2919 = vmatprep.mubr.msk.f32.mxu0 %vm3804_vm0, %v3805_v2 }
  0x76   :  { %2920 = vmatmul.mubr.msk.f32.gmra.mrb[8].mxu0 %vm123_vm1, %v102_v42 }
  0x77   :  { %2922 = vmatprep.mubr.msk.f32.mxu0 %vm3804_vm0, %v3805_v2 }
  0x7a   :  { %2923 = vmatmul.mubr.msk.f32.gmra.mrb[10].mxu0 %vm123_vm1, %v103_v43 }
  0x7b   :  { %2925 = vmatprep.mubr.msk.f32.mxu0 %vm3804_vm0, %v3805_v2 }
  0x7e   :  { %2926 = vmatmul.mubr.msk.f32.gmra.mrb[12].mxu0 %vm123_vm1, %v104_v44 }
  0x7f   :  { %2928 = vmatprep.mubr.msk.f32.mxu0 %vm3804_vm0, %v3805_v2 }
  0x82   :  { %2929 = vmatmul.mubr.msk.f32.gmra.mrb[14].mxu0 %vm123_vm1, %v105_v45 }
  0x83   :  { %2931 = vmatprep.mubr.msk.f32.mxu0 %vm3804_vm0, %v3805_v2 }
  0x86   :  { %2932 = vmatmul.mubr.msk.f32.gmra.mrb[16].mxu0 %vm123_vm1, %v106_v46 }
 0x139   :  { %v217_v20 = vpop.f32.mrb[0].mxu0 }
 0x13a   :  { %v218_v21 = vadd.f32 %v4044_v19, %v217_v20  ;;  %v2909_v22 = vpop.f32.mrb[1].mxu0 }
 0x13c   :  { %vm261_vm2 = vcmp.gt.f32.partialorder %v218_v21, 0.0  ;;  %v270_v23 = vmul.f32 0.01, %v218_v21 }
 0x13d   :  { %v222_v24 = vpop.f32.mrb[2].mxu0 }
 0x13e   :  { %v279_v25 = vsel %vm261_vm2, %v218_v21, %v270_v23  ;;  %v223_v26 = vadd.f32 %v4044_v19, %v222_v24  ;;  %v2912_v27 = vpop.f32.mrb[3].mxu0 }
 0x13f   :  { %289 = vst.msk [vmem:[#allocation2] sm:$0xff] %vm288_vm3, %v279_v25 }
 0x140   :  { %vm262_vm4 = vcmp.gt.f32.partialorder %v223_v26, 0.0  ;;  %v271_v28 = vmul.f32 0.01, %v223_v26 }
 0x141   :  { %v227_v29 = vpop.f32.mrb[4].mxu0 }
 0x142   :  { %v280_v30 = vsel %vm262_vm4, %v223_v26, %v271_v28  ;;  %v228_v31 = vadd.f32 %v4044_v19, %v227_v29  ;;  %v2915_v32 = vpop.f32.mrb[5].mxu0  ;;  %v325_v28 = vlaneseq }
 0x143   :  { %290 = vst.msk [vmem:[#allocation2 + $0x8] sm:$0xff] %vm288_vm3, %v280_v30 }
 0x144   :  { %vm263_vm5 = vcmp.gt.f32.partialorder %v228_v31, 0.0  ;;  %v272_v33 = vmul.f32 0.01, %v228_v31  ;;  %v326_v29 = vshrl.u32 %v325_v28, 7 }
 0x145   :  { %v232_v34 = vpop.f32.mrb[6].mxu0 }
 0x146   :  { %v281_v35 = vsel %vm263_vm5, %v228_v31, %v272_v33  ;;  %v233_v36 = vadd.f32 %v4044_v19, %v232_v34  ;;  %v2918_v37 = vpop.f32.mrb[7].mxu0  ;;  %v298_v38 = vld [vmem:[#allocation2] sm:$0xff]  ;;  %v4081_v30 = vsub.s32 0, %v326_v29  ;;  %v4086_v32 = vsub.s32 1, %v326_v29 }
 0x147   :  { %291 = vst.msk [vmem:[#allocation2 + $0x10] sm:$0xff] %vm288_vm3, %v281_v35  ;;  %2732 = vmatmul.mubr.msk.f32.vlgmr.msra.gmra.mrb[0].mxu1 %vm288_vm3, %v298_v38  ;;  %v323_v31 = vld [vmem:[%s4692_s5] sm:$0x3] }
 0x148   :  { %vm264_vm6 = vcmp.gt.f32.partialorder %v233_v36, 0.0  ;;  %v273_v39 = vmul.f32 0.01, %v233_v36  ;;  %432 = vmatprep.mubr.f32.mxu1 %v3805_v2  ;;  %v328_v33 = vrot.slane %v323_v31, %v4081_v30  ;;  %v332_v34 = vrot.slane %v323_v31, %v4086_v32 }
 0x149   :  { %v237_v40 = vpop.f32.mrb[8].mxu0 }
 0x14a   :  { %v282_v41 = vsel %vm264_vm6, %v233_v36, %v273_v39  ;;  %v238_v42 = vadd.f32 %v4044_v19, %v237_v40  ;;  %v2921_v43 = vpop.f32.mrb[9].mxu0  ;;  %v299_v44 = vld [vmem:[#allocation2 + $0x8] sm:$0xff] }
 0x14b   :  { %292 = vst.msk [vmem:[#allocation2 + $0x18] sm:$0xff] %vm288_vm3, %v282_v41  ;;  %2733 = vmatmul.mubr.msk.f32.gmra.mrb[2].mxu1 %vm288_vm3, %v299_v44 }
 0x14c   :  { %vm265_vm7 = vcmp.gt.f32.partialorder %v238_v42, 0.0  ;;  %v274_v45 = vmul.f32 0.01, %v238_v42  ;;  %438 = vmatprep.mubr.f32.mxu1 %v3805_v2 }
 0x14d   :  { %v242_v46 = vpop.f32.mrb[10].mxu0 }
 0x14e   :  { %v283_v47 = vsel %vm265_vm7, %v238_v42, %v274_v45  ;;  %v243_v48 = vadd.f32 %v4044_v19, %v242_v46  ;;  %v2924_v49 = vpop.f32.mrb[11].mxu0  ;;  %v300_v50 = vld [vmem:[#allocation2 + $0x10] sm:$0xff] }
 0x14f   :  { %293 = vst.msk [vmem:[#allocation2 + $0x20] sm:$0xff] %vm288_vm3, %v283_v47  ;;  %2734 = vmatmul.mubr.msk.f32.gmra.mrb[4].mxu1 %vm288_vm3, %v300_v50 }
 0x150   :  { %vm266_vm8 = vcmp.gt.f32.partialorder %v243_v48, 0.0  ;;  %v275_v51 = vmul.f32 0.01, %v243_v48  ;;  %444 = vmatprep.mubr.f32.mxu1 %v3805_v2 }
 0x151   :  { %v247_v52 = vpop.f32.mrb[12].mxu0 }
 0x152   :  { %v284_v53 = vsel %vm266_vm8, %v243_v48, %v275_v51  ;;  %v248_v54 = vadd.f32 %v4044_v19, %v247_v52  ;;  %v2927_v55 = vpop.f32.mrb[13].mxu0  ;;  %v301_v56 = vld [vmem:[#allocation2 + $0x18] sm:$0xff] }
 0x153   :  { %294 = vst.msk [vmem:[#allocation2 + $0x28] sm:$0xff] %vm288_vm3, %v284_v53  ;;  %2735 = vmatmul.mubr.msk.f32.gmra.mrb[6].mxu1 %vm288_vm3, %v301_v56 }
 0x154   :  { %vm267_vm9 = vcmp.gt.f32.partialorder %v248_v54, 0.0  ;;  %v276_v57 = vmul.f32 0.01, %v248_v54  ;;  %450 = vmatprep.mubr.f32.mxu1 %v3805_v2 }
 0x155   :  { %v252_v58 = vpop.f32.mrb[14].mxu0 }
 0x156   :  { %v285_v59 = vsel %vm267_vm9, %v248_v54, %v276_v57  ;;  %v253_v60 = vadd.f32 %v4044_v19, %v252_v58  ;;  %v2930_v61 = vpop.f32.mrb[15].mxu0  ;;  %v302_v62 = vld [vmem:[#allocation2 + $0x20] sm:$0xff] }
 0x157   :  { %295 = vst.msk [vmem:[#allocation2 + $0x30] sm:$0xff] %vm288_vm3, %v285_v59  ;;  %2736 = vmatmul.mubr.msk.f32.gmra.mrb[8].mxu1 %vm288_vm3, %v302_v62 }
 0x158   :  { %vm268_vm10 = vcmp.gt.f32.partialorder %v253_v60, 0.0  ;;  %v277_v63 = vmul.f32 0.01, %v253_v60  ;;  %456 = vmatprep.mubr.f32.mxu1 %v3805_v2 }
 0x159   :  { %v257_v0 = vpop.f32.mrb[16].mxu0 }
 0x15a   :  { %v286_v20 = vsel %vm268_vm10, %v253_v60, %v277_v63  ;;  %v258_v21 = vadd.f32 %v4044_v19, %v257_v0  ;;  %v2933_v22 = vpop.f32.mrb[17].mxu0  ;;  %v303_v23 = vld [vmem:[#allocation2 + $0x28] sm:$0xff] }
 0x15b   :  { %296 = vst.msk [vmem:[#allocation2 + $0x38] sm:$0xff] %vm288_vm3, %v286_v20  ;;  %2737 = vmatmul.mubr.msk.f32.gmra.mrb[10].mxu1 %vm288_vm3, %v303_v23 }
 0x15c   :  { %vm269_vm11 = vcmp.gt.f32.partialorder %v258_v21, 0.0  ;;  %v278_v24 = vmul.f32 0.01, %v258_v21  ;;  %462 = vmatprep.mubr.f32.mxu1 %v3805_v2 }
 0x15e   :  { %v287_v25 = vsel %vm269_vm11, %v258_v21, %v278_v24  ;;  %v304_v26 = vld [vmem:[#allocation2 + $0x30] sm:$0xff] }
 0x15f   :  { %297 = vst.msk [vmem:[#allocation2 + $0x40] sm:$0xff] %vm288_vm3, %v287_v25  ;;  %2738 = vmatmul.mubr.msk.f32.gmra.mrb[12].mxu1 %vm288_vm3, %v304_v26  ;;  %v4090_v26 = vmov 0.0  }
 0x160   :  { %468 = vmatprep.mubr.f32.mxu1 %v3805_v2 }
 0x162   :  { %v305_v27 = vld [vmem:[#allocation2 + $0x38] sm:$0xff] }
 0x163   :  { %2739 = vmatmul.mubr.msk.f32.gmra.mrb[14].mxu1 %vm288_vm3, %v305_v27  ;;  %v4092_v27 = vmov 0.0  }
 0x164   :  { %474 = vmatprep.mubr.f32.mxu1 %v3805_v2 }
 0x166   :  { %v306_v19 = vld [vmem:[#allocation2 + $0x40] sm:$0xff] }
 0x167   :  { %2740 = vmatmul.mubr.msk.f32.gmra.mrb[16].mxu1 %vm288_vm3, %v306_v19 }
 0x21a   :  { %v428_v35 = vpop.f32.mrb[0].mxu1 }
 0x21b   :  { %v429_v36 = vadd.f32 %v428_v35, %v328_v33  ;;  %v430_v37 = vpop.f32.mrb[1].mxu1 }
 0x21c   :  { %v431_v38 = vadd.f32 %v430_v37, %v332_v34 }
 0x21d   :  { %481 = vst [vmem:[#allocation3] sm:$0xff] %v429_v36 }
 0x21e   :  { %482 = vst [vmem:[#allocation3 + $0x8] sm:$0xff] %v431_v38  ;;  %v434_v39 = vpop.f32.mrb[2].mxu1 }
 0x21f   :  { %v435_v40 = vadd.f32 %v434_v39, %v328_v33  ;;  %v436_v41 = vpop.f32.mrb[3].mxu1 }
 0x220   :  { %v437_v42 = vadd.f32 %v436_v41, %v332_v34 }
 0x221   :  { %483 = vst [vmem:[#allocation3 + $0x10] sm:$0xff] %v435_v40 }
 0x222   :  { %484 = vst [vmem:[#allocation3 + $0x18] sm:$0xff] %v437_v42  ;;  %v440_v43 = vpop.f32.mrb[4].mxu1 }
 0x223   :  { %v441_v44 = vadd.f32 %v440_v43, %v328_v33  ;;  %v442_v45 = vpop.f32.mrb[5].mxu1 }
 0x224   :  { %v443_v46 = vadd.f32 %v442_v45, %v332_v34 }
 0x225   :  { %485 = vst [vmem:[#allocation3 + $0x20] sm:$0xff] %v441_v44 }
 0x226   :  { %486 = vst [vmem:[#allocation3 + $0x28] sm:$0xff] %v443_v46  ;;  %v446_v47 = vpop.f32.mrb[6].mxu1 }
 0x227   :  { %v447_v48 = vadd.f32 %v446_v47, %v328_v33  ;;  %v448_v49 = vpop.f32.mrb[7].mxu1 }
 0x228   :  { %v449_v50 = vadd.f32 %v448_v49, %v332_v34 }
 0x229   :  { %487 = vst [vmem:[#allocation3 + $0x30] sm:$0xff] %v447_v48 }
 0x22a   :  { %488 = vst [vmem:[#allocation3 + $0x38] sm:$0xff] %v449_v50  ;;  %v452_v51 = vpop.f32.mrb[8].mxu1 }
 0x22b   :  { %v453_v52 = vadd.f32 %v452_v51, %v328_v33  ;;  %v454_v53 = vpop.f32.mrb[9].mxu1 }
 0x22c   :  { %v455_v54 = vadd.f32 %v454_v53, %v332_v34 }
 0x22d   :  { %489 = vst [vmem:[#allocation3 + $0x40] sm:$0xff] %v453_v52 }
 0x22e   :  { %490 = vst [vmem:[#allocation3 + $0x48] sm:$0xff] %v455_v54  ;;  %v458_v55 = vpop.f32.mrb[10].mxu1 }
 0x22f   :  { %v459_v56 = vadd.f32 %v458_v55, %v328_v33  ;;  %v460_v57 = vpop.f32.mrb[11].mxu1 }
 0x230   :  { %v461_v58 = vadd.f32 %v460_v57, %v332_v34 }
 0x231   :  { %491 = vst [vmem:[#allocation3 + $0x50] sm:$0xff] %v459_v56 }
 0x232   :  { %492 = vst [vmem:[#allocation3 + $0x58] sm:$0xff] %v461_v58  ;;  %v464_v59 = vpop.f32.mrb[12].mxu1 }
 0x233   :  { %v465_v60 = vadd.f32 %v464_v59, %v328_v33  ;;  %v466_v61 = vpop.f32.mrb[13].mxu1 }
 0x234   :  { %v467_v62 = vadd.f32 %v466_v61, %v332_v34 }
 0x235   :  { %493 = vst [vmem:[#allocation3 + $0x60] sm:$0xff] %v465_v60 }
 0x236   :  { %494 = vst [vmem:[#allocation3 + $0x68] sm:$0xff] %v467_v62  ;;  %v470_v63 = vpop.f32.mrb[14].mxu1 }
 0x237   :  { %v471_v0 = vadd.f32 %v470_v63, %v328_v33  ;;  %v472_v20 = vpop.f32.mrb[15].mxu1 }
 0x238   :  { %v473_v21 = vadd.f32 %v472_v20, %v332_v34 }
 0x239   :  { %495 = vst [vmem:[#allocation3 + $0x70] sm:$0xff] %v471_v0 }
 0x23a   :  { %496 = vst [vmem:[#allocation3 + $0x78] sm:$0xff] %v473_v21  ;;  %v476_v22 = vpop.f32.mrb[16].mxu1 }
 0x23b   :  { %v477_v23 = vadd.f32 %v476_v22, %v328_v33  ;;  %v478_v24 = vpop.f32.mrb[17].mxu1 }
 0x23c   :  { %v479_v25 = vadd.f32 %v478_v24, %v332_v34 }
 0x23d   :  { %497 = vst [vmem:[#allocation3 + $0x80] sm:$0xff] %v477_v23 }
 0x23e   :  { %498 = vst [vmem:[#allocation3 + $0x88] sm:$0xff] %v479_v25 }
 0x23f LB: > { %v2997_v19 = vpack.c.bf16 %v3959_v6, %v3955_v4  ;;  %v2999_v28 = vpack.c.bf16 %v3957_v5, %v3953_v3  ;;  %v3001_v29 = vpack.c.bf16 %v3967_v10, %v3963_v8  ;;  %v3003_v31 = vpack.c.bf16 %v3965_v9, %v3961_v7  ;;  %s2741_s4 = sshll.u32 %s3745_s18, 3  ;;  %s3807_s15 = smov 64   ;;  %s3745_s18 = sphi %s4094_s18, %s520_s18   ;;  %v3741_v27 = vphi %v4092_v27, %v636_v27   ;;  %v3737_v26 = vphi %v4090_v26, %v630_v26  }
 0x240   : > { %v3806_v33 = vmov 0.0   ;;  %v3005_v34 = vpack.c.bf16 %v3975_v14, %v3971_v12  ;;  %v3007_v35 = vpack.c.bf16 %v3973_v13, %v3969_v11  ;;  %v3009_v36 = vpack.c.bf16 %v3983_v18, %v3979_v16  ;;  %s524_s11 = sshra.s32 %s2741_s4, 3  ;;  %s637_s17 = scalar_lea.vmem [#allocation2], %s2741_s4 }
 0x241   : > { %2998 = vmatprep.subr.bf16.mxu0 %v2997_v19  ;;  %598 = vmatprep.mubr.f32.mxu0 %v3806_v33  ;;  %v3011_v37 = vpack.c.bf16 %v3981_v17, %v3977_v15  ;;  %s2814_s6 = sshll.u32 %s524_s11, 4  ;;  %s520_s18 = sadd.s32 1, %s3745_s18  }
 0x242   : > { %3000 = vmatpush1.bf16.msra.mxu0 %v2999_v28  ;;  %s528_s14 = scalar_lea.vmem [#allocation3], %s2814_s6  ;;  %p517_p4 = scmp.ge.s32.totalorder %s520_s18, 9  }
 0x243   : > { %3002 = vmatprep.subr.bf16.mxu0 %v3001_v29  ;;  %v650_v59 = vld [vmem:[#allocation8 + $0x88] sm:$0xff] (%p517_p4)  ;;  %v652_v60 = vld [vmem:[#allocation8 + $0x98] sm:$0xff] (%p517_p4)  ;;  %v649_v61 = vld [vmem:[#allocation8 + $0x80] sm:$0xff] (%p517_p4)  ;;  %799 = vmatprep.mubr.f32.mxu1 (%p517_p4), %v3805_v2  ;;  %s4190_s22 = smov (%p517_p4), 0  }
 0x244   :  { %v3013_v62 = vpack.c.bf16 (%p517_p4), %v652_v60, %v650_v59  ;;  %v651_v63 = vld [vmem:[#allocation8 + $0x90] sm:$0xff] (%p517_p4)  ;;  %v654_v0 = vld [vmem:[#allocation8 + $0xa8] sm:$0xff] (%p517_p4)  ;;  %v656_v20 = vld [vmem:[#allocation8 + $0xb8] sm:$0xff] (%p517_p4) }
 0x245   : > { %v530_v38 = vld [vmem:[%s528_s14 + $0x8] sm:$0xff]  ;;  %v529_v43 = vld [vmem:[%s528_s14] sm:$0xff]  ;;  %v3015_v21 = vpack.c.bf16 (%p517_p4), %v651_v63, %v649_v61  ;;  %v3017_v22 = vpack.c.bf16 (%p517_p4), %v656_v20, %v654_v0  ;;  %v658_v25 = vld [vmem:[#allocation8 + $0xc8] sm:$0xff] (%p517_p4) }
 0x246   : > { %3004 = vmatpush1.bf16.msra.mxu0 %v3003_v31  ;;  %v653_v23 = vld [vmem:[#allocation8 + $0xa0] sm:$0xff] (%p517_p4)  ;;  %v655_v24 = vld [vmem:[#allocation8 + $0xb0] sm:$0xff] (%p517_p4)  ;;  %3341 = vmatprep.subr.bf16.mxu1 (%p517_p4), %v3013_v62  ;;  %v662_v7 = vld [vmem:[#allocation8 + $0xe8] sm:$0xff] (%p517_p4) }
 0x247   : > { %3006 = vmatprep.subr.bf16.mxu0 %v3005_v34  ;;  %3345 = vmatpush1.bf16.msra.mxu1 (%p517_p4), %v3015_v21  ;;  %v3019_v3 = vpack.c.bf16 (%p517_p4), %v655_v24, %v653_v23  ;;  %v657_v5 = vld [vmem:[#allocation8 + $0xc0] sm:$0xff] (%p517_p4)  ;;  %v659_v6 = vld [vmem:[#allocation8 + $0xd0] sm:$0xff] (%p517_p4)  ;;  %v664_v8 = vld [vmem:[#allocation8 + $0xf8] sm:$0xff] (%p517_p4) }
 0x248   :  { %3342 = vmatprep.subr.bf16.mxu1 (%p517_p4), %v3017_v22  ;;  %v3023_v9 = vpack.c.bf16 (%p517_p4), %v659_v6, %v657_v5  ;;  %v3025_v10 = vpack.c.bf16 (%p517_p4), %v664_v8, %v662_v7  ;;  %v661_v11 = vld [vmem:[#allocation8 + $0xe0] sm:$0xff] (%p517_p4)  ;;  %v663_v12 = vld [vmem:[#allocation8 + $0xf0] sm:$0xff] (%p517_p4)  ;;  %v4151_v33 = vld [vmem:[#allocation10 + $0x88] sm:$0xff] (%p517_p4) }
 0x249   :  { %v3027_v13 = vpack.c.bf16 (%p517_p4), %v663_v12, %v661_v11  ;;  %v4149_v31 = vld [vmem:[#allocation10 + $0x80] sm:$0xff] (%p517_p4)  ;;  %v4153_v34 = vld [vmem:[#allocation10 + $0x90] sm:$0xff] (%p517_p4) }
 0x24a   : > { %3008 = vmatpush1.bf16.msra.mxu0 %v3007_v35  ;;  %v4155_v35 = vld [vmem:[#allocation10 + $0x98] sm:$0xff] (%p517_p4) }
 0x24b   : > { %3010 = vmatprep.subr.bf16.mxu0 %v3009_v36  ;;  %3346 = vmatpush1.bf16.msra.mxu1 (%p517_p4), %v3019_v3  ;;  %v4157_v36 = vld [vmem:[#allocation10 + $0xa0] sm:$0xff] (%p517_p4) }
 0x24e   : > { %3012 = vmatpush1.bf16.msra.mxu0 %v3011_v37  ;;  %v4159_v37 = vld [vmem:[#allocation10 + $0xa8] sm:$0xff] (%p517_p4) }
 0x24f   :  { %3014 = vmatprep.subr.bf16.mxu0 (%p517_p4), %v3013_v62 }
 0x251   : > { %2744 = vmatmul.mubr.msk.f32.vlgmr.msra.gmra.mrb[0].mxu0 %vm288_vm3, %v3741_v27 }
 0x252   :  { %769 = vmatprep.mubr.f32.mxu0 (%p517_p4), %v3805_v2  ;;  %3016 = vmatpush1.bf16.msra.mxu0 (%p517_p4), %v3015_v21 }
 0x253   :  { %3018 = vmatprep.subr.bf16.mxu0 (%p517_p4), %v3017_v22 }
 0x256   :  { %3020 = vmatpush1.bf16.msra.mxu0 (%p517_p4), %v3019_v3 }
 0x324   : > { %v600_v39 = vpop.f32.mrb[0].mxu0 }
 0x325   : > { %v602_v40 = vpop.f32.mrb[1].mxu0  ;;  %v605_v44 = vadd.f32 %v600_v39, %v529_v43  ;;  %v4163_v39 = vld [vmem:[#allocation10 + $0xb8] sm:$0xff] (%p517_p4) }
 0x326   : > { %v606_v41 = vadd.f32 %v602_v40, %v530_v38  ;;  %v4161_v38 = vld [vmem:[#allocation10 + $0xb0] sm:$0xff] (%p517_p4)  ;;  %v4165_v40 = vld [vmem:[#allocation10 + $0xc0] sm:$0xff] (%p517_p4)  ;;  %v4171_v43 = vld [vmem:[#allocation10 + $0xd8] sm:$0xff] (%p517_p4) }
 0x327   : > { %v2745_v45 = vmul.f32 -1.442695, %v605_v44  ;;  %v4173_v44 = vld [vmem:[#allocation10 + $0xe0] sm:$0xff] (%p517_p4) }
 0x328   : > { %3521 = vtanh.f32 %v606_v41  ;;  %v2746_v54 = vmul.f32 -1.442695, %v606_v41  ;;  %v4167_v41 = vld [vmem:[#allocation10 + $0xc8] sm:$0xff] (%p517_p4) }
 0x329   : > { %3523 = vpow2.f32 %v2745_v45  ;;  %v4175_v45 = vld [vmem:[#allocation10 + $0xe8] sm:$0xff] (%p517_p4) }
 0x332   : > { %v3522_v42 = vpop.eup %3521 }
 0x333   : > { %622 = vrot.lane.b32.xlu0 %v3522_v42, %s3807_s15  ;;  %v3524_v46 = vpop.eup %3523  ;;  %v4169_v42 = vld [vmem:[#allocation10 + $0xd0] sm:$0xff] (%p517_p4) }
 0x334   : > { %v613_v47 = vadd.f32 1.0, %v3524_v46  ;;  %v4177_v46 = vld [vmem:[#allocation10 + $0xf0] sm:$0xff] (%p517_p4) }
 0x336   : > { %3525 = vrcp.f32 %v613_v47  ;;  %v4179_v47 = vld [vmem:[#allocation10 + $0xf8] sm:$0xff] (%p517_p4) }
 0x340   : > { %v3526_v48 = vpop.eup %3525 }
 0x341   : > { %v620_v51 = vmul.f32 %v3737_v26, %v3526_v48 }
 0x3a5   : > { %v623_v49 = vpop.permute.xlu0 %622 }
 0x3a6   : > { %v625_v50 = vmul.f32 %v3526_v48, %v623_v49  ;;  %v2747_v48 = vld [vmem:[%s4692_s5 + $0x2] sm:$0x3] (%p517_p4) }
 0x3a7   :  { %v671_v49 = vrot.slane (%p517_p4), %v2747_v48, %v4081_v30 }
 0x3a8   : > { %627 = vrot.lane.b32.xlu0 %v625_v50, %s3807_s15  ;;  %v675_v50 = vrot.slane (%p517_p4), %v2747_v48, %v4086_v32 }
 0x41a   : > { %v628_v52 = vpop.permute.xlu0 %627 }
 0x41b   : > { %v630_v26 = vadd.f32 %v628_v52, %v620_v51  }
 0x41d   : > { %3527 = vtanh.f32 %v630_v26 }
 0x41e   : > { %3529 = vpow2.f32 %v2746_v54 }
 0x427   : > { %v3528_v53 = vpop.eup %3527 }
 0x428   : > { %633 = vrot.lane.b32.xlu1 %v3528_v53, %s3807_s15  ;;  %v3530_v55 = vpop.eup %3529 }
 0x429   : > { %v614_v56 = vadd.f32 1.0, %v3530_v55 }
 0x42b   : > { %3531 = vrcp.f32 %v614_v56 }
 0x435   : > { %v3532_v57 = vpop.eup %3531 }
 0x497   :  { %519 = sbr.rel (!%p517_p4) target bundleno = 575 (0x23f), region = 141 }
 0x49a   : > { %v634_v58 = vpop.permute.xlu1 %633 }
 0x49b   : > { %v636_v27 = vmul.f32 %v3532_v57, %v634_v58  }
 0x49d   : > { %638 = vst.msk [vmem:[%s637_s17] sm:$0xff] %vm288_vm3, %v636_v27  ;;  %v660_v27 = vld [vmem:[#allocation8 + $0xd8] sm:$0xff] (%p517_p4) }
 0x49e   :  { %v3021_v4 = vpack.c.bf16 %v660_v27, %v658_v25 }
 0x4a0   :  { %3022 = vmatprep.subr.bf16.mxu0 %v3021_v4  ;;  %3343 = vmatprep.subr.bf16.mxu1 %v3021_v4 }
 0x4a1   :  { %3024 = vmatpush1.bf16.msra.mxu0 %v3023_v9  ;;  %3347 = vmatpush1.bf16.msra.mxu1 %v3023_v9 }
 0x4a2   :  { %3026 = vmatprep.subr.bf16.mxu0 %v3025_v10  ;;  %3344 = vmatprep.subr.bf16.mxu1 %v3025_v10 }
 0x4a4   :  { %v639_v14 = vld [vmem:[#allocation2] sm:$0xff]  ;;  %v644_v15 = vld [vmem:[#allocation2 + $0x28] sm:$0xff]  ;;  %v645_v17 = vld [vmem:[#allocation2 + $0x30] sm:$0xff] }
 0x4a5   :  { %3028 = vmatpush1.bf16.msra.mxu0 %v3027_v13  ;;  %3348 = vmatpush1.bf16.msra.mxu1 %v3027_v13  ;;  %v640_v16 = vld [vmem:[#allocation2 + $0x8] sm:$0xff]  ;;  %v641_v18 = vld [vmem:[#allocation2 + $0x10] sm:$0xff]  ;;  %v646_v26 = vld [vmem:[#allocation2 + $0x38] sm:$0xff] }
 0x4a6   :  { %v642_v19 = vld [vmem:[#allocation2 + $0x18] sm:$0xff]  ;;  %v647_v28 = vld [vmem:[#allocation2 + $0x40] sm:$0xff] }
 0x4a7   :  { %v643_v29 = vld [vmem:[#allocation2 + $0x20] sm:$0xff] }
 0x4a8   :  { %2748 = vmatmul.mubr.msk.f32.vlgmr.msra.gmra.mrb[0].mxu0 %vm288_vm3, %v639_v14  ;;  %2753 = vmatmul.mubr.msk.f32.vlgmr.msra.gmra.mrb[0].mxu1 %vm288_vm3, %v644_v15 }
 0x4a9   :  { %775 = vmatprep.mubr.f32.mxu0 %v3805_v2  ;;  %805 = vmatprep.mubr.f32.mxu1 %v3805_v2 }
 0x4ac   :  { %2749 = vmatmul.mubr.msk.f32.gmra.mrb[2].mxu0 %vm288_vm3, %v640_v16  ;;  %2754 = vmatmul.mubr.msk.f32.gmra.mrb[2].mxu1 %vm288_vm3, %v645_v17 }
 0x4ad   :  { %781 = vmatprep.mubr.f32.mxu0 %v3805_v2  ;;  %811 = vmatprep.mubr.f32.mxu1 %v3805_v2 }
 0x4b0   :  { %2750 = vmatmul.mubr.msk.f32.gmra.mrb[4].mxu0 %vm288_vm3, %v641_v18  ;;  %2755 = vmatmul.mubr.msk.f32.gmra.mrb[4].mxu1 %vm288_vm3, %v646_v26  ;;  %v4186_v18 = vmov 0.0   ;;  %v4188_v26 = vmov 0.0  }
 0x4b1   :  { %787 = vmatprep.mubr.f32.mxu0 %v3805_v2  ;;  %817 = vmatprep.mubr.f32.mxu1 %v3805_v2 }
 0x4b4   :  { %2751 = vmatmul.mubr.msk.f32.gmra.mrb[6].mxu0 %vm288_vm3, %v642_v19  ;;  %2756 = vmatmul.mubr.msk.f32.gmra.mrb[6].mxu1 %vm288_vm3, %v647_v28 }
 0x4b5   :  { %793 = vmatprep.mubr.f32.mxu0 %v3805_v2 }
 0x4b8   :  { %2752 = vmatmul.mubr.msk.f32.gmra.mrb[8].mxu0 %vm288_vm3, %v643_v29 }
 0x57b   :  { %v771_v51 = vpop.f32.mrb[0].mxu0  ;;  %v801_v52 = vpop.f32.mrb[0].mxu1 }
 0x57c   :  { %v772_v53 = vadd.f32 %v771_v51, %v671_v49  ;;  %v773_v54 = vpop.f32.mrb[1].mxu0  ;;  %v802_v55 = vadd.f32 %v801_v52, %v671_v49  ;;  %v803_v56 = vpop.f32.mrb[1].mxu1 }
 0x57d   :  { %v774_v57 = vadd.f32 %v773_v54, %v675_v50  ;;  %v804_v58 = vadd.f32 %v803_v56, %v675_v50 }
 0x57e   :  { %824 = vst [vmem:[#allocation3] sm:$0xff] %v772_v53  ;;  %834 = vst [vmem:[#allocation3 + $0x50] sm:$0xff] %v802_v55 }
 0x57f   :  { %825 = vst [vmem:[#allocation3 + $0x8] sm:$0xff] %v774_v57  ;;  %v777_v59 = vpop.f32.mrb[2].mxu0  ;;  %835 = vst [vmem:[#allocation3 + $0x58] sm:$0xff] %v804_v58  ;;  %v807_v60 = vpop.f32.mrb[2].mxu1 }
 0x580   :  { %v778_v61 = vadd.f32 %v777_v59, %v671_v49  ;;  %v779_v62 = vpop.f32.mrb[3].mxu0  ;;  %v808_v63 = vadd.f32 %v807_v60, %v671_v49  ;;  %v809_v0 = vpop.f32.mrb[3].mxu1 }
 0x581   :  { %v780_v20 = vadd.f32 %v779_v62, %v675_v50  ;;  %v810_v21 = vadd.f32 %v809_v0, %v675_v50 }
 0x582   :  { %826 = vst [vmem:[#allocation3 + $0x10] sm:$0xff] %v778_v61  ;;  %836 = vst [vmem:[#allocation3 + $0x60] sm:$0xff] %v808_v63 }
 0x583   :  { %827 = vst [vmem:[#allocation3 + $0x18] sm:$0xff] %v780_v20  ;;  %v783_v22 = vpop.f32.mrb[4].mxu0  ;;  %837 = vst [vmem:[#allocation3 + $0x68] sm:$0xff] %v810_v21  ;;  %v813_v23 = vpop.f32.mrb[4].mxu1 }
 0x584   :  { %v784_v24 = vadd.f32 %v783_v22, %v671_v49  ;;  %v785_v25 = vpop.f32.mrb[5].mxu0  ;;  %v814_v27 = vadd.f32 %v813_v23, %v671_v49  ;;  %v815_v3 = vpop.f32.mrb[5].mxu1 }
 0x585   :  { %v786_v4 = vadd.f32 %v785_v25, %v675_v50  ;;  %v816_v5 = vadd.f32 %v815_v3, %v675_v50 }
 0x586   :  { %828 = vst [vmem:[#allocation3 + $0x20] sm:$0xff] %v784_v24  ;;  %838 = vst [vmem:[#allocation3 + $0x70] sm:$0xff] %v814_v27 }
 0x587   :  { %829 = vst [vmem:[#allocation3 + $0x28] sm:$0xff] %v786_v4  ;;  %v789_v6 = vpop.f32.mrb[6].mxu0  ;;  %839 = vst [vmem:[#allocation3 + $0x78] sm:$0xff] %v816_v5  ;;  %v819_v7 = vpop.f32.mrb[6].mxu1 }
 0x588   :  { %v790_v8 = vadd.f32 %v789_v6, %v671_v49  ;;  %v791_v9 = vpop.f32.mrb[7].mxu0  ;;  %v820_v10 = vadd.f32 %v819_v7, %v671_v49  ;;  %v821_v11 = vpop.f32.mrb[7].mxu1 }
 0x589   :  { %v792_v12 = vadd.f32 %v791_v9, %v675_v50  ;;  %v822_v13 = vadd.f32 %v821_v11, %v675_v50 }
 0x58a   :  { %830 = vst [vmem:[#allocation3 + $0x30] sm:$0xff] %v790_v8  ;;  %840 = vst [vmem:[#allocation3 + $0x80] sm:$0xff] %v820_v10 }
 0x58b   :  { %831 = vst [vmem:[#allocation3 + $0x38] sm:$0xff] %v792_v12  ;;  %v795_v14 = vpop.f32.mrb[8].mxu0  ;;  %841 = vst [vmem:[#allocation3 + $0x88] sm:$0xff] %v822_v13 }
 0x58c   :  { %v796_v15 = vadd.f32 %v795_v14, %v671_v49  ;;  %v797_v16 = vpop.f32.mrb[9].mxu0 }
 0x58d   :  { %v798_v17 = vadd.f32 %v797_v16, %v675_v50 }
 0x58e   :  { %832 = vst [vmem:[#allocation3 + $0x40] sm:$0xff] %v796_v15 }
 0x58f   :  { %833 = vst [vmem:[#allocation3 + $0x48] sm:$0xff] %v798_v17 }
 0x590 LB: > { %v3029_v19 = vpack.c.bf16 %v4155_v35, %v4151_v33  ;;  %v3031_v28 = vpack.c.bf16 %v4153_v34, %v4149_v31  ;;  %v3033_v29 = vpack.c.bf16 %v4163_v39, %v4159_v37  ;;  %v3035_v48 = vpack.c.bf16 %v4161_v38, %v4157_v36  ;;  %s2757_s23 = sshll.u32 %s3757_s22, 3  ;;  %s3809_s19 = smov 64   ;;  %s3757_s22 = sphi %s4190_s22, %s864_s22   ;;  %v3753_v26 = vphi %v4188_v26, %v980_v26   ;;  %v3749_v18 = vphi %v4186_v18, %v974_v18  }
 0x591   : > { %v3808_v49 = vmov 0.0   ;;  %v3037_v50 = vpack.c.bf16 %v4171_v43, %v4167_v41  ;;  %v3039_v51 = vpack.c.bf16 %v4169_v42, %v4165_v40  ;;  %v3041_v52 = vpack.c.bf16 %v4179_v47, %v4175_v45  ;;  %s868_s25 = sshra.s32 %s2757_s23, 3  ;;  %s981_s27 = scalar_lea.vmem [#allocation2], %s2757_s23 }
 0x592   : > { %3030 = vmatprep.subr.bf16.mxu0 %v3029_v19  ;;  %942 = vmatprep.mubr.f32.mxu0 %v3808_v49  ;;  %v3043_v53 = vpack.c.bf16 %v4177_v46, %v4173_v44  ;;  %s2815_s26 = sshll.u32 %s868_s25, 4  ;;  %s864_s22 = sadd.s32 1, %s3757_s22  }
 0x593   : > { %3032 = vmatpush1.bf16.msra.mxu0 %v3031_v28  ;;  %s872_s0 = scalar_lea.vmem [#allocation3], %s2815_s26  ;;  %p861_p5 = scmp.ge.s32.totalorder %s864_s22, 9  }
 0x594   : > { %3034 = vmatprep.subr.bf16.mxu0 %v3033_v29  ;;  %v994_v6 = vld [vmem:[#allocation8 + $0x108] sm:$0xff] (%p861_p5)  ;;  %v996_v7 = vld [vmem:[#allocation8 + $0x118] sm:$0xff] (%p861_p5)  ;;  %v993_v8 = vld [vmem:[#allocation8 + $0x100] sm:$0xff] (%p861_p5)  ;;  %1143 = vmatprep.mubr.f32.mxu1 (%p861_p5), %v3805_v2  ;;  %s4286_s24 = smov (%p861_p5), 0  }
 0x595   :  { %v3045_v9 = vpack.c.bf16 (%p861_p5), %v996_v7, %v994_v6  ;;  %v995_v10 = vld [vmem:[#allocation8 + $0x110] sm:$0xff] (%p861_p5)  ;;  %v998_v11 = vld [vmem:[#allocation8 + $0x128] sm:$0xff] (%p861_p5)  ;;  %v1000_v12 = vld [vmem:[#allocation8 + $0x138] sm:$0xff] (%p861_p5) }
 0x596   : > { %v874_v54 = vld [vmem:[%s872_s0 + $0x8] sm:$0xff]  ;;  %v873_v59 = vld [vmem:[%s872_s0] sm:$0xff]  ;;  %v3047_v13 = vpack.c.bf16 (%p861_p5), %v995_v10, %v993_v8  ;;  %v3049_v14 = vpack.c.bf16 (%p861_p5), %v1000_v12, %v998_v11  ;;  %v1002_v17 = vld [vmem:[#allocation8 + $0x148] sm:$0xff] (%p861_p5) }
 0x597   : > { %3036 = vmatpush1.bf16.msra.mxu0 %v3035_v48  ;;  %v997_v15 = vld [vmem:[#allocation8 + $0x120] sm:$0xff] (%p861_p5)  ;;  %v999_v16 = vld [vmem:[#allocation8 + $0x130] sm:$0xff] (%p861_p5)  ;;  %3349 = vmatprep.subr.bf16.mxu1 (%p861_p5), %v3045_v9  ;;  %v1006_v36 = vld [vmem:[#allocation8 + $0x168] sm:$0xff] (%p861_p5) }
 0x598   : > { %3038 = vmatprep.subr.bf16.mxu0 %v3037_v50  ;;  %3353 = vmatpush1.bf16.msra.mxu1 (%p861_p5), %v3047_v13  ;;  %v3051_v31 = vpack.c.bf16 (%p861_p5), %v999_v16, %v997_v15  ;;  %v1001_v34 = vld [vmem:[#allocation8 + $0x140] sm:$0xff] (%p861_p5)  ;;  %v1003_v35 = vld [vmem:[#allocation8 + $0x150] sm:$0xff] (%p861_p5)  ;;  %v1008_v37 = vld [vmem:[#allocation8 + $0x178] sm:$0xff] (%p861_p5) }
 0x599   :  { %3350 = vmatprep.subr.bf16.mxu1 (%p861_p5), %v3049_v14  ;;  %v3055_v38 = vpack.c.bf16 (%p861_p5), %v1003_v35, %v1001_v34  ;;  %v3057_v39 = vpack.c.bf16 (%p861_p5), %v1008_v37, %v1006_v36  ;;  %v1005_v40 = vld [vmem:[#allocation8 + $0x160] sm:$0xff] (%p861_p5)  ;;  %v1007_v41 = vld [vmem:[#allocation8 + $0x170] sm:$0xff] (%p861_p5)  ;;  %v4247_v49 = vld [vmem:[#allocation10 + $0x108] sm:$0xff] (%p861_p5) }
 0x59a   :  { %v3059_v42 = vpack.c.bf16 (%p861_p5), %v1007_v41, %v1005_v40  ;;  %v4245_v48 = vld [vmem:[#allocation10 + $0x100] sm:$0xff] (%p861_p5)  ;;  %v4249_v50 = vld [vmem:[#allocation10 + $0x110] sm:$0xff] (%p861_p5) }
 0x59b   : > { %3040 = vmatpush1.bf16.msra.mxu0 %v3039_v51  ;;  %v4251_v51 = vld [vmem:[#allocation10 + $0x118] sm:$0xff] (%p861_p5) }
 0x59c   : > { %3042 = vmatprep.subr.bf16.mxu0 %v3041_v52  ;;  %3354 = vmatpush1.bf16.msra.mxu1 (%p861_p5), %v3051_v31  ;;  %v4253_v52 = vld [vmem:[#allocation10 + $0x120] sm:$0xff] (%p861_p5) }
 0x59f   : > { %3044 = vmatpush1.bf16.msra.mxu0 %v3043_v53  ;;  %v4255_v53 = vld [vmem:[#allocation10 + $0x128] sm:$0xff] (%p861_p5) }
 0x5a0   :  { %3046 = vmatprep.subr.bf16.mxu0 (%p861_p5), %v3045_v9 }
 0x5a2   : > { %2760 = vmatmul.mubr.msk.f32.vlgmr.msra.gmra.mrb[0].mxu0 %vm288_vm3, %v3753_v26 }
 0x5a3   :  { %1113 = vmatprep.mubr.f32.mxu0 (%p861_p5), %v3805_v2  ;;  %3048 = vmatpush1.bf16.msra.mxu0 (%p861_p5), %v3047_v13 }
 0x5a4   :  { %3050 = vmatprep.subr.bf16.mxu0 (%p861_p5), %v3049_v14 }
 0x5a7   :  { %3052 = vmatpush1.bf16.msra.mxu0 (%p861_p5), %v3051_v31 }
 0x675   : > { %v944_v55 = vpop.f32.mrb[0].mxu0 }
 0x676   : > { %v946_v56 = vpop.f32.mrb[1].mxu0  ;;  %v949_v60 = vadd.f32 %v944_v55, %v873_v59  ;;  %v4259_v55 = vld [vmem:[#allocation10 + $0x138] sm:$0xff] (%p861_p5) }
 0x677   : > { %v950_v57 = vadd.f32 %v946_v56, %v874_v54  ;;  %v4257_v54 = vld [vmem:[#allocation10 + $0x130] sm:$0xff] (%p861_p5)  ;;  %v4261_v56 = vld [vmem:[#allocation10 + $0x140] sm:$0xff] (%p861_p5)  ;;  %v4267_v59 = vld [vmem:[#allocation10 + $0x158] sm:$0xff] (%p861_p5) }
 0x678   : > { %v2761_v61 = vmul.f32 -1.442695, %v949_v60  ;;  %v4269_v60 = vld [vmem:[#allocation10 + $0x160] sm:$0xff] (%p861_p5) }
 0x679   : > { %3533 = vtanh.f32 %v950_v57  ;;  %v2762_v25 = vmul.f32 -1.442695, %v950_v57  ;;  %v4263_v57 = vld [vmem:[#allocation10 + $0x148] sm:$0xff] (%p861_p5) }
 0x67a   : > { %3535 = vpow2.f32 %v2761_v61  ;;  %v4271_v61 = vld [vmem:[#allocation10 + $0x168] sm:$0xff] (%p861_p5) }
 0x683   : > { %v3534_v58 = vpop.eup %3533 }
 0x684   : > { %966 = vrot.lane.b32.xlu0 %v3534_v58, %s3809_s19  ;;  %v3536_v62 = vpop.eup %3535  ;;  %v4265_v58 = vld [vmem:[#allocation10 + $0x150] sm:$0xff] (%p861_p5) }
 0x685   : > { %v957_v63 = vadd.f32 1.0, %v3536_v62  ;;  %v4273_v62 = vld [vmem:[#allocation10 + $0x170] sm:$0xff] (%p861_p5) }
 0x687   : > { %3537 = vrcp.f32 %v957_v63  ;;  %v4275_v63 = vld [vmem:[#allocation10 + $0x178] sm:$0xff] (%p861_p5) }
 0x691   : > { %v3538_v0 = vpop.eup %3537 }
 0x692   : > { %v964_v22 = vmul.f32 %v3749_v18, %v3538_v0 }
 0x6f6   : > { %v967_v20 = vpop.permute.xlu0 %966 }
 0x6f7   : > { %v969_v21 = vmul.f32 %v3538_v0, %v967_v20  ;;  %v2763_v0 = vld [vmem:[%s4692_s5 + $0x4] sm:$0x3] (%p861_p5) }
 0x6f8   :  { %v1015_v20 = vrot.slane (%p861_p5), %v2763_v0, %v4081_v30 }
 0x6f9   : > { %971 = vrot.lane.b32.xlu0 %v969_v21, %s3809_s19  ;;  %v1019_v21 = vrot.slane (%p861_p5), %v2763_v0, %v4086_v32 }
 0x76b   : > { %v972_v23 = vpop.permute.xlu0 %971 }
 0x76c   : > { %v974_v18 = vadd.f32 %v972_v23, %v964_v22  }
 0x76e   : > { %3539 = vtanh.f32 %v974_v18 }
 0x76f   : > { %3541 = vpow2.f32 %v2762_v25 }
 0x778   : > { %v3540_v24 = vpop.eup %3539 }
 0x779   : > { %977 = vrot.lane.b32.xlu1 %v3540_v24, %s3809_s19  ;;  %v3542_v27 = vpop.eup %3541 }
 0x77a   : > { %v958_v3 = vadd.f32 1.0, %v3542_v27 }
 0x77c   : > { %3543 = vrcp.f32 %v958_v3 }
 0x786   : > { %v3544_v4 = vpop.eup %3543 }
 0x7e8   :  { %863 = sbr.rel (!%p861_p5) target bundleno = 1424 (0x590), region = 152 }
 0x7eb   : > { %v978_v5 = vpop.permute.xlu1 %977 }
 0x7ec   : > { %v980_v26 = vmul.f32 %v3544_v4, %v978_v5  }
 0x7ee   : > { %982 = vst.msk [vmem:[%s981_s27] sm:$0xff] %vm288_vm3, %v980_v26  ;;  %v1004_v26 = vld [vmem:[#allocation8 + $0x158] sm:$0xff] (%p861_p5) }
 0x7ef   :  { %v3053_v33 = vpack.c.bf16 %v1004_v26, %v1002_v17 }
 0x7f1   :  { %3054 = vmatprep.subr.bf16.mxu0 %v3053_v33  ;;  %3351 = vmatprep.subr.bf16.mxu1 %v3053_v33 }
 0x7f2   :  { %3056 = vmatpush1.bf16.msra.mxu0 %v3055_v38  ;;  %3355 = vmatpush1.bf16.msra.mxu1 %v3055_v38 }
 0x7f3   :  { %3058 = vmatprep.subr.bf16.mxu0 %v3057_v39  ;;  %3352 = vmatprep.subr.bf16.mxu1 %v3057_v39 }
 0x7f5   :  { %v983_v43 = vld [vmem:[#allocation2] sm:$0xff]  ;;  %v988_v44 = vld [vmem:[#allocation2 + $0x28] sm:$0xff]  ;;  %v989_v46 = vld [vmem:[#allocation2 + $0x30] sm:$0xff] }
 0x7f6   :  { %3060 = vmatpush1.bf16.msra.mxu0 %v3059_v42  ;;  %3356 = vmatpush1.bf16.msra.mxu1 %v3059_v42  ;;  %v984_v45 = vld [vmem:[#allocation2 + $0x8] sm:$0xff]  ;;  %v985_v47 = vld [vmem:[#allocation2 + $0x10] sm:$0xff]  ;;  %v990_v18 = vld [vmem:[#allocation2 + $0x38] sm:$0xff] }
 0x7f7   :  { %v986_v19 = vld [vmem:[#allocation2 + $0x18] sm:$0xff]  ;;  %v991_v28 = vld [vmem:[#allocation2 + $0x40] sm:$0xff] }
 0x7f8   :  { %v987_v29 = vld [vmem:[#allocation2 + $0x20] sm:$0xff] }
 0x7f9   :  { %2764 = vmatmul.mubr.msk.f32.vlgmr.msra.gmra.mrb[0].mxu0 %vm288_vm3, %v983_v43  ;;  %2769 = vmatmul.mubr.msk.f32.vlgmr.msra.gmra.mrb[0].mxu1 %vm288_vm3, %v988_v44 }
 0x7fa   :  { %1119 = vmatprep.mubr.f32.mxu0 %v3805_v2  ;;  %1149 = vmatprep.mubr.f32.mxu1 %v3805_v2 }
 0x7fd   :  { %2765 = vmatmul.mubr.msk.f32.gmra.mrb[2].mxu0 %vm288_vm3, %v984_v45  ;;  %2770 = vmatmul.mubr.msk.f32.gmra.mrb[2].mxu1 %vm288_vm3, %v989_v46 }
 0x7fe   :  { %1125 = vmatprep.mubr.f32.mxu0 %v3805_v2  ;;  %1155 = vmatprep.mubr.f32.mxu1 %v3805_v2 }
 0x801   :  { %2766 = vmatmul.mubr.msk.f32.gmra.mrb[4].mxu0 %vm288_vm3, %v985_v47  ;;  %2771 = vmatmul.mubr.msk.f32.gmra.mrb[4].mxu1 %vm288_vm3, %v990_v18  ;;  %v4282_v47 = vmov 0.0   ;;  %v4284_v18 = vmov 0.0  }
 0x802   :  { %1131 = vmatprep.mubr.f32.mxu0 %v3805_v2  ;;  %1161 = vmatprep.mubr.f32.mxu1 %v3805_v2 }
 0x805   :  { %2767 = vmatmul.mubr.msk.f32.gmra.mrb[6].mxu0 %vm288_vm3, %v986_v19  ;;  %2772 = vmatmul.mubr.msk.f32.gmra.mrb[6].mxu1 %vm288_vm3, %v991_v28 }
 0x806   :  { %1137 = vmatprep.mubr.f32.mxu0 %v3805_v2 }
 0x809   :  { %2768 = vmatmul.mubr.msk.f32.gmra.mrb[8].mxu0 %vm288_vm3, %v987_v29 }
 0x8cc   :  { %v1115_v22 = vpop.f32.mrb[0].mxu0  ;;  %v1145_v23 = vpop.f32.mrb[0].mxu1 }
 0x8cd   :  { %v1116_v24 = vadd.f32 %v1115_v22, %v1015_v20  ;;  %v1117_v25 = vpop.f32.mrb[1].mxu0  ;;  %v1146_v27 = vadd.f32 %v1145_v23, %v1015_v20  ;;  %v1147_v3 = vpop.f32.mrb[1].mxu1 }
 0x8ce   :  { %v1118_v4 = vadd.f32 %v1117_v25, %v1019_v21  ;;  %v1148_v5 = vadd.f32 %v1147_v3, %v1019_v21 }
 0x8cf   :  { %1168 = vst [vmem:[#allocation3] sm:$0xff] %v1116_v24  ;;  %1178 = vst [vmem:[#allocation3 + $0x50] sm:$0xff] %v1146_v27 }
 0x8d0   :  { %1169 = vst [vmem:[#allocation3 + $0x8] sm:$0xff] %v1118_v4  ;;  %v1121_v6 = vpop.f32.mrb[2].mxu0  ;;  %1179 = vst [vmem:[#allocation3 + $0x58] sm:$0xff] %v1148_v5  ;;  %v1151_v7 = vpop.f32.mrb[2].mxu1 }
 0x8d1   :  { %v1122_v8 = vadd.f32 %v1121_v6, %v1015_v20  ;;  %v1123_v9 = vpop.f32.mrb[3].mxu0  ;;  %v1152_v10 = vadd.f32 %v1151_v7, %v1015_v20  ;;  %v1153_v11 = vpop.f32.mrb[3].mxu1 }
 0x8d2   :  { %v1124_v12 = vadd.f32 %v1123_v9, %v1019_v21  ;;  %v1154_v13 = vadd.f32 %v1153_v11, %v1019_v21 }
 0x8d3   :  { %1170 = vst [vmem:[#allocation3 + $0x10] sm:$0xff] %v1122_v8  ;;  %1180 = vst [vmem:[#allocation3 + $0x60] sm:$0xff] %v1152_v10 }
 0x8d4   :  { %1171 = vst [vmem:[#allocation3 + $0x18] sm:$0xff] %v1124_v12  ;;  %v1127_v14 = vpop.f32.mrb[4].mxu0  ;;  %1181 = vst [vmem:[#allocation3 + $0x68] sm:$0xff] %v1154_v13  ;;  %v1157_v15 = vpop.f32.mrb[4].mxu1 }
 0x8d5   :  { %v1128_v16 = vadd.f32 %v1127_v14, %v1015_v20  ;;  %v1129_v17 = vpop.f32.mrb[5].mxu0  ;;  %v1158_v26 = vadd.f32 %v1157_v15, %v1015_v20  ;;  %v1159_v31 = vpop.f32.mrb[5].mxu1 }
 0x8d6   :  { %v1130_v33 = vadd.f32 %v1129_v17, %v1019_v21  ;;  %v1160_v34 = vadd.f32 %v1159_v31, %v1019_v21 }
 0x8d7   :  { %1172 = vst [vmem:[#allocation3 + $0x20] sm:$0xff] %v1128_v16  ;;  %1182 = vst [vmem:[#allocation3 + $0x70] sm:$0xff] %v1158_v26 }
 0x8d8   :  { %1173 = vst [vmem:[#allocation3 + $0x28] sm:$0xff] %v1130_v33  ;;  %v1133_v35 = vpop.f32.mrb[6].mxu0  ;;  %1183 = vst [vmem:[#allocation3 + $0x78] sm:$0xff] %v1160_v34  ;;  %v1163_v36 = vpop.f32.mrb[6].mxu1 }
 0x8d9   :  { %v1134_v37 = vadd.f32 %v1133_v35, %v1015_v20  ;;  %v1135_v38 = vpop.f32.mrb[7].mxu0  ;;  %v1164_v39 = vadd.f32 %v1163_v36, %v1015_v20  ;;  %v1165_v40 = vpop.f32.mrb[7].mxu1 }
 0x8da   :  { %v1136_v41 = vadd.f32 %v1135_v38, %v1019_v21  ;;  %v1166_v42 = vadd.f32 %v1165_v40, %v1019_v21 }
 0x8db   :  { %1174 = vst [vmem:[#allocation3 + $0x30] sm:$0xff] %v1134_v37  ;;  %1184 = vst [vmem:[#allocation3 + $0x80] sm:$0xff] %v1164_v39 }
 0x8dc   :  { %1175 = vst [vmem:[#allocation3 + $0x38] sm:$0xff] %v1136_v41  ;;  %v1139_v43 = vpop.f32.mrb[8].mxu0  ;;  %1185 = vst [vmem:[#allocation3 + $0x88] sm:$0xff] %v1166_v42 }
 0x8dd   :  { %v1140_v44 = vadd.f32 %v1139_v43, %v1015_v20  ;;  %v1141_v45 = vpop.f32.mrb[9].mxu0 }
 0x8de   :  { %v1142_v46 = vadd.f32 %v1141_v45, %v1019_v21 }
 0x8df   :  { %1176 = vst [vmem:[#allocation3 + $0x40] sm:$0xff] %v1140_v44 }
 0x8e0   :  { %1177 = vst [vmem:[#allocation3 + $0x48] sm:$0xff] %v1142_v46 }
 0x8e1 LB: > { %v3061_v19 = vpack.c.bf16 %v4251_v51, %v4247_v49  ;;  %v3063_v28 = vpack.c.bf16 %v4249_v50, %v4245_v48  ;;  %v3065_v29 = vpack.c.bf16 %v4259_v55, %v4255_v53  ;;  %v3067_v0 = vpack.c.bf16 %v4257_v54, %v4253_v52  ;;  %s2773_s29 = sshll.u32 %s3769_s24, 3  ;;  %s3811_s2 = smov 64   ;;  %s3769_s24 = sphi %s4286_s24, %s1208_s24   ;;  %v3765_v18 = vphi %v4284_v18, %v1324_v18   ;;  %v3761_v47 = vphi %v4282_v47, %v1318_v47  }
 0x8e2   : > { %v3810_v20 = vmov 0.0   ;;  %v3069_v21 = vpack.c.bf16 %v4267_v59, %v4263_v57  ;;  %v3071_v22 = vpack.c.bf16 %v4265_v58, %v4261_v56  ;;  %v3073_v23 = vpack.c.bf16 %v4275_v63, %v4271_v61  ;;  %s1212_s30 = sshra.s32 %s2773_s29, 3  ;;  %s1325_s16 = scalar_lea.vmem [#allocation2], %s2773_s29 }
 0x8e3   : > { %3062 = vmatprep.subr.bf16.mxu0 %v3061_v19  ;;  %1286 = vmatprep.mubr.f32.mxu0 %v3810_v20  ;;  %v3075_v24 = vpack.c.bf16 %v4273_v62, %v4269_v60  ;;  %s2816_s1 = sshll.u32 %s1212_s30, 4  ;;  %s1208_s24 = sadd.s32 1, %s3769_s24  }
 0x8e4   : > { %3064 = vmatpush1.bf16.msra.mxu0 %v3063_v28  ;;  %s1216_s13 = scalar_lea.vmem [#allocation3], %s2816_s1  ;;  %p1205_p6 = scmp.ge.s32.totalorder %s1208_s24, 9  }
 0x8e5   : > { %3066 = vmatprep.subr.bf16.mxu0 %v3065_v29  ;;  %v1338_v35 = vld [vmem:[#allocation8 + $0x188] sm:$0xff] (%p1205_p6)  ;;  %v1340_v36 = vld [vmem:[#allocation8 + $0x198] sm:$0xff] (%p1205_p6)  ;;  %v1337_v37 = vld [vmem:[#allocation8 + $0x180] sm:$0xff] (%p1205_p6)  ;;  %1487 = vmatprep.mubr.f32.mxu1 (%p1205_p6), %v3805_v2  ;;  %s4382_s11 = smov (%p1205_p6), 0  }
 0x8e6   :  { %v3077_v38 = vpack.c.bf16 (%p1205_p6), %v1340_v36, %v1338_v35  ;;  %v1339_v39 = vld [vmem:[#allocation8 + $0x190] sm:$0xff] (%p1205_p6)  ;;  %v1342_v40 = vld [vmem:[#allocation8 + $0x1a8] sm:$0xff] (%p1205_p6)  ;;  %v1344_v41 = vld [vmem:[#allocation8 + $0x1b8] sm:$0xff] (%p1205_p6) }
 0x8e7   : > { %v1218_v25 = vld [vmem:[%s1216_s13 + $0x8] sm:$0xff]  ;;  %v1217_v6 = vld [vmem:[%s1216_s13] sm:$0xff]  ;;  %v3079_v42 = vpack.c.bf16 (%p1205_p6), %v1339_v39, %v1337_v37  ;;  %v3081_v43 = vpack.c.bf16 (%p1205_p6), %v1344_v41, %v1342_v40  ;;  %v1346_v46 = vld [vmem:[#allocation8 + $0x1c8] sm:$0xff] (%p1205_p6) }
 0x8e8   : > { %3068 = vmatpush1.bf16.msra.mxu0 %v3067_v0  ;;  %v1341_v44 = vld [vmem:[#allocation8 + $0x1a0] sm:$0xff] (%p1205_p6)  ;;  %v1343_v45 = vld [vmem:[#allocation8 + $0x1b0] sm:$0xff] (%p1205_p6)  ;;  %3357 = vmatprep.subr.bf16.mxu1 (%p1205_p6), %v3077_v38  ;;  %v1350_v52 = vld [vmem:[#allocation8 + $0x1e8] sm:$0xff] (%p1205_p6) }
 0x8e9   : > { %3070 = vmatprep.subr.bf16.mxu0 %v3069_v21  ;;  %3361 = vmatpush1.bf16.msra.mxu1 (%p1205_p6), %v3079_v42  ;;  %v3083_v48 = vpack.c.bf16 (%p1205_p6), %v1343_v45, %v1341_v44  ;;  %v1345_v50 = vld [vmem:[#allocation8 + $0x1c0] sm:$0xff] (%p1205_p6)  ;;  %v1347_v51 = vld [vmem:[#allocation8 + $0x1d0] sm:$0xff] (%p1205_p6)  ;;  %v1352_v53 = vld [vmem:[#allocation8 + $0x1f8] sm:$0xff] (%p1205_p6) }
 0x8ea   :  { %3358 = vmatprep.subr.bf16.mxu1 (%p1205_p6), %v3081_v43  ;;  %v3087_v54 = vpack.c.bf16 (%p1205_p6), %v1347_v51, %v1345_v50  ;;  %v3089_v55 = vpack.c.bf16 (%p1205_p6), %v1352_v53, %v1350_v52  ;;  %v1349_v56 = vld [vmem:[#allocation8 + $0x1e0] sm:$0xff] (%p1205_p6)  ;;  %v1351_v57 = vld [vmem:[#allocation8 + $0x1f0] sm:$0xff] (%p1205_p6)  ;;  %v4343_v20 = vld [vmem:[#allocation10 + $0x188] sm:$0xff] (%p1205_p6) }
 0x8eb   :  { %v3091_v58 = vpack.c.bf16 (%p1205_p6), %v1351_v57, %v1349_v56  ;;  %v4341_v0 = vld [vmem:[#allocation10 + $0x180] sm:$0xff] (%p1205_p6)  ;;  %v4345_v21 = vld [vmem:[#allocation10 + $0x190] sm:$0xff] (%p1205_p6) }
 0x8ec   : > { %3072 = vmatpush1.bf16.msra.mxu0 %v3071_v22  ;;  %v4347_v22 = vld [vmem:[#allocation10 + $0x198] sm:$0xff] (%p1205_p6) }
 0x8ed   : > { %3074 = vmatprep.subr.bf16.mxu0 %v3073_v23  ;;  %3362 = vmatpush1.bf16.msra.mxu1 (%p1205_p6), %v3083_v48  ;;  %v4349_v23 = vld [vmem:[#allocation10 + $0x1a0] sm:$0xff] (%p1205_p6) }
 0x8f0   : > { %3076 = vmatpush1.bf16.msra.mxu0 %v3075_v24  ;;  %v4351_v24 = vld [vmem:[#allocation10 + $0x1a8] sm:$0xff] (%p1205_p6) }
 0x8f1   :  { %3078 = vmatprep.subr.bf16.mxu0 (%p1205_p6), %v3077_v38 }
 0x8f3   : > { %2776 = vmatmul.mubr.msk.f32.vlgmr.msra.gmra.mrb[0].mxu0 %vm288_vm3, %v3765_v18 }
 0x8f4   :  { %1457 = vmatprep.mubr.f32.mxu0 (%p1205_p6), %v3805_v2  ;;  %3080 = vmatpush1.bf16.msra.mxu0 (%p1205_p6), %v3079_v42 }
 0x8f5   :  { %3082 = vmatprep.subr.bf16.mxu0 (%p1205_p6), %v3081_v43 }
 0x8f8   :  { %3084 = vmatpush1.bf16.msra.mxu0 (%p1205_p6), %v3083_v48 }
 0x9c6   : > { %v1288_v27 = vpop.f32.mrb[0].mxu0 }
 0x9c7   : > { %v1290_v3 = vpop.f32.mrb[1].mxu0  ;;  %v1293_v7 = vadd.f32 %v1288_v27, %v1217_v6  ;;  %v4355_v27 = vld [vmem:[#allocation10 + $0x1b8] sm:$0xff] (%p1205_p6) }
 0x9c8   : > { %v1294_v4 = vadd.f32 %v1290_v3, %v1218_v25  ;;  %v4353_v25 = vld [vmem:[#allocation10 + $0x1b0] sm:$0xff] (%p1205_p6)  ;;  %v4357_v3 = vld [vmem:[#allocation10 + $0x1c0] sm:$0xff] (%p1205_p6)  ;;  %v4363_v6 = vld [vmem:[#allocation10 + $0x1d8] sm:$0xff] (%p1205_p6) }
 0x9c9   : > { %v2777_v8 = vmul.f32 -1.442695, %v1293_v7  ;;  %v4365_v7 = vld [vmem:[#allocation10 + $0x1e0] sm:$0xff] (%p1205_p6) }
 0x9ca   : > { %3545 = vtanh.f32 %v1294_v4  ;;  %v2778_v17 = vmul.f32 -1.442695, %v1294_v4  ;;  %v4359_v4 = vld [vmem:[#allocation10 + $0x1c8] sm:$0xff] (%p1205_p6) }
 0x9cb   : > { %3547 = vpow2.f32 %v2777_v8  ;;  %v4367_v8 = vld [vmem:[#allocation10 + $0x1e8] sm:$0xff] (%p1205_p6) }
 0x9d4   : > { %v3546_v5 = vpop.eup %3545 }
 0x9d5   : > { %1310 = vrot.lane.b32.xlu0 %v3546_v5, %s3811_s2  ;;  %v3548_v9 = vpop.eup %3547  ;;  %v4361_v5 = vld [vmem:[#allocation10 + $0x1d0] sm:$0xff] (%p1205_p6) }
 0x9d6   : > { %v1301_v10 = vadd.f32 1.0, %v3548_v9  ;;  %v4369_v9 = vld [vmem:[#allocation10 + $0x1f0] sm:$0xff] (%p1205_p6) }
 0x9d8   : > { %3549 = vrcp.f32 %v1301_v10  ;;  %v4371_v10 = vld [vmem:[#allocation10 + $0x1f8] sm:$0xff] (%p1205_p6) }
 0x9e2   : > { %v3550_v11 = vpop.eup %3549 }
 0x9e3   : > { %v1308_v14 = vmul.f32 %v3761_v47, %v3550_v11 }
 0xa47   : > { %v1311_v12 = vpop.permute.xlu0 %1310 }
 0xa48   : > { %v1313_v13 = vmul.f32 %v3550_v11, %v1311_v12  ;;  %v2779_v11 = vld [vmem:[%s4692_s5 + $0x6] sm:$0x3] (%p1205_p6) }
 0xa49   :  { %v1359_v12 = vrot.slane (%p1205_p6), %v2779_v11, %v4081_v30 }
 0xa4a   : > { %1315 = vrot.lane.b32.xlu0 %v1313_v13, %s3811_s2  ;;  %v1363_v13 = vrot.slane (%p1205_p6), %v2779_v11, %v4086_v32 }
 0xabc   : > { %v1316_v15 = vpop.permute.xlu0 %1315 }
 0xabd   : > { %v1318_v47 = vadd.f32 %v1316_v15, %v1308_v14  }
 0xabf   : > { %3551 = vtanh.f32 %v1318_v47 }
 0xac0   : > { %3553 = vpow2.f32 %v2778_v17 }
 0xac9   : > { %v3552_v16 = vpop.eup %3551 }
 0xaca   : > { %1321 = vrot.lane.b32.xlu1 %v3552_v16, %s3811_s2  ;;  %v3554_v26 = vpop.eup %3553 }
 0xacb   : > { %v1302_v31 = vadd.f32 1.0, %v3554_v26 }
 0xacd   : > { %3555 = vrcp.f32 %v1302_v31 }
 0xad7   : > { %v3556_v33 = vpop.eup %3555 }
 0xb39   :  { %1207 = sbr.rel (!%p1205_p6) target bundleno = 2273 (0x8e1), region = 163 }
 0xb3c   : > { %v1322_v34 = vpop.permute.xlu1 %1321 }
 0xb3d   : > { %v1324_v18 = vmul.f32 %v3556_v33, %v1322_v34  }
 0xb3f   : > { %1326 = vst.msk [vmem:[%s1325_s16] sm:$0xff] %vm288_vm3, %v1324_v18  ;;  %v1348_v18 = vld [vmem:[#allocation8 + $0x1d8] sm:$0xff] (%p1205_p6) }
 0xb40   :  { %v3085_v49 = vpack.c.bf16 %v1348_v18, %v1346_v46 }
 0xb42   :  { %3086 = vmatprep.subr.bf16.mxu0 %v3085_v49  ;;  %3359 = vmatprep.subr.bf16.mxu1 %v3085_v49 }
 0xb43   :  { %3088 = vmatpush1.bf16.msra.mxu0 %v3087_v54  ;;  %3363 = vmatpush1.bf16.msra.mxu1 %v3087_v54 }
 0xb44   :  { %3090 = vmatprep.subr.bf16.mxu0 %v3089_v55  ;;  %3360 = vmatprep.subr.bf16.mxu1 %v3089_v55 }
 0xb46   :  { %v1327_v59 = vld [vmem:[#allocation2] sm:$0xff]  ;;  %v1332_v60 = vld [vmem:[#allocation2 + $0x28] sm:$0xff]  ;;  %v1333_v62 = vld [vmem:[#allocation2 + $0x30] sm:$0xff] }
 0xb47   :  { %3092 = vmatpush1.bf16.msra.mxu0 %v3091_v58  ;;  %3364 = vmatpush1.bf16.msra.mxu1 %v3091_v58  ;;  %v1328_v61 = vld [vmem:[#allocation2 + $0x8] sm:$0xff]  ;;  %v1329_v63 = vld [vmem:[#allocation2 + $0x10] sm:$0xff]  ;;  %v1334_v47 = vld [vmem:[#allocation2 + $0x38] sm:$0xff] }
 0xb48   :  { %v1330_v19 = vld [vmem:[#allocation2 + $0x18] sm:$0xff]  ;;  %v1335_v28 = vld [vmem:[#allocation2 + $0x40] sm:$0xff] }
 0xb49   :  { %v1331_v29 = vld [vmem:[#allocation2 + $0x20] sm:$0xff] }
 0xb4a   :  { %2780 = vmatmul.mubr.msk.f32.vlgmr.msra.gmra.mrb[0].mxu0 %vm288_vm3, %v1327_v59  ;;  %2785 = vmatmul.mubr.msk.f32.vlgmr.msra.gmra.mrb[0].mxu1 %vm288_vm3, %v1332_v60 }
 0xb4b   :  { %1463 = vmatprep.mubr.f32.mxu0 %v3805_v2  ;;  %1493 = vmatprep.mubr.f32.mxu1 %v3805_v2 }
 0xb4e   :  { %2781 = vmatmul.mubr.msk.f32.gmra.mrb[2].mxu0 %vm288_vm3, %v1328_v61  ;;  %2786 = vmatmul.mubr.msk.f32.gmra.mrb[2].mxu1 %vm288_vm3, %v1333_v62 }
 0xb4f   :  { %1469 = vmatprep.mubr.f32.mxu0 %v3805_v2  ;;  %1499 = vmatprep.mubr.f32.mxu1 %v3805_v2 }
 0xb52   :  { %2782 = vmatmul.mubr.msk.f32.gmra.mrb[4].mxu0 %vm288_vm3, %v1329_v63  ;;  %2787 = vmatmul.mubr.msk.f32.gmra.mrb[4].mxu1 %vm288_vm3, %v1334_v47  ;;  %v4378_v63 = vmov 0.0   ;;  %v4380_v47 = vmov 0.0  }
 0xb53   :  { %1475 = vmatprep.mubr.f32.mxu0 %v3805_v2  ;;  %1505 = vmatprep.mubr.f32.mxu1 %v3805_v2 }
 0xb56   :  { %2783 = vmatmul.mubr.msk.f32.gmra.mrb[6].mxu0 %vm288_vm3, %v1330_v19  ;;  %2788 = vmatmul.mubr.msk.f32.gmra.mrb[6].mxu1 %vm288_vm3, %v1335_v28 }
 0xb57   :  { %1481 = vmatprep.mubr.f32.mxu0 %v3805_v2 }
 0xb5a   :  { %2784 = vmatmul.mubr.msk.f32.gmra.mrb[8].mxu0 %vm288_vm3, %v1331_v29 }
 0xc1d   :  { %v1459_v14 = vpop.f32.mrb[0].mxu0  ;;  %v1489_v15 = vpop.f32.mrb[0].mxu1 }
 0xc1e   :  { %v1460_v16 = vadd.f32 %v1459_v14, %v1359_v12  ;;  %v1461_v17 = vpop.f32.mrb[1].mxu0  ;;  %v1490_v26 = vadd.f32 %v1489_v15, %v1359_v12  ;;  %v1491_v31 = vpop.f32.mrb[1].mxu1 }
 0xc1f   :  { %v1462_v33 = vadd.f32 %v1461_v17, %v1363_v13  ;;  %v1492_v34 = vadd.f32 %v1491_v31, %v1363_v13 }
 0xc20   :  { %1512 = vst [vmem:[#allocation3] sm:$0xff] %v1460_v16  ;;  %1522 = vst [vmem:[#allocation3 + $0x50] sm:$0xff] %v1490_v26 }
 0xc21   :  { %1513 = vst [vmem:[#allocation3 + $0x8] sm:$0xff] %v1462_v33  ;;  %v1465_v35 = vpop.f32.mrb[2].mxu0  ;;  %1523 = vst [vmem:[#allocation3 + $0x58] sm:$0xff] %v1492_v34  ;;  %v1495_v36 = vpop.f32.mrb[2].mxu1 }
 0xc22   :  { %v1466_v37 = vadd.f32 %v1465_v35, %v1359_v12  ;;  %v1467_v38 = vpop.f32.mrb[3].mxu0  ;;  %v1496_v39 = vadd.f32 %v1495_v36, %v1359_v12  ;;  %v1497_v40 = vpop.f32.mrb[3].mxu1 }
 0xc23   :  { %v1468_v41 = vadd.f32 %v1467_v38, %v1363_v13  ;;  %v1498_v42 = vadd.f32 %v1497_v40, %v1363_v13 }
 0xc24   :  { %1514 = vst [vmem:[#allocation3 + $0x10] sm:$0xff] %v1466_v37  ;;  %1524 = vst [vmem:[#allocation3 + $0x60] sm:$0xff] %v1496_v39 }
 0xc25   :  { %1515 = vst [vmem:[#allocation3 + $0x18] sm:$0xff] %v1468_v41  ;;  %v1471_v43 = vpop.f32.mrb[4].mxu0  ;;  %1525 = vst [vmem:[#allocation3 + $0x68] sm:$0xff] %v1498_v42  ;;  %v1501_v44 = vpop.f32.mrb[4].mxu1 }
 0xc26   :  { %v1472_v45 = vadd.f32 %v1471_v43, %v1359_v12  ;;  %v1473_v46 = vpop.f32.mrb[5].mxu0  ;;  %v1502_v18 = vadd.f32 %v1501_v44, %v1359_v12  ;;  %v1503_v48 = vpop.f32.mrb[5].mxu1 }
 0xc27   :  { %v1474_v49 = vadd.f32 %v1473_v46, %v1363_v13  ;;  %v1504_v50 = vadd.f32 %v1503_v48, %v1363_v13 }
 0xc28   :  { %1516 = vst [vmem:[#allocation3 + $0x20] sm:$0xff] %v1472_v45  ;;  %1526 = vst [vmem:[#allocation3 + $0x70] sm:$0xff] %v1502_v18 }
 0xc29   :  { %1517 = vst [vmem:[#allocation3 + $0x28] sm:$0xff] %v1474_v49  ;;  %v1477_v51 = vpop.f32.mrb[6].mxu0  ;;  %1527 = vst [vmem:[#allocation3 + $0x78] sm:$0xff] %v1504_v50  ;;  %v1507_v52 = vpop.f32.mrb[6].mxu1 }
 0xc2a   :  { %v1478_v53 = vadd.f32 %v1477_v51, %v1359_v12  ;;  %v1479_v54 = vpop.f32.mrb[7].mxu0  ;;  %v1508_v55 = vadd.f32 %v1507_v52, %v1359_v12  ;;  %v1509_v56 = vpop.f32.mrb[7].mxu1 }
 0xc2b   :  { %v1480_v57 = vadd.f32 %v1479_v54, %v1363_v13  ;;  %v1510_v58 = vadd.f32 %v1509_v56, %v1363_v13 }
 0xc2c   :  { %1518 = vst [vmem:[#allocation3 + $0x30] sm:$0xff] %v1478_v53  ;;  %1528 = vst [vmem:[#allocation3 + $0x80] sm:$0xff] %v1508_v55 }
 0xc2d   :  { %1519 = vst [vmem:[#allocation3 + $0x38] sm:$0xff] %v1480_v57  ;;  %v1483_v59 = vpop.f32.mrb[8].mxu0  ;;  %1529 = vst [vmem:[#allocation3 + $0x88] sm:$0xff] %v1510_v58 }
 0xc2e   :  { %v1484_v60 = vadd.f32 %v1483_v59, %v1359_v12  ;;  %v1485_v61 = vpop.f32.mrb[9].mxu0 }
 0xc2f   :  { %v1486_v62 = vadd.f32 %v1485_v61, %v1363_v13 }
 0xc30   :  { %1520 = vst [vmem:[#allocation3 + $0x40] sm:$0xff] %v1484_v60 }
 0xc31   :  { %1521 = vst [vmem:[#allocation3 + $0x48] sm:$0xff] %v1486_v62 }
 0xc32 LB: > { %v3093_v19 = vpack.c.bf16 %v4347_v22, %v4343_v20  ;;  %v3095_v28 = vpack.c.bf16 %v4345_v21, %v4341_v0  ;;  %v3097_v29 = vpack.c.bf16 %v4355_v27, %v4351_v24  ;;  %v3099_v11 = vpack.c.bf16 %v4353_v25, %v4349_v23  ;;  %s2789_s6 = sshll.u32 %s3781_s11, 3  ;;  %s3813_s20 = smov 64   ;;  %s3781_s11 = sphi %s4382_s11, %s1552_s11   ;;  %v3777_v47 = vphi %v4380_v47, %v1668_v47   ;;  %v3773_v63 = vphi %v4378_v63, %v1662_v63  }
 0xc33   : > { %v3812_v12 = vmov 0.0   ;;  %v3101_v13 = vpack.c.bf16 %v4363_v6, %v4359_v4  ;;  %v3103_v14 = vpack.c.bf16 %v4361_v5, %v4357_v3  ;;  %v3105_v15 = vpack.c.bf16 %v4371_v10, %v4367_v8  ;;  %s1556_s14 = sshra.s32 %s2789_s6, 3  ;;  %s1669_s21 = scalar_lea.vmem [#allocation2], %s2789_s6 }
 0xc34   : > { %3094 = vmatprep.subr.bf16.mxu0 %v3093_v19  ;;  %1630 = vmatprep.mubr.f32.mxu0 %v3812_v12  ;;  %v3107_v16 = vpack.c.bf16 %v4369_v9, %v4365_v7  ;;  %s2817_s15 = sshll.u32 %s1556_s14, 4  ;;  %s1552_s11 = sadd.s32 1, %s3781_s11  }
 0xc35   : > { %3096 = vmatpush1.bf16.msra.mxu0 %v3095_v28  ;;  %s1560_s17 = scalar_lea.vmem [#allocation3], %s2817_s15  ;;  %p1549_p7 = scmp.ge.s32.totalorder %s1552_s11, 9  }
 0xc36   : > { %3098 = vmatprep.subr.bf16.mxu0 %v3097_v29  ;;  %v1682_v51 = vld [vmem:[#allocation8 + $0x208] sm:$0xff] (%p1549_p7)  ;;  %v1684_v52 = vld [vmem:[#allocation8 + $0x218] sm:$0xff] (%p1549_p7)  ;;  %v1681_v53 = vld [vmem:[#allocation8 + $0x200] sm:$0xff] (%p1549_p7)  ;;  %1831 = vmatprep.mubr.f32.mxu1 (%p1549_p7), %v3805_v2 }
 0xc37   :  { %v3109_v54 = vpack.c.bf16 (%p1549_p7), %v1684_v52, %v1682_v51  ;;  %v1683_v55 = vld [vmem:[#allocation8 + $0x210] sm:$0xff] (%p1549_p7)  ;;  %v1686_v56 = vld [vmem:[#allocation8 + $0x228] sm:$0xff] (%p1549_p7)  ;;  %v1688_v57 = vld [vmem:[#allocation8 + $0x238] sm:$0xff] (%p1549_p7) }
 0xc38   : > { %v1562_v17 = vld [vmem:[%s1560_s17 + $0x8] sm:$0xff]  ;;  %v1561_v35 = vld [vmem:[%s1560_s17] sm:$0xff]  ;;  %v3111_v58 = vpack.c.bf16 (%p1549_p7), %v1683_v55, %v1681_v53  ;;  %v3113_v59 = vpack.c.bf16 (%p1549_p7), %v1688_v57, %v1686_v56  ;;  %v1690_v62 = vld [vmem:[#allocation8 + $0x248] sm:$0xff] (%p1549_p7) }
 0xc39   : > { %3100 = vmatpush1.bf16.msra.mxu0 %v3099_v11  ;;  %v1685_v60 = vld [vmem:[#allocation8 + $0x220] sm:$0xff] (%p1549_p7)  ;;  %v1687_v61 = vld [vmem:[#allocation8 + $0x230] sm:$0xff] (%p1549_p7)  ;;  %3365 = vmatprep.subr.bf16.mxu1 (%p1549_p7), %v3109_v54  ;;  %v1694_v23 = vld [vmem:[#allocation8 + $0x268] sm:$0xff] (%p1549_p7) }
 0xc3a   : > { %3102 = vmatprep.subr.bf16.mxu0 %v3101_v13  ;;  %3369 = vmatpush1.bf16.msra.mxu1 (%p1549_p7), %v3111_v58  ;;  %v3115_v0 = vpack.c.bf16 (%p1549_p7), %v1687_v61, %v1685_v60  ;;  %v1689_v21 = vld [vmem:[#allocation8 + $0x240] sm:$0xff] (%p1549_p7)  ;;  %v1691_v22 = vld [vmem:[#allocation8 + $0x250] sm:$0xff] (%p1549_p7)  ;;  %v1696_v24 = vld [vmem:[#allocation8 + $0x278] sm:$0xff] (%p1549_p7) }
 0xc3b   :  { %3366 = vmatprep.subr.bf16.mxu1 (%p1549_p7), %v3113_v59  ;;  %v3119_v25 = vpack.c.bf16 (%p1549_p7), %v1691_v22, %v1689_v21  ;;  %v3121_v27 = vpack.c.bf16 (%p1549_p7), %v1696_v24, %v1694_v23  ;;  %v1693_v3 = vld [vmem:[#allocation8 + $0x260] sm:$0xff] (%p1549_p7)  ;;  %v1695_v4 = vld [vmem:[#allocation8 + $0x270] sm:$0xff] (%p1549_p7)  ;;  %v4439_v12 = vld [vmem:[#allocation10 + $0x208] sm:$0xff] (%p1549_p7) }
 0xc3c   :  { %v3123_v5 = vpack.c.bf16 (%p1549_p7), %v1695_v4, %v1693_v3  ;;  %v4437_v11 = vld [vmem:[#allocation10 + $0x200] sm:$0xff] (%p1549_p7)  ;;  %v4441_v13 = vld [vmem:[#allocation10 + $0x210] sm:$0xff] (%p1549_p7) }
 0xc3d   : > { %3104 = vmatpush1.bf16.msra.mxu0 %v3103_v14  ;;  %v4443_v14 = vld [vmem:[#allocation10 + $0x218] sm:$0xff] (%p1549_p7) }
 0xc3e   : > { %3106 = vmatprep.subr.bf16.mxu0 %v3105_v15  ;;  %3370 = vmatpush1.bf16.msra.mxu1 (%p1549_p7), %v3115_v0  ;;  %v4445_v15 = vld [vmem:[#allocation10 + $0x220] sm:$0xff] (%p1549_p7) }
 0xc41   : > { %3108 = vmatpush1.bf16.msra.mxu0 %v3107_v16  ;;  %v4447_v16 = vld [vmem:[#allocation10 + $0x228] sm:$0xff] (%p1549_p7) }
 0xc42   :  { %3110 = vmatprep.subr.bf16.mxu0 (%p1549_p7), %v3109_v54 }
 0xc44   : > { %2792 = vmatmul.mubr.msk.f32.vlgmr.msra.gmra.mrb[0].mxu0 %vm288_vm3, %v3777_v47 }
 0xc45   :  { %1801 = vmatprep.mubr.f32.mxu0 (%p1549_p7), %v3805_v2  ;;  %3112 = vmatpush1.bf16.msra.mxu0 (%p1549_p7), %v3111_v58 }
 0xc46   :  { %3114 = vmatprep.subr.bf16.mxu0 (%p1549_p7), %v3113_v59 }
 0xc49   :  { %3116 = vmatpush1.bf16.msra.mxu0 (%p1549_p7), %v3115_v0 }
 0xd17   : > { %v1632_v26 = vpop.f32.mrb[0].mxu0 }
 0xd18   : > { %v1634_v31 = vpop.f32.mrb[1].mxu0  ;;  %v1637_v36 = vadd.f32 %v1632_v26, %v1561_v35  ;;  %v4451_v26 = vld [vmem:[#allocation10 + $0x238] sm:$0xff] (%p1549_p7) }
 0xd19   : > { %v1638_v33 = vadd.f32 %v1634_v31, %v1562_v17  ;;  %v4449_v17 = vld [vmem:[#allocation10 + $0x230] sm:$0xff] (%p1549_p7)  ;;  %v4453_v31 = vld [vmem:[#allocation10 + $0x240] sm:$0xff] (%p1549_p7)  ;;  %v4459_v35 = vld [vmem:[#allocation10 + $0x258] sm:$0xff] (%p1549_p7) }
 0xd1a   : > { %v2793_v37 = vmul.f32 -1.442695, %v1637_v36  ;;  %v4461_v36 = vld [vmem:[#allocation10 + $0x260] sm:$0xff] (%p1549_p7) }
 0xd1b   : > { %3557 = vtanh.f32 %v1638_v33  ;;  %v2794_v46 = vmul.f32 -1.442695, %v1638_v33  ;;  %v4455_v33 = vld [vmem:[#allocation10 + $0x248] sm:$0xff] (%p1549_p7) }
 0xd1c   : > { %3559 = vpow2.f32 %v2793_v37  ;;  %v4463_v37 = vld [vmem:[#allocation10 + $0x268] sm:$0xff] (%p1549_p7) }
 0xd25   : > { %v3558_v34 = vpop.eup %3557 }
 0xd26   : > { %1654 = vrot.lane.b32.xlu0 %v3558_v34, %s3813_s20  ;;  %v3560_v38 = vpop.eup %3559  ;;  %v4457_v34 = vld [vmem:[#allocation10 + $0x250] sm:$0xff] (%p1549_p7) }
 0xd27   : > { %v1645_v39 = vadd.f32 1.0, %v3560_v38  ;;  %v4465_v38 = vld [vmem:[#allocation10 + $0x270] sm:$0xff] (%p1549_p7) }
 0xd29   : > { %3561 = vrcp.f32 %v1645_v39  ;;  %v4467_v39 = vld [vmem:[#allocation10 + $0x278] sm:$0xff] (%p1549_p7) }
 0xd33   : > { %v3562_v40 = vpop.eup %3561 }
 0xd34   : > { %v1652_v43 = vmul.f32 %v3773_v63, %v3562_v40 }
 0xd98   : > { %v1655_v41 = vpop.permute.xlu0 %1654 }
 0xd99   : > { %v1657_v42 = vmul.f32 %v3562_v40, %v1655_v41  ;;  %v2795_v40 = vld [vmem:[%s4692_s5 + $0x8] sm:$0x3] (%p1549_p7)  ;;  %s4478_s5 = smov (%p1549_p7), 0  }
 0xd9a   :  { %v1703_v41 = vrot.slane (%p1549_p7), %v2795_v40, %v4081_v30 }
 0xd9b   : > { %1659 = vrot.lane.b32.xlu0 %v1657_v42, %s3813_s20  ;;  %v1707_v42 = vrot.slane (%p1549_p7), %v2795_v40, %v4086_v32 }
 0xe0d   : > { %v1660_v44 = vpop.permute.xlu0 %1659 }
 0xe0e   : > { %v1662_v63 = vadd.f32 %v1660_v44, %v1652_v43  }
 0xe10   : > { %3563 = vtanh.f32 %v1662_v63 }
 0xe11   : > { %3565 = vpow2.f32 %v2794_v46 }
 0xe1a   : > { %v3564_v45 = vpop.eup %3563 }
 0xe1b   : > { %1665 = vrot.lane.b32.xlu1 %v3564_v45, %s3813_s20  ;;  %v3566_v18 = vpop.eup %3565 }
 0xe1c   : > { %v1646_v48 = vadd.f32 1.0, %v3566_v18 }
 0xe1e   : > { %3567 = vrcp.f32 %v1646_v48 }
 0xe28   : > { %v3568_v49 = vpop.eup %3567 }
 0xe8a   :  { %1551 = sbr.rel (!%p1549_p7) target bundleno = 3122 (0xc32), region = 174 }
 0xe8d   : > { %v1666_v50 = vpop.permute.xlu1 %1665 }
 0xe8e   : > { %v1668_v47 = vmul.f32 %v3568_v49, %v1666_v50  }
 0xe90   : > { %1670 = vst.msk [vmem:[%s1669_s21] sm:$0xff] %vm288_vm3, %v1668_v47  ;;  %v1692_v47 = vld [vmem:[#allocation8 + $0x258] sm:$0xff] (%p1549_p7) }
 0xe91   :  { %v3117_v20 = vpack.c.bf16 %v1692_v47, %v1690_v62 }
 0xe93   :  { %3118 = vmatprep.subr.bf16.mxu0 %v3117_v20  ;;  %3367 = vmatprep.subr.bf16.mxu1 %v3117_v20 }
 0xe94   :  { %3120 = vmatpush1.bf16.msra.mxu0 %v3119_v25  ;;  %3371 = vmatpush1.bf16.msra.mxu1 %v3119_v25 }
 0xe95   :  { %3122 = vmatprep.subr.bf16.mxu0 %v3121_v27  ;;  %3368 = vmatprep.subr.bf16.mxu1 %v3121_v27 }
 0xe97   :  { %v1671_v6 = vld [vmem:[#allocation2] sm:$0xff]  ;;  %v1676_v7 = vld [vmem:[#allocation2 + $0x28] sm:$0xff]  ;;  %v1677_v9 = vld [vmem:[#allocation2 + $0x30] sm:$0xff] }
 0xe98   :  { %3124 = vmatpush1.bf16.msra.mxu0 %v3123_v5  ;;  %3372 = vmatpush1.bf16.msra.mxu1 %v3123_v5  ;;  %v1672_v8 = vld [vmem:[#allocation2 + $0x8] sm:$0xff]  ;;  %v1673_v10 = vld [vmem:[#allocation2 + $0x10] sm:$0xff]  ;;  %v1678_v63 = vld [vmem:[#allocation2 + $0x38] sm:$0xff] }
 0xe99   :  { %v1674_v19 = vld [vmem:[#allocation2 + $0x18] sm:$0xff]  ;;  %v1679_v28 = vld [vmem:[#allocation2 + $0x40] sm:$0xff] }
 0xe9a   :  { %v1675_v29 = vld [vmem:[#allocation2 + $0x20] sm:$0xff] }
 0xe9b   :  { %2796 = vmatmul.mubr.msk.f32.vlgmr.msra.gmra.mrb[0].mxu0 %vm288_vm3, %v1671_v6  ;;  %2801 = vmatmul.mubr.msk.f32.vlgmr.msra.gmra.mrb[0].mxu1 %vm288_vm3, %v1676_v7 }
 0xe9c   :  { %1807 = vmatprep.mubr.f32.mxu0 %v3805_v2  ;;  %1837 = vmatprep.mubr.f32.mxu1 %v3805_v2 }
 0xe9f   :  { %2797 = vmatmul.mubr.msk.f32.gmra.mrb[2].mxu0 %vm288_vm3, %v1672_v8  ;;  %2802 = vmatmul.mubr.msk.f32.gmra.mrb[2].mxu1 %vm288_vm3, %v1677_v9 }
 0xea0   :  { %1813 = vmatprep.mubr.f32.mxu0 %v3805_v2  ;;  %1843 = vmatprep.mubr.f32.mxu1 %v3805_v2 }
 0xea3   :  { %2798 = vmatmul.mubr.msk.f32.gmra.mrb[4].mxu0 %vm288_vm3, %v1673_v10  ;;  %2803 = vmatmul.mubr.msk.f32.gmra.mrb[4].mxu1 %vm288_vm3, %v1678_v63  ;;  %v4474_v10 = vmov 0.0   ;;  %v4476_v63 = vmov 0.0  }
 0xea4   :  { %1819 = vmatprep.mubr.f32.mxu0 %v3805_v2  ;;  %1849 = vmatprep.mubr.f32.mxu1 %v3805_v2 }
 0xea7   :  { %2799 = vmatmul.mubr.msk.f32.gmra.mrb[6].mxu0 %vm288_vm3, %v1674_v19  ;;  %2804 = vmatmul.mubr.msk.f32.gmra.mrb[6].mxu1 %vm288_vm3, %v1679_v28 }
 0xea8   :  { %1825 = vmatprep.mubr.f32.mxu0 %v3805_v2 }
 0xeab   :  { %2800 = vmatmul.mubr.msk.f32.gmra.mrb[8].mxu0 %vm288_vm3, %v1675_v29 }
 0xf6e   :  { %v1803_v43 = vpop.f32.mrb[0].mxu0  ;;  %v1833_v44 = vpop.f32.mrb[0].mxu1 }
 0xf6f   :  { %v1804_v45 = vadd.f32 %v1803_v43, %v1703_v41  ;;  %v1805_v46 = vpop.f32.mrb[1].mxu0  ;;  %v1834_v18 = vadd.f32 %v1833_v44, %v1703_v41  ;;  %v1835_v48 = vpop.f32.mrb[1].mxu1 }
 0xf70   :  { %v1806_v49 = vadd.f32 %v1805_v46, %v1707_v42  ;;  %v1836_v50 = vadd.f32 %v1835_v48, %v1707_v42 }
 0xf71   :  { %1856 = vst [vmem:[#allocation3] sm:$0xff] %v1804_v45  ;;  %1866 = vst [vmem:[#allocation3 + $0x50] sm:$0xff] %v1834_v18 }
 0xf72   :  { %1857 = vst [vmem:[#allocation3 + $0x8] sm:$0xff] %v1806_v49  ;;  %v1809_v51 = vpop.f32.mrb[2].mxu0  ;;  %1867 = vst [vmem:[#allocation3 + $0x58] sm:$0xff] %v1836_v50  ;;  %v1839_v52 = vpop.f32.mrb[2].mxu1 }
 0xf73   :  { %v1810_v53 = vadd.f32 %v1809_v51, %v1703_v41  ;;  %v1811_v54 = vpop.f32.mrb[3].mxu0  ;;  %v1840_v55 = vadd.f32 %v1839_v52, %v1703_v41  ;;  %v1841_v56 = vpop.f32.mrb[3].mxu1 }
 0xf74   :  { %v1812_v57 = vadd.f32 %v1811_v54, %v1707_v42  ;;  %v1842_v58 = vadd.f32 %v1841_v56, %v1707_v42 }
 0xf75   :  { %1858 = vst [vmem:[#allocation3 + $0x10] sm:$0xff] %v1810_v53  ;;  %1868 = vst [vmem:[#allocation3 + $0x60] sm:$0xff] %v1840_v55 }
 0xf76   :  { %1859 = vst [vmem:[#allocation3 + $0x18] sm:$0xff] %v1812_v57  ;;  %v1815_v59 = vpop.f32.mrb[4].mxu0  ;;  %1869 = vst [vmem:[#allocation3 + $0x68] sm:$0xff] %v1842_v58  ;;  %v1845_v60 = vpop.f32.mrb[4].mxu1 }
 0xf77   :  { %v1816_v61 = vadd.f32 %v1815_v59, %v1703_v41  ;;  %v1817_v62 = vpop.f32.mrb[5].mxu0  ;;  %v1846_v47 = vadd.f32 %v1845_v60, %v1703_v41  ;;  %v1847_v0 = vpop.f32.mrb[5].mxu1 }
 0xf78   :  { %v1818_v20 = vadd.f32 %v1817_v62, %v1707_v42  ;;  %v1848_v21 = vadd.f32 %v1847_v0, %v1707_v42 }
 0xf79   :  { %1860 = vst [vmem:[#allocation3 + $0x20] sm:$0xff] %v1816_v61  ;;  %1870 = vst [vmem:[#allocation3 + $0x70] sm:$0xff] %v1846_v47 }
 0xf7a   :  { %1861 = vst [vmem:[#allocation3 + $0x28] sm:$0xff] %v1818_v20  ;;  %v1821_v22 = vpop.f32.mrb[6].mxu0  ;;  %1871 = vst [vmem:[#allocation3 + $0x78] sm:$0xff] %v1848_v21  ;;  %v1851_v23 = vpop.f32.mrb[6].mxu1 }
 0xf7b   :  { %v1822_v24 = vadd.f32 %v1821_v22, %v1703_v41  ;;  %v1823_v25 = vpop.f32.mrb[7].mxu0  ;;  %v1852_v27 = vadd.f32 %v1851_v23, %v1703_v41  ;;  %v1853_v3 = vpop.f32.mrb[7].mxu1 }
 0xf7c   :  { %v1824_v4 = vadd.f32 %v1823_v25, %v1707_v42  ;;  %v1854_v5 = vadd.f32 %v1853_v3, %v1707_v42 }
 0xf7d   :  { %1862 = vst [vmem:[#allocation3 + $0x30] sm:$0xff] %v1822_v24  ;;  %1872 = vst [vmem:[#allocation3 + $0x80] sm:$0xff] %v1852_v27 }
 0xf7e   :  { %1863 = vst [vmem:[#allocation3 + $0x38] sm:$0xff] %v1824_v4  ;;  %v1827_v6 = vpop.f32.mrb[8].mxu0  ;;  %1873 = vst [vmem:[#allocation3 + $0x88] sm:$0xff] %v1854_v5 }
 0xf7f   :  { %v1828_v7 = vadd.f32 %v1827_v6, %v1703_v41  ;;  %v1829_v8 = vpop.f32.mrb[9].mxu0 }
 0xf80   :  { %v1830_v9 = vadd.f32 %v1829_v8, %v1707_v42 }
 0xf81   :  { %1864 = vst [vmem:[#allocation3 + $0x40] sm:$0xff] %v1828_v7 }
 0xf82   :  { %1865 = vst [vmem:[#allocation3 + $0x48] sm:$0xff] %v1830_v9 }
 0xf83 LB: > { %v3125_v19 = vpack.c.bf16 %v4443_v14, %v4439_v12  ;;  %v3127_v28 = vpack.c.bf16 %v4441_v13, %v4437_v11  ;;  %v3129_v29 = vpack.c.bf16 %v4451_v26, %v4447_v16  ;;  %v3131_v40 = vpack.c.bf16 %v4449_v17, %v4445_v15  ;;  %s2805_s25 = sshll.u32 %s3793_s5, 3  ;;  %s3815_s27 = smov 64   ;;  %s3793_s5 = sphi %s4478_s5, %s1896_s5   ;;  %v3789_v63 = vphi %v4476_v63, %v2012_v63   ;;  %v3785_v10 = vphi %v4474_v10, %v2006_v10  }
 0xf84   : > { %v3814_v41 = vmov 0.0   ;;  %v3133_v42 = vpack.c.bf16 %v4459_v35, %v4455_v33  ;;  %v3135_v43 = vpack.c.bf16 %v4457_v34, %v4453_v31  ;;  %v3137_v44 = vpack.c.bf16 %v4467_v39, %v4463_v37  ;;  %s1900_s26 = sshra.s32 %s2805_s25, 3  ;;  %s2013_s28 = scalar_lea.vmem [#allocation2], %s2805_s25 }
 0xf85   : > { %3126 = vmatprep.subr.bf16.mxu0 %v3125_v19  ;;  %1974 = vmatprep.mubr.f32.mxu0 %v3814_v41  ;;  %v3139_v45 = vpack.c.bf16 %v4465_v38, %v4461_v36  ;;  %s2818_s0 = sshll.u32 %s1900_s26, 4  ;;  %s1896_s5 = sadd.s32 1, %s3793_s5  }
 0xf86   : > { %3128 = vmatpush1.bf16.msra.mxu0 %v3127_v28  ;;  %s1904_s19 = scalar_lea.vmem [#allocation3], %s2818_s0  ;;  %p1893_p8 = scmp.ge.s32.totalorder %s1896_s5, 9  }
 0xf87   : > { %3130 = vmatprep.subr.bf16.mxu0 %v3129_v29  ;;  %s3816_s3 = smov (%p1893_p8), 64   ;;  %v2120_v27 = vld [vmem:[#allocation11 + $0x208] sm:$0xff] (%p1893_p8)  ;;  %v2122_v3 = vld [vmem:[#allocation11 + $0x218] sm:$0xff] (%p1893_p8)  ;;  %v2119_v5 = vld [vmem:[#allocation11 + $0x200] sm:$0xff] (%p1893_p8)  ;;  %vm2022_vm12 = vcmask (%p1893_p8), 1048064  }
 0xf88   :  { %v3205_v4 = vpack.c.bf16 (%p1893_p8), %v2122_v3, %v2120_v27  ;;  %v2121_v6 = vld [vmem:[#allocation11 + $0x210] sm:$0xff] (%p1893_p8)  ;;  %v2124_v7 = vld [vmem:[#allocation11 + $0x228] sm:$0xff] (%p1893_p8)  ;;  %v2126_v9 = vld [vmem:[#allocation11 + $0x238] sm:$0xff] (%p1893_p8) }
 0xf89   : > { %v1906_v46 = vld [vmem:[%s1904_s19 + $0x8] sm:$0xff]  ;;  %v1905_v51 = vld [vmem:[%s1904_s19] sm:$0xff]  ;;  %v3207_v8 = vpack.c.bf16 (%p1893_p8), %v2121_v6, %v2119_v5  ;;  %v3209_v28 = vpack.c.bf16 (%p1893_p8), %v2126_v9, %v2124_v7  ;;  %v2128_v29 = vld [vmem:[#allocation11 + $0x248] sm:$0xff] (%p1893_p8) }
 0xf8a   : > { %3132 = vmatpush1.bf16.msra.mxu0 %v3131_v40  ;;  %v2123_v19 = vld [vmem:[#allocation11 + $0x220] sm:$0xff] (%p1893_p8)  ;;  %v2130_v11 = vld [vmem:[#allocation11 + $0x258] sm:$0xff] (%p1893_p8)  ;;  %v2056_v14 = vld [vmem:[#allocation11 + $0x8] sm:$0xff] (%p1893_p8) }
 0xf8b   : > { %3134 = vmatprep.subr.bf16.mxu0 %v3133_v42  ;;  %v2127_v13 = vld [vmem:[#allocation11 + $0x240] sm:$0xff] (%p1893_p8)  ;;  %v2058_v15 = vld [vmem:[#allocation11 + $0x18] sm:$0xff] (%p1893_p8)  ;;  %v3213_v16 = vpack.c.bf16 (%p1893_p8), %v2130_v11, %v2128_v29  ;;  %v2129_v17 = vld [vmem:[#allocation11 + $0x250] sm:$0xff] (%p1893_p8) }
 0xf8c   :  { %v3141_v26 = vpack.c.bf16 (%p1893_p8), %v2058_v15, %v2056_v14  ;;  %v2055_v31 = vld [vmem:[#allocation11] sm:$0xff] (%p1893_p8)  ;;  %v2057_v33 = vld [vmem:[#allocation11 + $0x10] sm:$0xff] (%p1893_p8)  ;;  %v2132_v34 = vld [vmem:[#allocation11 + $0x268] sm:$0xff] (%p1893_p8)  ;;  %v3215_v39 = vpack.c.bf16 (%p1893_p8), %v2129_v17, %v2127_v13 }
 0xf8d   :  { %v2134_v35 = vld [vmem:[#allocation11 + $0x278] sm:$0xff] (%p1893_p8)  ;;  %v3143_v36 = vpack.c.bf16 (%p1893_p8), %v2057_v33, %v2055_v31  ;;  %v2060_v37 = vld [vmem:[#allocation11 + $0x28] sm:$0xff] (%p1893_p8)  ;;  %v2059_v41 = vld [vmem:[#allocation11 + $0x20] sm:$0xff] (%p1893_p8) }
 0xf8e   : > { %3136 = vmatpush1.bf16.msra.mxu0 %v3135_v43  ;;  %3142 = vmatprep.subr.bf16.mxu1 (%p1893_p8), %v3141_v26  ;;  %v2062_v38 = vld [vmem:[#allocation11 + $0x38] sm:$0xff] (%p1893_p8)  ;;  %v2061_v42 = vld [vmem:[#allocation11 + $0x30] sm:$0xff] (%p1893_p8)  ;;  %v3217_v43 = vpack.c.bf16 (%p1893_p8), %v2134_v35, %v2132_v34  ;;  %v2144_v3 = vld [vmem:[#allocation11 + $0x2c8] sm:$0xff] (%p1893_p8) }
 0xf8f   : > { %3138 = vmatprep.subr.bf16.mxu0 %v3137_v44  ;;  %3144 = vmatpush1.bf16.msra.mxu1 (%p1893_p8), %v3143_v36  ;;  %v3145_v40 = vpack.c.bf16 (%p1893_p8), %v2062_v38, %v2060_v37  ;;  %v2133_v44 = vld [vmem:[#allocation11 + $0x270] sm:$0xff] (%p1893_p8)  ;;  %v2071_v5 = vld [vmem:[#allocation11 + $0x80] sm:$0xff] (%p1893_p8)  ;;  %v2146_v7 = vld [vmem:[#allocation11 + $0x2d8] sm:$0xff] (%p1893_p8) }
 0xf90   :  { %v2073_v6 = vld [vmem:[#allocation11 + $0x90] sm:$0xff] (%p1893_p8)  ;;  %v2078_v9 = vld [vmem:[#allocation11 + $0xb8] sm:$0xff] (%p1893_p8)  ;;  %v3229_v11 = vpack.c.bf16 (%p1893_p8), %v2146_v7, %v2144_v3  ;;  %v2075_v14 = vld [vmem:[#allocation11 + $0xa0] sm:$0xff] (%p1893_p8) }
 0xf91   :  { %3146 = vmatprep.subr.bf16.mxu1 (%p1893_p8), %v3145_v40  ;;  %v3159_v29 = vpack.c.bf16 (%p1893_p8), %v2073_v6, %v2071_v5  ;;  %v2077_v15 = vld [vmem:[#allocation11 + $0xb0] sm:$0xff] (%p1893_p8)  ;;  %v2080_v17 = vld [vmem:[#allocation11 + $0xc8] sm:$0xff] (%p1893_p8)  ;;  %v2082_v26 = vld [vmem:[#allocation11 + $0xd8] sm:$0xff] (%p1893_p8) }
 0xf92   : > { %3140 = vmatpush1.bf16.msra.mxu0 %v3139_v45  ;;  %v3147_v45 = vpack.c.bf16 (%p1893_p8), %v2061_v42, %v2059_v41  ;;  %v2147_v33 = vld [vmem:[#allocation11 + $0x2e0] sm:$0xff] (%p1893_p8)  ;;  %v2149_v34 = vld [vmem:[#allocation11 + $0x2f0] sm:$0xff] (%p1893_p8)  ;;  %v3163_v35 = vpack.c.bf16 (%p1893_p8), %v2077_v15, %v2075_v14  ;;  %v2152_v37 = vld [vmem:[#allocation11 + $0x308] sm:$0xff] (%p1893_p8)  ;;  %v3165_v38 = vpack.c.bf16 (%p1893_p8), %v2082_v26, %v2080_v17 }
 0xf93   :  { %3206 = vmatprep.subr.bf16.mxu0 (%p1893_p8), %v3205_v4  ;;  %v2154_v40 = vld [vmem:[#allocation11 + $0x318] sm:$0xff] (%p1893_p8)  ;;  %v2084_v41 = vld [vmem:[#allocation11 + $0xe8] sm:$0xff] (%p1893_p8)  ;;  %v2091_v7 = vld [vmem:[#allocation11 + $0x120] sm:$0xff] (%p1893_p8) }
 0xf94   :  { %3148 = vmatpush1.bf16.msra.mxu1 (%p1893_p8), %v3147_v45  ;;  %v2086_v42 = vld [vmem:[#allocation11 + $0xf8] sm:$0xff] (%p1893_p8)  ;;  %v2153_v45 = vld [vmem:[#allocation11 + $0x310] sm:$0xff] (%p1893_p8)  ;;  %v2164_v5 = vld [vmem:[#allocation11 + $0x368] sm:$0xff] (%p1893_p8) }
 0xf95   : > { %2808 = vmatmul.mubr.msk.f32.vlgmr.msra.gmra.mrb[0].mxu0 %vm288_vm3, %v3789_v63  ;;  %v2095_v26 = vld [vmem:[#allocation11 + $0x140] sm:$0xff] (%p1893_p8) }
 0xf96   :  { %3208 = vmatpush1.bf16.msra.mxu0 (%p1893_p8), %v3207_v8  ;;  %v2076_v8 = vld [vmem:[#allocation11 + $0xa8] sm:$0xff] (%p1893_p8) }
 0xf97   :  { %3210 = vmatprep.subr.bf16.mxu0 (%p1893_p8), %v3209_v28  ;;  %v2145_v28 = vld [vmem:[#allocation11 + $0x2d0] sm:$0xff] (%p1893_p8)  ;;  %v3161_v13 = vpack.c.bf16 (%p1893_p8), %v2078_v9, %v2076_v8  ;;  %v2166_v9 = vld [vmem:[#allocation11 + $0x378] sm:$0xff] (%p1893_p8) }
 0xf98   :  { %v2093_v8 = vld [vmem:[#allocation11 + $0x130] sm:$0xff] (%p1893_p8)  ;;  %v3249_v15 = vpack.c.bf16 (%p1893_p8), %v2166_v9, %v2164_v5 }
 0xf99   :  { %v3179_v14 = vpack.c.bf16 (%p1893_p8), %v2093_v8, %v2091_v7  ;;  %v2181_v5 = vld [vmem:[#allocation11 + $0x3f0] sm:$0xff] (%p1893_p8)  ;;  %v2184_v8 = vld [vmem:[#allocation11 + $0x408] sm:$0xff] (%p1893_p8) }
0x1068   : > { %v1976_v18 = vpop.f32.mrb[0].mxu0 }
0x1069   : > { %v1978_v48 = vpop.f32.mrb[1].mxu0  ;;  %v1981_v52 = vadd.f32 %v1976_v18, %v1905_v51  ;;  %v2066_v18 = vld [vmem:[#allocation11 + $0x58] sm:$0xff] (%p1893_p8)  ;;  %v2063_v51 = vld [vmem:[#allocation11 + $0x40] sm:$0xff] (%p1893_p8) }
0x106a   : > { %v1982_v49 = vadd.f32 %v1978_v48, %v1906_v46  ;;  %v2064_v46 = vld [vmem:[#allocation11 + $0x48] sm:$0xff] (%p1893_p8) }
0x106b   : > { %v2809_v53 = vmul.f32 -1.442695, %v1981_v52  ;;  %v2136_v48 = vld [vmem:[#allocation11 + $0x288] sm:$0xff] (%p1893_p8)  ;;  %v2065_v52 = vld [vmem:[#allocation11 + $0x50] sm:$0xff] (%p1893_p8) }
0x106c   : > { %3569 = vtanh.f32 %v1982_v49  ;;  %v2810_v62 = vmul.f32 -1.442695, %v1982_v49  ;;  %v2138_v49 = vld [vmem:[#allocation11 + $0x298] sm:$0xff] (%p1893_p8) }
0x106d   : > { %3571 = vpow2.f32 %v2809_v53 }
0x1076   : > { %v3570_v50 = vpop.eup %3569 }
0x1077   : > { %1998 = vrot.lane.b32.xlu0 %v3570_v50, %s3815_s27  ;;  %v3572_v54 = vpop.eup %3571  ;;  %v3149_v50 = vpack.c.bf16 (%p1893_p8), %v2066_v18, %v2064_v46  ;;  %v2156_v46 = vld [vmem:[#allocation11 + $0x328] sm:$0xff] (%p1893_p8) }
0x1078   : > { %v1989_v55 = vadd.f32 1.0, %v3572_v54  ;;  %v2135_v54 = vld [vmem:[#allocation11 + $0x280] sm:$0xff] (%p1893_p8) }
0x1079   :  { %3150 = vmatprep.subr.bf16.mxu1 (%p1893_p8), %v3149_v50  ;;  %v3169_v50 = vpack.c.bf16 (%p1893_p8), %v2086_v42, %v2084_v41  ;;  %v2099_v42 = vld [vmem:[#allocation11 + $0x160] sm:$0xff] (%p1893_p8) }
0x107a   : > { %3573 = vrcp.f32 %v1989_v55  ;;  %v3151_v55 = vpack.c.bf16 (%p1893_p8), %v2065_v52, %v2063_v51  ;;  %v2083_v51 = vld [vmem:[#allocation11 + $0xe0] sm:$0xff] (%p1893_p8)  ;;  %v2085_v52 = vld [vmem:[#allocation11 + $0xf0] sm:$0xff] (%p1893_p8) }
0x107c   :  { %3152 = vmatpush1.bf16.msra.mxu1 (%p1893_p8), %v3151_v55 }
0x1084   : > { %v3574_v56 = vpop.eup %3573 }
0x1085   : > { %v1996_v59 = vmul.f32 %v3785_v10, %v3574_v56 }
0x10e9   : > { %v1999_v57 = vpop.permute.xlu0 %1998 }
0x10ea   : > { %v2001_v58 = vmul.f32 %v3574_v56, %v1999_v57  ;;  %v2068_v56 = vld [vmem:[#allocation11 + $0x68] sm:$0xff] (%p1893_p8)  ;;  %v2070_v57 = vld [vmem:[#allocation11 + $0x78] sm:$0xff] (%p1893_p8) }
0x10ec   : > { %2003 = vrot.lane.b32.xlu0 %v2001_v58, %s3815_s27  ;;  %v3221_v58 = vpack.c.bf16 (%p1893_p8), %v2138_v49, %v2136_v48  ;;  %v3237_v48 = vpack.c.bf16 (%p1893_p8), %v2154_v40, %v2152_v37  ;;  %v2158_v49 = vld [vmem:[#allocation11 + $0x338] sm:$0xff] (%p1893_p8)  ;;  %v2167_v37 = vld [vmem:[#allocation11 + $0x380] sm:$0xff] (%p1893_p8)  ;;  %v2172_v40 = vld [vmem:[#allocation11 + $0x3a8] sm:$0xff] (%p1893_p8) }
0x115e   : > { %v2004_v60 = vpop.permute.xlu0 %2003 }
0x115f   : > { %v2006_v10 = vadd.f32 %v2004_v60, %v1996_v59   ;;  %v2137_v59 = vld [vmem:[#allocation11 + $0x290] sm:$0xff] (%p1893_p8)  ;;  %v3153_v60 = vpack.c.bf16 (%p1893_p8), %v2070_v57, %v2068_v56  ;;  %v2155_v57 = vld [vmem:[#allocation11 + $0x320] sm:$0xff] (%p1893_p8) }
0x1161   : > { %3575 = vtanh.f32 %v2006_v10  ;;  %v2131_v10 = vld [vmem:[#allocation11 + $0x260] sm:$0xff] (%p1893_p8)  ;;  %3154 = vmatprep.subr.bf16.mxu1 (%p1893_p8), %v3153_v60  ;;  %v3171_v60 = vpack.c.bf16 (%p1893_p8), %v2085_v52, %v2083_v51 }
0x1162   : > { %3577 = vpow2.f32 %v2810_v62  ;;  %v3219_v53 = vpack.c.bf16 (%p1893_p8), %v2133_v44, %v2131_v10  ;;  %v2069_v62 = vld [vmem:[#allocation11 + $0x70] sm:$0xff] (%p1893_p8)  ;;  %v2151_v44 = vld [vmem:[#allocation11 + $0x300] sm:$0xff] (%p1893_p8) }
0x1163   :  { %v2081_v10 = vld [vmem:[#allocation11 + $0xd0] sm:$0xff] (%p1893_p8)  ;;  %v3239_v56 = vpack.c.bf16 (%p1893_p8), %v2153_v45, %v2151_v44  ;;  %v2174_v44 = vld [vmem:[#allocation11 + $0x3b8] sm:$0xff] (%p1893_p8)  ;;  %v2104_v45 = vld [vmem:[#allocation11 + $0x188] sm:$0xff] (%p1893_p8) }
0x1164   :  { %v3257_v52 = vpack.c.bf16 (%p1893_p8), %v2174_v44, %v2172_v40  ;;  %v2189_v44 = vld [vmem:[#allocation11 + $0x430] sm:$0xff] (%p1893_p8) }
0x116b   : > { %v3576_v61 = vpop.eup %3575 }
0x116c   : > { %2009 = vrot.lane.b32.xlu1 %v3576_v61, %s3815_s27  ;;  %v3578_v47 = vpop.eup %3577  ;;  %v2067_v61 = vld [vmem:[#allocation11 + $0x60] sm:$0xff] (%p1893_p8) }
0x116d   : > { %v1990_v0 = vadd.f32 1.0, %v3578_v47  ;;  %v2140_v47 = vld [vmem:[#allocation11 + $0x2a8] sm:$0xff] (%p1893_p8) }
0x116f   : > { %3579 = vrcp.f32 %v1990_v0  ;;  %v2142_v0 = vld [vmem:[#allocation11 + $0x2b8] sm:$0xff] (%p1893_p8) }
0x1170   :  { %v3225_v27 = vpack.c.bf16 (%p1893_p8), %v2142_v0, %v2140_v47  ;;  %v2087_v47 = vld [vmem:[#allocation11 + $0x100] sm:$0xff] (%p1893_p8)  ;;  %v2089_v0 = vld [vmem:[#allocation11 + $0x110] sm:$0xff] (%p1893_p8) }
0x1171   :  { %v3175_v3 = vpack.c.bf16 (%p1893_p8), %v2089_v0, %v2087_v47 }
0x1179   : > { %v3580_v20 = vpop.eup %3579 }
0x11db   :  { %1895 = sbr.rel (!%p1893_p8) target bundleno = 3971 (0xf83), region = 185 }
0x11de   : > { %v2010_v21 = vpop.permute.xlu1 %2009 }
0x11df   : > { %v2012_v63 = vmul.f32 %v3580_v20, %v2010_v21   ;;  %v2072_v20 = vld [vmem:[#allocation11 + $0x88] sm:$0xff] (%p1893_p8)  ;;  %v2074_v21 = vld [vmem:[#allocation11 + $0x98] sm:$0xff] (%p1893_p8) }
0x11e0   :  { %v3157_v4 = vpack.c.bf16 (%p1893_p8), %v2074_v21, %v2072_v20  ;;  %v2162_v21 = vld [vmem:[#allocation11 + $0x358] sm:$0xff] (%p1893_p8) }
0x11e1   : > { %2014 = vst.msk [vmem:[%s2013_s28] sm:$0xff] %vm288_vm3, %v2012_v63  ;;  %v2125_v63 = vld [vmem:[#allocation11 + $0x230] sm:$0xff] (%p1893_p8) }
0x11e2   :  { %v3211_v12 = vpack.c.bf16 %v2125_v63, %v2123_v19  ;;  %v2143_v63 = vld [vmem:[#allocation11 + $0x2c0] sm:$0xff] }
0x11e3   :  { %v3231_v31 = vpack.c.bf16 %v2145_v28, %v2143_v63  ;;  %v2098_v63 = vld [vmem:[#allocation11 + $0x158] sm:$0xff] }
0x11e4   :  { %3212 = vmatpush1.bf16.msra.mxu0 %v3211_v12  ;;  %v2148_v12 = vld [vmem:[#allocation11 + $0x2e8] sm:$0xff] }
0x11e5   :  { %3214 = vmatprep.subr.bf16.mxu0 %v3213_v16  ;;  %v2150_v16 = vld [vmem:[#allocation11 + $0x2f8] sm:$0xff] }
0x11e6   :  { %v3233_v36 = vpack.c.bf16 %v2150_v16, %v2148_v12  ;;  %v2165_v12 = vld [vmem:[#allocation11 + $0x370] sm:$0xff]  ;;  %v2170_v16 = vld [vmem:[#allocation11 + $0x398] sm:$0xff] }
0x11e8   :  { %v2042_v22 = vld [vmem:[#allocation2 + $0x38] sm:$0xff]  ;;  %v2034_v23 = vld [vmem:[#allocation2 + $0x28] sm:$0xff]  ;;  %3216 = vmatpush1.bf16.msra.mxu0 %v3215_v39  ;;  %v2040_v55 = vld [vmem:[#allocation2 + $0x30] sm:$0xff] }
0x11e9   :  { %v2026_v24 = vld [vmem:[#allocation2 + $0x18] sm:$0xff]  ;;  %2044 = vrot.lane.b32.xlu0 %v2042_v22, %s3816_s3  ;;  %v2017_v25 = vld [vmem:[#allocation2 + $0x8] sm:$0xff]  ;;  %3218 = vmatprep.subr.bf16.mxu0 %v3217_v43  ;;  %v3223_v22 = vpack.c.bf16 %v2137_v59, %v2135_v54  ;;  %v3235_v43 = vpack.c.bf16 %v2149_v34, %v2147_v33  ;;  %2041 = vst.msk [vmem:[#allocation4 + $0x18] sm:$0xff] %vm288_vm3, %v2040_v55  ;;  %v2032_v20 = vld [vmem:[#allocation2 + $0x20] sm:$0xff] }
0x11ea   :  { %2028 = vrot.lane.b32.xlu1 %v2026_v24, %s3816_s3  ;;  %v2141_v24 = vld [vmem:[#allocation11 + $0x2b0] sm:$0xff]  ;;  %v2079_v39 = vld [vmem:[#allocation11 + $0xc0] sm:$0xff]  ;;  %v2090_v54 = vld [vmem:[#allocation11 + $0x118] sm:$0xff]  ;;  %2033 = vst.msk [vmem:[#allocation4 + $0x10] sm:$0xff] %vm288_vm3, %v2032_v20 }
0x11eb   :  { %v3167_v18 = vpack.c.bf16 %v2081_v10, %v2079_v39  ;;  %v2160_v59 = vld [vmem:[#allocation11 + $0x348] sm:$0xff]  ;;  %v2102_v34 = vld [vmem:[#allocation11 + $0x178] sm:$0xff]  ;;  %v2103_v55 = vld [vmem:[#allocation11 + $0x180] sm:$0xff] }
0x11ec   :  { %3220 = vmatpush1.bf16.msra.mxu0 %v3219_v53  ;;  %v2088_v53 = vld [vmem:[#allocation11 + $0x108] sm:$0xff]  ;;  %v2048_v51 = vld [vmem:[#allocation2 + $0x40] sm:$0xff] }
0x11ed   :  { %2036 = vrot.lane.b32.xlu0 %v2034_v23, %s3816_s3  ;;  %v2139_v23 = vld [vmem:[#allocation11 + $0x2a0] sm:$0xff]  ;;  %3222 = vmatprep.subr.bf16.mxu0 %v3221_v58  ;;  %v2157_v58 = vld [vmem:[#allocation11 + $0x330] sm:$0xff]  ;;  %v2100_v33 = vld [vmem:[#allocation11 + $0x168] sm:$0xff]  ;;  %2049 = vst.msk [vmem:[#allocation4 + $0x20] sm:$0xff] %vm288_vm3, %v2048_v51 }
0x11ee   :  { %2019 = vrot.lane.b32.xlu1 %v2017_v25, %s3816_s3  ;;  %v3155_v25 = vpack.c.bf16 %v2069_v62, %v2067_v61  ;;  %v3227_v19 = vpack.c.bf16 %v2141_v24, %v2139_v23  ;;  %v3241_v61 = vpack.c.bf16 %v2158_v49, %v2156_v46  ;;  %v3173_v62 = vpack.c.bf16 %v2090_v54, %v2088_v53  ;;  %v2094_v23 = vld [vmem:[#allocation11 + $0x138] sm:$0xff]  ;;  %v2024_v28 = vld [vmem:[#allocation2 + $0x10] sm:$0xff]  ;;  %v2173_v49 = vld [vmem:[#allocation11 + $0x3b0] sm:$0xff] }
0x11ef   :  { %v3243_v24 = vpack.c.bf16 %v2157_v58, %v2155_v57  ;;  %2025 = vst.msk [vmem:[#allocation4 + $0x8] sm:$0xff] %vm288_vm3, %v2024_v28  ;;  %v3185_v41 = vpack.c.bf16 %v2102_v34, %v2100_v33  ;;  %v2106_v46 = vld [vmem:[#allocation11 + $0x198] sm:$0xff]  ;;  %v2176_v53 = vld [vmem:[#allocation11 + $0x3c8] sm:$0xff]  ;;  %v2191_v51 = vld [vmem:[#allocation11 + $0x440] sm:$0xff] }
0x11f0   :  { %3224 = vmatpush1.bf16.msra.mxu0 %v3223_v22  ;;  %3156 = vmatpush1.bf16.msra.mxu1 %v3155_v25  ;;  %v2092_v22 = vld [vmem:[#allocation11 + $0x128] sm:$0xff]  ;;  %v2159_v25 = vld [vmem:[#allocation11 + $0x340] sm:$0xff]  ;;  %v3189_v54 = vpack.c.bf16 %v2106_v46, %v2104_v45  ;;  %v2178_v57 = vld [vmem:[#allocation11 + $0x3d8] sm:$0xff] }
0x11f1   :  { %3226 = vmatprep.subr.bf16.mxu0 %v3225_v27  ;;  %3158 = vmatprep.subr.bf16.mxu1 %v3157_v4  ;;  %v2161_v27 = vld [vmem:[#allocation11 + $0x350] sm:$0xff]  ;;  %v3245_v4 = vpack.c.bf16 %v2162_v21, %v2160_v59  ;;  %v3177_v6 = vpack.c.bf16 %v2094_v23, %v2092_v22  ;;  %v2108_v58 = vld [vmem:[#allocation11 + $0x1a8] sm:$0xff]  ;;  %v2110_v59 = vld [vmem:[#allocation11 + $0x1b8] sm:$0xff]  ;;  %v3261_v0 = vpack.c.bf16 %v2178_v57, %v2176_v53 }
0x11f2   :  { %v2180_v20 = vld [vmem:[#allocation11 + $0x3e8] sm:$0xff]  ;;  %v3193_v21 = vpack.c.bf16 %v2110_v59, %v2108_v58  ;;  %v2107_v22 = vld [vmem:[#allocation11 + $0x1a0] sm:$0xff]  ;;  %v2109_v23 = vld [vmem:[#allocation11 + $0x1b0] sm:$0xff] }
0x11f3   :  { %v2186_v28 = vld [vmem:[#allocation11 + $0x418] sm:$0xff]  ;;  %v2192_v45 = vld [vmem:[#allocation11 + $0x448] sm:$0xff]  ;;  %v2195_v57 = vld [vmem:[#allocation11 + $0x460] sm:$0xff] }
0x11f4   :  { %3228 = vmatpush1.bf16.msra.mxu0 %v3227_v19  ;;  %3160 = vmatpush1.bf16.msra.mxu1 %v3159_v29  ;;  %v2096_v19 = vld [vmem:[#allocation11 + $0x148] sm:$0xff]  ;;  %v3247_v29 = vpack.c.bf16 %v2161_v27, %v2159_v25  ;;  %v2114_v27 = vld [vmem:[#allocation11 + $0x1d8] sm:$0xff]  ;;  %v2197_v58 = vld [vmem:[#allocation11 + $0x470] sm:$0xff] }
0x11f5   :  { %3230 = vmatprep.subr.bf16.mxu0 %v3229_v11  ;;  %3162 = vmatprep.subr.bf16.mxu1 %v3161_v13  ;;  %v2163_v11 = vld [vmem:[#allocation11 + $0x360] sm:$0xff]  ;;  %v2168_v13 = vld [vmem:[#allocation11 + $0x388] sm:$0xff]  ;;  %v3181_v17 = vpack.c.bf16 %v2098_v63, %v2096_v19  ;;  %v2113_v63 = vld [vmem:[#allocation11 + $0x1d0] sm:$0xff] }
0x11f6   :  { %v3253_v10 = vpack.c.bf16 %v2170_v16, %v2168_v13  ;;  %v2112_v25 = vld [vmem:[#allocation11 + $0x1c8] sm:$0xff]  ;;  %v2111_v19 = vld [vmem:[#allocation11 + $0x1c0] sm:$0xff]  ;;  %v2449_v59 = vld [vmem:[%s4695_s8 + $0x80] sm:$0xff] }
0x11f7   :  { %v3197_v9 = vpack.c.bf16 %v2114_v27, %v2112_v25  ;;  %v3199_v13 = vpack.c.bf16 %v2113_v63, %v2111_v19  ;;  %v2115_v16 = vld [vmem:[#allocation11 + $0x1e0] sm:$0xff]  ;;  %v2196_v53 = vld [vmem:[#allocation11 + $0x468] sm:$0xff]  ;;  %v2453_v27 = vld [vmem:[%s4695_s8 + $0xa0] sm:$0xff] }
0x11f8   :  { %3232 = vmatpush1.bf16.msra.mxu0 %v3231_v31  ;;  %3164 = vmatpush1.bf16.msra.mxu1 %v3163_v35  ;;  %v2097_v31 = vld [vmem:[#allocation11 + $0x150] sm:$0xff] }
0x11f9   :  { %3234 = vmatprep.subr.bf16.mxu0 %v3233_v36  ;;  %3166 = vmatprep.subr.bf16.mxu1 %v3165_v38  ;;  %v2015_v35 = vld [vmem:[#allocation2] sm:$0xff]  ;;  %v3251_v36 = vpack.c.bf16 %v2165_v12, %v2163_v11  ;;  %v3183_v39 = vpack.c.bf16 %v2097_v31, %v2095_v26  ;;  %v2436_v25 = vld [vmem:[%s4695_s8 + $0x18] sm:$0xff] }
0x11fa   :  { %2016 = vst.msk [vmem:[#allocation4] sm:$0xff] %vm288_vm3, %v2015_v35  ;;  %v2169_v38 = vld [vmem:[#allocation11 + $0x390] sm:$0xff]  ;;  %v2118_v11 = vld [vmem:[#allocation11 + $0x1f8] sm:$0xff] }
0x11fc   :  { %3236 = vmatpush1.bf16.msra.mxu0 %v3235_v43  ;;  %3168 = vmatpush1.bf16.msra.mxu1 %v3167_v18  ;;  %v2101_v43 = vld [vmem:[#allocation11 + $0x170] sm:$0xff]  ;;  %v3255_v18 = vpack.c.bf16 %v2169_v38, %v2167_v37  ;;  %v2188_v38 = vld [vmem:[#allocation11 + $0x428] sm:$0xff] }
0x11fd   :  { %3238 = vmatprep.subr.bf16.mxu0 %v3237_v48  ;;  %3170 = vmatprep.subr.bf16.mxu1 %v3169_v50  ;;  %v2171_v48 = vld [vmem:[#allocation11 + $0x3a0] sm:$0xff]  ;;  %v3187_v50 = vpack.c.bf16 %v2101_v43, %v2099_v42  ;;  %v2185_v37 = vld [vmem:[#allocation11 + $0x410] sm:$0xff] }
0x11fe   :  { %v2187_v43 = vld [vmem:[#allocation11 + $0x420] sm:$0xff] }
0x1200   :  { %3240 = vmatpush1.bf16.msra.mxu0 %v3239_v56  ;;  %3172 = vmatpush1.bf16.msra.mxu1 %v3171_v60  ;;  %v2105_v56 = vld [vmem:[#allocation11 + $0x190] sm:$0xff]  ;;  %v3259_v60 = vpack.c.bf16 %v2173_v49, %v2171_v48  ;;  %v3275_v49 = vpack.c.bf16 %v2189_v44, %v2187_v43 }
0x1201   :  { %3242 = vmatprep.subr.bf16.mxu0 %v3241_v61  ;;  %3174 = vmatprep.subr.bf16.mxu1 %v3173_v62  ;;  %v2175_v61 = vld [vmem:[#allocation11 + $0x3c0] sm:$0xff]  ;;  %v2177_v62 = vld [vmem:[#allocation11 + $0x3d0] sm:$0xff]  ;;  %v3191_v47 = vpack.c.bf16 %v2105_v56, %v2103_v55 }
0x1202   :  { %v2464_v43 = vld [vmem:[%s4695_s8 + $0xf8] sm:$0xff] }
0x1204   :  { %3244 = vmatpush1.bf16.msra.mxu0 %v3243_v24  ;;  %3176 = vmatpush1.bf16.msra.mxu1 %v3175_v3  ;;  %v2182_v24 = vld [vmem:[#allocation11 + $0x3f8] sm:$0xff]  ;;  %v3263_v3 = vpack.c.bf16 %v2177_v62, %v2175_v61  ;;  %v3283_v61 = vpack.c.bf16 %v2197_v58, %v2195_v57  ;;  %v2551_v57 = vld [vmem:[%s4697_s10 + $0x30] sm:$0xff]  ;;  %v2552_v58 = vld [vmem:[%s4697_s10 + $0x38] sm:$0xff] }
0x1205   :  { %3246 = vmatprep.subr.bf16.mxu0 %v3245_v4  ;;  %3178 = vmatprep.subr.bf16.mxu1 %v3177_v6  ;;  %v2179_v4 = vld [vmem:[#allocation11 + $0x3e0] sm:$0xff]  ;;  %v3195_v6 = vpack.c.bf16 %v2109_v23, %v2107_v22  ;;  %v3265_v7 = vpack.c.bf16 %v2182_v24, %v2180_v20  ;;  %v2433_v62 = vld [vmem:[%s4695_s8] sm:$0xff]  ;;  %v2452_v20 = vld [vmem:[%s4695_s8 + $0x98] sm:$0xff] }
0x1206   :  { %v3267_v12 = vpack.c.bf16 %v2181_v5, %v2179_v4  ;;  %v2435_v24 = vld [vmem:[%s4695_s8 + $0x10] sm:$0xff] }
0x1207   :  { %v3291_v4 = vpack.c.bf16 %v2436_v25, %v2435_v24 }
0x1208   :  { %3248 = vmatpush1.bf16.msra.mxu0 %v3247_v29  ;;  %3180 = vmatpush1.bf16.msra.mxu1 %v3179_v14  ;;  %v2116_v29 = vld [vmem:[#allocation11 + $0x1e8] sm:$0xff]  ;;  %v3269_v14 = vpack.c.bf16 %v2186_v28, %v2184_v8 }
0x1209   :  { %3250 = vmatprep.subr.bf16.mxu0 %v3249_v15  ;;  %3182 = vmatprep.subr.bf16.mxu1 %v3181_v17  ;;  %v3201_v15 = vpack.c.bf16 %v2118_v11, %v2116_v29  ;;  %v2117_v17 = vld [vmem:[#allocation11 + $0x1f0] sm:$0xff]  ;;  %v2455_v8 = vld [vmem:[%s4695_s8 + $0xb0] sm:$0xff] }
0x120a   :  { %v3203_v26 = vpack.c.bf16 %v2117_v17, %v2115_v16  ;;  %v2439_v28 = vld [vmem:[%s4695_s8 + $0x30] sm:$0xff]  ;;  %v2440_v29 = vld [vmem:[%s4695_s8 + $0x38] sm:$0xff]  ;;  %v2457_v11 = vld [vmem:[%s4695_s8 + $0xc0] sm:$0xff] }
0x120b   :  { %v2442_v16 = vld [vmem:[%s4695_s8 + $0x48] sm:$0xff]  ;;  %v2459_v17 = vld [vmem:[%s4695_s8 + $0xd0] sm:$0xff] }
0x120c   :  { %3252 = vmatpush1.bf16.msra.mxu0 %v3251_v36  ;;  %3184 = vmatpush1.bf16.msra.mxu1 %v3183_v39  ;;  %v2183_v36 = vld [vmem:[#allocation11 + $0x400] sm:$0xff] }
0x120d   :  { %3254 = vmatprep.subr.bf16.mxu0 %v3253_v10  ;;  %3186 = vmatprep.subr.bf16.mxu1 %v3185_v41  ;;  %v2190_v10 = vld [vmem:[#allocation11 + $0x438] sm:$0xff]  ;;  %v3271_v41 = vpack.c.bf16 %v2185_v37, %v2183_v36 }
0x120e   :  { %v3273_v42 = vpack.c.bf16 %v2190_v10, %v2188_v38  ;;  %v2461_v37 = vld [vmem:[%s4695_s8 + $0xe0] sm:$0xff]  ;;  %v2462_v38 = vld [vmem:[%s4695_s8 + $0xe8] sm:$0xff] }
0x120f   :  { %v2445_v10 = vld [vmem:[%s4695_s8 + $0x60] sm:$0xff] }
0x1210   :  { %3256 = vmatpush1.bf16.msra.mxu0 %v3255_v18  ;;  %3188 = vmatpush1.bf16.msra.mxu1 %v3187_v50  ;;  %v2194_v18 = vld [vmem:[#allocation11 + $0x458] sm:$0xff] }
0x1211   :  { %3258 = vmatprep.subr.bf16.mxu0 %v3257_v52  ;;  %3190 = vmatprep.subr.bf16.mxu1 %v3189_v54  ;;  %v3277_v50 = vpack.c.bf16 %v2194_v18, %v2192_v45  ;;  %v2193_v52 = vld [vmem:[#allocation11 + $0x450] sm:$0xff]  ;;  %v2198_v54 = vld [vmem:[#allocation11 + $0x478] sm:$0xff]  ;;  %v2447_v45 = vld [vmem:[%s4695_s8 + $0x70] sm:$0xff] }
0x1212   :  { %v3279_v55 = vpack.c.bf16 %v2193_v52, %v2191_v51  ;;  %v3281_v56 = vpack.c.bf16 %v2198_v54, %v2196_v53  ;;  %v2548_v52 = vld [vmem:[%s4697_s10 + $0x18] sm:$0xff]  ;;  %v2549_v54 = vld [vmem:[%s4697_s10 + $0x20] sm:$0xff] }
0x1214   :  { %3260 = vmatpush1.bf16.msra.mxu0 %v3259_v60  ;;  %3192 = vmatpush1.bf16.msra.mxu1 %v3191_v47  ;;  %v2450_v60 = vld [vmem:[%s4695_s8 + $0x88] sm:$0xff] }
0x1215   :  { %3262 = vmatprep.subr.bf16.mxu0 %v3261_v0  ;;  %3194 = vmatprep.subr.bf16.mxu1 %v3193_v21  ;;  %v2434_v47 = vld [vmem:[%s4695_s8 + $0x8] sm:$0xff]  ;;  %v2451_v0 = vld [vmem:[%s4695_s8 + $0x90] sm:$0xff]  ;;  %v2054_v21 = vld [vmem:[#allocation4 + $0x20] sm:$0xff] }
0x1216   :  { %v3287_v22 = vpack.c.bf16 %v2434_v47, %v2433_v62  ;;  %v3289_v23 = vpack.c.bf16 %v2452_v20, %v2451_v0  ;;  %v2555_v62 = vld [vmem:[%s4697_s10 + $0x50] sm:$0xff]  ;;  %v2556_v47 = vld [vmem:[%s4697_s10 + $0x58] sm:$0xff] }
0x1217   :  { %v3333_v0 = vpack.c.bf16 %v2556_v47, %v2555_v62 }
0x1218   :  { %3264 = vmatpush1.bf16.msra.mxu0 %v3263_v3  ;;  %3196 = vmatpush1.bf16.msra.mxu1 %v3195_v6  ;;  %v2454_v3 = vld [vmem:[%s4695_s8 + $0xa8] sm:$0xff]  ;;  %v2437_v6 = vld [vmem:[%s4695_s8 + $0x20] sm:$0xff] }
0x1219   :  { %3266 = vmatprep.subr.bf16.mxu0 %v3265_v7  ;;  %3198 = vmatprep.subr.bf16.mxu1 %v3197_v9  ;;  %v3293_v5 = vpack.c.bf16 %v2454_v3, %v2453_v27  ;;  %v2438_v7 = vld [vmem:[%s4695_s8 + $0x28] sm:$0xff]  ;;  %v2456_v9 = vld [vmem:[%s4695_s8 + $0xb8] sm:$0xff] }
0x121a   :  { %v3295_v19 = vpack.c.bf16 %v2438_v7, %v2437_v6  ;;  %v3297_v63 = vpack.c.bf16 %v2456_v9, %v2455_v8 }
0x121c   :  { %3268 = vmatpush1.bf16.msra.mxu0 %v3267_v12  ;;  %3200 = vmatpush1.bf16.msra.mxu1 %v3199_v13  ;;  %v2458_v12 = vld [vmem:[%s4695_s8 + $0xc8] sm:$0xff]  ;;  %v3299_v13 = vpack.c.bf16 %v2440_v29, %v2439_v28  ;;  %v2559_v28 = vld [vmem:[%s4697_s10 + $0x70] sm:$0xff]  ;;  %v2560_v29 = vld [vmem:[%s4697_s10 + $0x78] sm:$0xff] }
0x121d   :  { %3270 = vmatprep.subr.bf16.mxu0 %v3269_v14  ;;  %3202 = vmatprep.subr.bf16.mxu1 %v3201_v15  ;;  %v3301_v14 = vpack.c.bf16 %v2458_v12, %v2457_v11  ;;  %v2441_v15 = vld [vmem:[%s4695_s8 + $0x40] sm:$0xff]  ;;  %v3339_v11 = vpack.c.bf16 %v2560_v29, %v2559_v28 }
0x1220   :  { %3204 = vmatpush1.bf16.msra.mxu1 %v3203_v26  ;;  %v2460_v26 = vld [vmem:[%s4695_s8 + $0xd8] sm:$0xff] }
0x1221   :  { %3317 = vmatprep.subr.bf16.mxu1 %v3803_v1 }
0x125b   :  { %v2045_v31 = vpop.permute.xlu0 %2044 }
0x125c   :  { %v2029_v33 = vpop.permute.xlu1 %2028  ;;  %2047 = vst.msk [vmem:[#allocation4 + $0x18] sm:$0xff] %vm2022_vm12, %v2045_v31  ;;  %v3303_v31 = vpack.c.bf16 %v2442_v16, %v2441_v15 }
0x125d   :  { %2031 = vst.msk [vmem:[#allocation4 + $0x8] sm:$0xff] %vm2022_vm12, %v2029_v33  ;;  %v3305_v33 = vpack.c.bf16 %v2460_v26, %v2459_v17  ;;  %v2813_v26 = vld [vmem:[#allocation5] ss:$0 sm:$0xff] }
0x125f   :  { %v2037_v34 = vpop.permute.xlu0 %2036 }
0x1260   :  { %v2020_v35 = vpop.permute.xlu1 %2019  ;;  %2039 = vst.msk [vmem:[#allocation4 + $0x10] sm:$0xff] %vm2022_vm12, %v2037_v34  ;;  %v2443_v34 = vld [vmem:[%s4695_s8 + $0x50] sm:$0xff] }
0x1261   :  { %2023 = vst.msk [vmem:[#allocation4] sm:$0xff] %vm2022_vm12, %v2020_v35  ;;  %v2444_v35 = vld [vmem:[%s4695_s8 + $0x58] sm:$0xff] }
0x1262   :  { %v3307_v36 = vpack.c.bf16 %v2444_v35, %v2443_v34 }
0x1263   :  { %v2053_v39 = vld [vmem:[#allocation4 + $0x18] sm:$0xff] }
0x1264   :  { %v2051_v40 = vld [vmem:[#allocation4 + $0x8] sm:$0xff]  ;;  %2349 = vmatprep.mubr.f32.mxu0 %v2053_v39  ;;  %v3309_v39 = vpack.c.bf16 %v2462_v38, %v2461_v37 }
0x1265   :  { %2278 = vmatprep.mubr.f32.mxu1 %v2051_v40  ;;  %v2446_v40 = vld [vmem:[%s4695_s8 + $0x68] sm:$0xff] }
0x1267   :  { %v2052_v46 = vld [vmem:[#allocation4 + $0x10] sm:$0xff] }
0x1268   :  { %v2050_v48 = vld [vmem:[#allocation4] sm:$0xff]  ;;  %2350 = vmatmul.mubr.f32.vlgmr.msra.gmra.mrb[0].mxu0 %v2052_v46 }
0x1269   :  { %2279 = vmatmul.mubr.f32.vlgmr.msra.gmra.mrb[0].mxu1 %v2050_v48  ;;  %3272 = vmatpush1.bf16.msra.mxu0 %v3271_v41  ;;  %v3311_v41 = vpack.c.bf16 %v2446_v40, %v2445_v10  ;;  %v2448_v46 = vld [vmem:[%s4695_s8 + $0x78] sm:$0xff]  ;;  %v2545_v48 = vld [vmem:[%s4697_s10] sm:$0xff] }
0x126a   :  { %2420 = vmatprep.mubr.f32.mxu0 %v3805_v2  ;;  %3274 = vmatprep.subr.bf16.mxu0 %v3273_v42  ;;  %v2463_v42 = vld [vmem:[%s4695_s8 + $0xf0] sm:$0xff]  ;;  %v3315_v18 = vpack.c.bf16 %v2448_v46, %v2447_v45 }
0x126b   :  { %2966 = vmatprep.mubr.msk.f32.mxu1 %vm3804_vm0, %v3805_v2  ;;  %v3285_v2 = vpack.c.bf16 %v2450_v60, %v2449_v59  ;;  %v3313_v44 = vpack.c.bf16 %v2464_v43, %v2463_v42  ;;  %v3327_v59 = vpack.c.bf16 %v2552_v58, %v2551_v57  ;;  %v2553_v60 = vld [vmem:[%s4697_s10 + $0x40] sm:$0xff]  ;;  %vm2638_vm0 = vcmask 7168  }
0x126d   :  { %3276 = vmatpush1.bf16.msra.mxu0 %v3275_v49  ;;  %v2546_v49 = vld [vmem:[%s4697_s10 + $0x8] sm:$0xff] }
0x126e   :  { %3278 = vmatprep.subr.bf16.mxu0 %v3277_v50  ;;  %v2547_v50 = vld [vmem:[%s4697_s10 + $0x10] sm:$0xff]  ;;  %v3318_v51 = vpack.c.bf16 %v2546_v49, %v2545_v48 }
0x126f   :  { %v3321_v53 = vpack.c.bf16 %v2548_v52, %v2547_v50 }
0x1270   :  { %3319 = vmatpush3.bf16.msra.mxu1 %v3318_v51 }
0x1271   :  { %3280 = vmatpush1.bf16.msra.mxu0 %v3279_v55  ;;  %3320 = vmatprep.subr.bf16.mxu1 %v3803_v1  ;;  %v2550_v55 = vld [vmem:[%s4697_s10 + $0x28] sm:$0xff] }
0x1272   :  { %3282 = vmatprep.subr.bf16.mxu0 %v3281_v56  ;;  %v3324_v56 = vpack.c.bf16 %v2550_v55, %v2549_v54 }
0x1274   :  { %3322 = vmatpush3.bf16.msra.mxu1 %v3321_v53 }
0x1275   :  { %3284 = vmatpush1.bf16.msra.mxu0 %v3283_v61  ;;  %3323 = vmatprep.subr.bf16.mxu1 %v3803_v1  ;;  %v2554_v61 = vld [vmem:[%s4697_s10 + $0x48] sm:$0xff] }
0x1276   :  { %3286 = vmatprep.subr.bf16.mxu0 %v3285_v2  ;;  %v3330_v2 = vpack.c.bf16 %v2554_v61, %v2553_v60 }
0x1278   :  { %2811 = vmatmul.mubr.msk.f32.vlgmr.msra.gmra.mrb[0].mxu0 %vm288_vm3, %v2054_v21  ;;  %3325 = vmatpush3.bf16.msra.mxu1 %v3324_v56 }
0x1279   :  { %3288 = vmatpush3.bf16.msra.mxu0 %v3287_v22  ;;  %3326 = vmatprep.subr.bf16.mxu1 %v3803_v1  ;;  %v2199_v22 = vld [vmem:[%s4694_s7] sm:$0x3] }
0x127a   :  { %3290 = vmatprep.subr.bf16.mxu0 %v3289_v23  ;;  %v2204_v23 = vrot.slane %v2199_v22, %v4081_v30  ;;  %v2208_v24 = vrot.slane %v2199_v22, %v4086_v32  ;;  %v2557_v30 = vld [vmem:[%s4697_s10 + $0x60] sm:$0xff]  ;;  %v2558_v32 = vld [vmem:[%s4697_s10 + $0x68] sm:$0xff] }
0x127c   :  { %3328 = vmatpush3.bf16.msra.mxu1 %v3327_v59 }
0x127d   :  { %3292 = vmatpush3.bf16.msra.mxu0 %v3291_v4  ;;  %3329 = vmatprep.subr.bf16.mxu1 %v3803_v1 }
0x127e   :  { %3294 = vmatprep.subr.bf16.mxu0 %v3293_v5 }
0x1280   :  { %3331 = vmatpush3.bf16.msra.mxu1 %v3330_v2 }
0x1281   :  { %3296 = vmatpush3.bf16.msra.mxu0 %v3295_v19  ;;  %3332 = vmatprep.subr.bf16.mxu1 %v3803_v1 }
0x1282   :  { %3298 = vmatprep.subr.bf16.mxu0 %v3297_v63  ;;  %v3336_v63 = vpack.c.bf16 %v2558_v32, %v2557_v30 }
0x1284   :  { %3334 = vmatpush3.bf16.msra.mxu1 %v3333_v0 }
0x1285   :  { %3300 = vmatpush3.bf16.msra.mxu0 %v3299_v13  ;;  %3335 = vmatprep.subr.bf16.mxu1 %v3803_v1  ;;  %v2812_v13 = vld [vmem:[%s4696_s9] ss:$0 sm:$0xff] }
0x1286   :  { %3302 = vmatprep.subr.bf16.mxu0 %v3301_v14 }
0x1288   :  { %3337 = vmatpush3.bf16.msra.mxu1 %v3336_v63 }
0x1289   :  { %3304 = vmatpush3.bf16.msra.mxu0 %v3303_v31  ;;  %3338 = vmatprep.subr.bf16.mxu1 %v3803_v1 }
0x128a   :  { %3306 = vmatprep.subr.bf16.mxu0 %v3305_v33 }
0x128c   :  { %3340 = vmatpush3.bf16.msra.mxu1 %v3339_v11 }
0x128d   :  { %3308 = vmatpush3.bf16.msra.mxu0 %v3307_v36 }
0x128e   :  { %3310 = vmatprep.subr.bf16.mxu0 %v3309_v39 }
0x1291   :  { %3312 = vmatpush3.bf16.msra.mxu0 %v3311_v41 }
0x1292   :  { %3314 = vmatprep.subr.bf16.mxu0 %v3313_v44 }
0x1295   :  { %3316 = vmatpush3.bf16.msra.mxu0 %v3315_v18 }
0x133c   :  { %v2280_v20 = vpop.f32.mrb[0].mxu1 }
0x133d   :  { %v2282_v21 = vpop.f32.mrb[1].mxu1  ;;  %v2281_v25 = vadd.f32 %v2280_v20, %v2204_v23 }
0x133e   :  { %v2283_v27 = vadd.f32 %v2282_v21, %v2208_v24 }
0x134b   :  { %v2422_v3 = vpop.f32.mrb[0].mxu0 }
0x134c   :  { %v3374_v4 = vadd.f32 %v2422_v3, %v2281_v25  ;;  %v2424_v5 = vpop.f32.mrb[1].mxu0 }
0x134d   :  { %v3376_v6 = vadd.f32 %v2424_v5, %v2283_v27 }
0x134e   :  { %v2429_v7 = vmul.f32 0.01, %v3374_v4  ;;  %vm2427_vm13 = vcmp.gt.f32.partialorder %v3374_v4, 0.0 }
0x134f   :  { %v2430_v8 = vmul.f32 0.01, %v3376_v6  ;;  %vm2428_vm14 = vcmp.gt.f32.partialorder %v3376_v6, 0.0 }
0x1350   :  { %v2431_v19 = vsel %vm2427_vm13, %v3374_v4, %v2429_v7 }
0x1351   :  { %v2432_v9 = vsel %vm2428_vm14, %v3376_v6, %v2430_v8 }
0x1352   :  { %2536 = vmatprep.mubr.f32.mxu0 %v2432_v9 }
0x1353   :  { %2537 = vmatmul.mubr.f32.vlgmr.msra.gmra.mrb[2].mxu0 %v2431_v19 }
0x1426   :  { %v2869_v12 = vpop.f32.mrb[2].mxu0 }
0x1427   :  { %v2870_v14 = vpop.f32.mrb[3].mxu0 }
0x1428   :  { %v2871_v15 = vadd.f32 %v2870_v14, %v2869_v12 }
0x142a   :  { %v2539_v16 = vadd.f32 %v2871_v15, %v2812_v13 }
0x142c   :  { %v2543_v17 = vmul.f32 0.01, %v2539_v16  ;;  %vm2542_vm15 = vcmp.gt.f32.partialorder %v2539_v16, 0.0 }
0x142e   :  { %v2544_v1 = vsel %vm2542_vm15, %v2539_v16, %v2543_v17 }
0x142f   :  { %2967 = vmatmul.mubr.f32.vlgmr.msra.gmra.mrb[2].mxu1 %v2544_v1 }
0x1502   :  { %v2634_v31 = vpop.f32.mrb[2].mxu1 }
0x1503   :  { %v2635_v33 = vadd.f32 %v2813_v26, %v2634_v31  ;;  %v2968_v34 = vpop.f32.mrb[3].mxu1 }
0x1505   :  { %2639 = vst.msk [vmem:[%s4699_s12] sm:$0xff] %vm2638_vm0, %v2635_v33 }
0x1506   :  { %2644 = vsyncpa [#allocation7], 1 }
0x1507   :  { %2645 = vsyncpa [#allocation9], 1 }
0x1508   :  { %2646 = vsyncpa [#allocation12], 1 }

</bundles_post_ra>
